<compile_context>
chip_gen: v7x
topology: tpu7x:2x2x1
jax: 0.10.0
libtpu: 0.0.40
codegen_flags: <defaults>
</compile_context>

<pallas_src>
import functools

import jax
import jax.numpy as jnp
import numpy as np
from jax import lax
from jax.experimental import pallas as pl
from jax.experimental.pallas import tpu as pltpu


def _round_up(x, m):
    return (x + m - 1) // m * m


# -----------------------------------------------------------------------------
# Pallas kernel: fused 3x3 same-pad conv (BN scale pre-folded) + bias + ReLU.
#
# Flattened-image trick: with the padded image flattened over (H+2, wp), the
# patch for tap (ky, kx) of a row tile is a contiguous 2-D slice starting at
# row_base + ky*wp + kx.  The 9 patches are packed along lanes into one
# (m, 9*Cin) im2col slab so the conv is a single MXU matmul with K = 9*Cin.
# Output rows whose column index lands on the horizontal padding columns are
# garbage and are sliced off in the wrapper.
# -----------------------------------------------------------------------------
def _conv3x3_bn_relu_kernel(x_ref, w_ref, b_ref, o_ref, col_ref, *, th, wp, cin):
    # x_ref:   (P, Cin)        padded image of this batch element, flattened;
    #                          P = (H+2)*wp + slack.  Resident per batch.
    # w_ref:   (9*Cin, Coutp)  conv weights with BN scale folded, tap-major K.
    # b_ref:   (1, Coutp)      folded BN bias (f32).
    # o_ref:   (th*wp, Coutp)  conv+BN+ReLU rows for this tile (cols >= W junk).
    # col_ref: (th*wp, 9*Cin)  VMEM im2col scratch.
    m = th * wp                                    # matmul M for this row tile
    row_base = pl.multiple_of(pl.program_id(1) * m, m)
    for k in range(9):                             # static unroll: 9 VMEM copies
        ky, kx = divmod(k, 3)
        col_ref[:, k * cin:(k + 1) * cin] = \
            x_ref[pl.ds(row_base + ky * wp + kx, m), :]
    # single MXU matmul, f32 accumulation
    acc = jnp.dot(col_ref[...], w_ref[...], preferred_element_type=jnp.float32)
    # folded BN bias + ReLU (f32), one store
    o_ref[...] = jnp.maximum(acc + b_ref[...], 0.0).astype(o_ref.dtype)


def _chip_budget():
    """(target matmul rows per tile, scoped VMEM limit bytes) for this chip."""
    try:
        vmem = int(pltpu.get_tpu_info().vmem_capacity_bytes)
    except Exception:
        vmem = 64 * 1024 * 1024
    if vmem >= 128 * 1024 * 1024:          # v5e / v6e: 128 MiB physical VMEM
        return 2048, 80 * 1024 * 1024
    return 1024, 40 * 1024 * 1024          # v7x-class: 64 MiB physical VMEM


def _pick_row_tile(h, wp, target_rows):
    """Largest divisor `th` of H with th*wp <= target matmul rows.  Since wp is
    a multiple of 8, th*wp is sublane-aligned for every divisor, so th=1 is
    always a valid fallback (no H padding needed)."""
    best = 1
    limit = max(target_rows, wp)
    for d in range(1, h + 1):
        if h % d == 0 and d * wp <= limit:
            best = d
    return best


def conv_bn_act_2x(x_nchw, w_oihw, gamma, beta, run_mean, run_var, *, eps=1e-5,
                   upsample=True, compute_dtype=jnp.bfloat16, out_dtype=None,
                   target_rows=None, vmem_limit_bytes=None):
    """FPNSegmentationBlock: ConvBnAct(3x3, no conv bias, inference BN, ReLU)
    optionally followed by UpsamplingNearest2d(scale_factor=2)."""
    B, Cin, H, W = x_nchw.shape
    Cout = w_oihw.shape[0]
    out_dtype = compute_dtype if out_dtype is None else out_dtype
    if target_rows is None or vmem_limit_bytes is None:
        tr, vl = _chip_budget()
        target_rows = tr if target_rows is None else target_rows
        vmem_limit_bytes = vl if vmem_limit_bytes is None else vmem_limit_bytes

    # Lane-dense stores for big Cout; small heads keep the true channel count
    # so we don't write 128/Cout x padded zeros to HBM.
    Coutp = Cout if (Cout < 128 or Cout % 128 == 0) else _round_up(Cout, 128)
    wp = _round_up(W + 2, 8)               # padded row width, sublane-aligned
    TH = _pick_row_tile(H, wp, target_rows)
    n_row_tiles = H // TH
    m_tile = TH * wp

    # ---- glue: fold inference BatchNorm into the conv weights + a bias ------
    inv_std = 1.0 / jnp.sqrt(run_var.astype(jnp.float32) + eps)
    scale = gamma.astype(jnp.float32) * inv_std
    bias = beta.astype(jnp.float32) - run_mean.astype(jnp.float32) * scale
    # (Cout, Cin, 3, 3) -> (ky, kx, Cin, Cout) -> (9*Cin, Cout); fold scale in.
    # Tap-major K ordering matches the kernel's im2col packing (k = ky*3+kx).
    w = jnp.transpose(w_oihw.astype(jnp.float32), (2, 3, 1, 0))
    w = w.reshape(9 * Cin, Cout) * scale[None, :]
    w = jnp.pad(w, ((0, 0), (0, Coutp - Cout))).astype(compute_dtype)
    bias = jnp.pad(bias, (0, Coutp - Cout)).reshape(1, Coutp).astype(jnp.float32)

    # ---- glue: NCHW -> zero-padded NHWC, flattened over spatial dims --------
    x = jnp.transpose(x_nchw, (0, 2, 3, 1)).astype(compute_dtype)   # NHWC
    x = jnp.pad(x, ((0, 0), (1, 1), (1, wp - W - 1), (0, 0)))       # pad = 1 (+align)
    x = x.reshape(B, (H + 2) * wp, Cin)
    x = jnp.pad(x, ((0, 0), (0, 8), (0, 0)))   # slack so the last tile's
    P = x.shape[1]                             # +2*wp+2 shifted slice stays in bounds

    kernel = functools.partial(_conv3x3_bn_relu_kernel, th=TH, wp=wp, cin=Cin)
    y = pl.pallas_call(
        kernel,
        out_shape=jax.ShapeDtypeStruct((B, H * wp, Coutp), out_dtype),
        grid_spec=pltpu.PrefetchScalarGridSpec(
            num_scalar_prefetch=0,
            grid=(B, n_row_tiles),
            in_specs=[
                # whole padded image: DMA'd once per batch element, resident
                # across the row-tile axis (index_map constant in r).
                pl.BlockSpec((None, P, Cin), lambda b, r: (b, 0, 0)),
                pl.BlockSpec((9 * Cin, Coutp), lambda b, r: (0, 0)),
                pl.BlockSpec((1, Coutp), lambda b, r: (0, 0)),
            ],
            out_specs=pl.BlockSpec((None, m_tile, Coutp),
                                   lambda b, r: (b, r, 0)),
            scratch_shapes=[pltpu.VMEM((m_tile, 9 * Cin), compute_dtype)],
        ),
        compiler_params=pltpu.CompilerParams(
            # batch axis "parallel" (megacore); row-tile axis "arbitrary" so a
            # core never has to re-DMA the whole resident image.
            dimension_semantics=("parallel", "arbitrary"),
            vmem_limit_bytes=vmem_limit_bytes,
        ),
    )(x, w, bias)

    # ---- glue: drop pad columns / pad channels, 2x nearest upsample, NCHW ---
    y = y.reshape(B, H, wp, Coutp)[:, :, :W, :Cout]
    if upsample:
        y = jnp.broadcast_to(y[:, :, None, :, None, :], (B, H, 2, W, 2, Cout))
        y = y.reshape(B, 2 * H, 2 * W, Cout)
    return jnp.transpose(y, (0, 3, 1, 2))                           # NHWC->NCHW


def fpn_segmentation_branch(residuals, params, **kwargs):
    """FPNSegmentationBranch.forward(x, residuals): one layer per pyramid
    level; every layer but the last includes the 2x nearest upsample."""
    features = []
    n = min(len(residuals), len(params))
    for i in range(n):
        features.append(conv_bn_act_2x(residuals[i], *params[i],
                                       upsample=i < len(params) - 1, **kwargs))
    return features


# ---------------------------- pure-JAX reference -----------------------------
def _reference_block(x, w, gamma, beta, mean, var, *, eps=1e-5, upsample=True):
    y = lax.conv_general_dilated(
        x, w, window_strides=(1, 1), padding=((1, 1), (1, 1)),
        dimension_numbers=("NCHW", "OIHW", "NCHW"))
    inv_std = 1.0 / jnp.sqrt(var + eps)
    scale = (gamma * inv_std).reshape(1, -1, 1, 1)
    bias = (beta - mean * gamma * inv_std).reshape(1, -1, 1, 1)
    y = jnp.maximum(y * scale + bias, 0.0)
    if upsample:
        y = jnp.repeat(jnp.repeat(y, 2, axis=2), 2, axis=3)
    return y


def _reference_branch(residuals, params):
    return [_reference_block(residuals[i], *params[i],
                             upsample=i < len(params) - 1)
            for i in range(min(len(residuals), len(params)))]


if __name__ == "__main__":
    B, Cin, Cout, depth = 2, 4, 8, 3
    spatial = [16, 8, 4, 2]        # one residual feature map per pyramid level

    key = jax.random.PRNGKey(0)
    residuals = []
    for s in spatial:
        key, sub = jax.random.split(key)
        residuals.append(jax.random.normal(sub, (B, Cin, s, s), jnp.float32))

    params = []
    for li in range(depth + 1):    # depth upsampling layers + final ConvBnAct
        key, sub = jax.random.split(key)
        w = jax.random.normal(sub, (Cout, Cin, 3, 3), jnp.float32) * 0.1
        gamma = jnp.linspace(0.5, 1.5, Cout, dtype=jnp.float32) + 0.01 * li
        beta = jnp.linspace(-0.2, 0.2, Cout, dtype=jnp.float32) - 0.01 * li
        mean = jnp.linspace(-0.1, 0.1, Cout, dtype=jnp.float32)
        var = jnp.linspace(0.5, 1.5, Cout, dtype=jnp.float32)
        params.append((w, gamma, beta, mean, var))

    ref = jax.block_until_ready(_reference_branch(residuals, params))

    # strict semantic check: f32 compute path vs f32 XLA reference
    out_f32 = jax.block_until_ready(
        fpn_segmentation_branch(residuals, params, compute_dtype=jnp.float32))
    for i, (o, r) in enumerate(zip(out_f32, ref)):
        assert o.shape == r.shape, (i, o.shape, r.shape)
        np.testing.assert_allclose(np.asarray(o), np.asarray(r),
                                   rtol=1e-4, atol=1e-4)

    # default fast path: bf16 inputs/weights/stores, f32 accumulation.  Loose
    # check against the f32 reference -- the error is expected bf16 rounding.
    out_bf16 = jax.block_until_ready(fpn_segmentation_branch(residuals, params))
    for o, r in zip(out_bf16, ref):
        o32 = np.asarray(o.astype(jnp.float32))
        np.testing.assert_allclose(o32, np.asarray(r), rtol=5e-2, atol=5e-2)

    expect = ([(B, Cout, 2 * s, 2 * s) for s in spatial[:depth]]
              + [(B, Cout, spatial[depth], spatial[depth])])
    assert [tuple(o.shape) for o in out_bf16] == expect, \
        ([tuple(o.shape) for o in out_bf16], expect)
    print("KERNEL_OK")
</pallas_src>

<mosaic_0001>
module attributes {stable_mosaic.version = 11 : i64} {
  func.func @_conv3x3_bn_relu_kernel(%arg0: i32, %arg1: i32, %arg2: memref<1x440x4xf32, #tpu.memory_space<vmem>>, %arg3: memref<36x8xf32, #tpu.memory_space<vmem>>, %arg4: memref<1x8xf32, #tpu.memory_space<vmem>>, %arg5: memref<1x384x8xf32, #tpu.memory_space<vmem>>, %arg6: memref<384x36xf32, #tpu.memory_space<vmem>>) attributes {dimension_semantics = [#tpu.dimension_semantics<parallel>, #tpu.dimension_semantics<arbitrary>], iteration_bounds = array<i64: 2, 1>, scalar_prefetch = 0 : i64, scratch_operands = 1 : i64, tpu.core_type = #tpu.core_type<tc>, window_params = [{transform_indices = @transform_0, window_bounds = array<i64: 1, 440, 4>}, {pipeline_mode = #tpu.pipeline_mode<synchronous>, transform_indices = @transform_1, window_bounds = array<i64: 36, 8>}, {pipeline_mode = #tpu.pipeline_mode<synchronous>, transform_indices = @transform_2, window_bounds = array<i64: 1, 8>}, {transform_indices = @transform_3, window_bounds = array<i64: 1, 384, 8>}]} {
    %c384_i32 = arith.constant 384 : i32
    %0 = arith.muli %arg1, %c384_i32 : i32
    %1 = tpu.assume_multiple %0, 384 : i32
    %c0_i32 = arith.constant 0 : i32
    %2 = arith.addi %1, %c0_i32 : i32
    %c0_i32_0 = arith.constant 0 : i32
    %3 = arith.addi %2, %c0_i32_0 : i32
    %c0 = arith.constant 0 : index
    %4 = arith.index_cast %3 : i32 to index
    %c0_1 = arith.constant 0 : index
    %5 = vector.load %arg2[%c0, %4, %c0_1] : memref<1x440x4xf32, #tpu.memory_space<vmem>>, vector<1x384x4xf32>
    %6 = vector.shape_cast %5 : vector<1x384x4xf32> to vector<384x4xf32>
    %c0_2 = arith.constant 0 : index
    %c0_3 = arith.constant 0 : index
    %7 = vector.load %arg6[%c0_2, %c0_3] : memref<384x36xf32, #tpu.memory_space<vmem>>, vector<384x4xf32>
    tpu.vector_store %arg6[%c0_2, %c0_3], %6 {strides = array<i32>} : memref<384x36xf32, #tpu.memory_space<vmem>>, vector<384x4xf32>,
    %c0_i32_4 = arith.constant 0 : i32
    %8 = arith.addi %1, %c0_i32_4 : i32
    %c1_i32 = arith.constant 1 : i32
    %9 = arith.addi %8, %c1_i32 : i32
    %c0_5 = arith.constant 0 : index
    %10 = arith.index_cast %9 : i32 to index
    %c0_6 = arith.constant 0 : index
    %11 = vector.load %arg2[%c0_5, %10, %c0_6] : memref<1x440x4xf32, #tpu.memory_space<vmem>>, vector<1x384x4xf32>
    %12 = vector.shape_cast %11 : vector<1x384x4xf32> to vector<384x4xf32>
    %c0_7 = arith.constant 0 : index
    %c4 = arith.constant 4 : index
    %13 = vector.load %arg6[%c0_7, %c4] : memref<384x36xf32, #tpu.memory_space<vmem>>, vector<384x4xf32>
    tpu.vector_store %arg6[%c0_7, %c4], %12 {strides = array<i32>} : memref<384x36xf32, #tpu.memory_space<vmem>>, vector<384x4xf32>,
    %c0_i32_8 = arith.constant 0 : i32
    %14 = arith.addi %1, %c0_i32_8 : i32
    %c2_i32 = arith.constant 2 : i32
    %15 = arith.addi %14, %c2_i32 : i32
    %c0_9 = arith.constant 0 : index
    %16 = arith.index_cast %15 : i32 to index
    %c0_10 = arith.constant 0 : index
    %17 = vector.load %arg2[%c0_9, %16, %c0_10] : memref<1x440x4xf32, #tpu.memory_space<vmem>>, vector<1x384x4xf32>
    %18 = vector.shape_cast %17 : vector<1x384x4xf32> to vector<384x4xf32>
    %c0_11 = arith.constant 0 : index
    %c8 = arith.constant 8 : index
    %19 = vector.load %arg6[%c0_11, %c8] : memref<384x36xf32, #tpu.memory_space<vmem>>, vector<384x4xf32>
    tpu.vector_store %arg6[%c0_11, %c8], %18 {strides = array<i32>} : memref<384x36xf32, #tpu.memory_space<vmem>>, vector<384x4xf32>,
    %c24_i32 = arith.constant 24 : i32
    %20 = arith.addi %1, %c24_i32 : i32
    %c0_i32_12 = arith.constant 0 : i32
    %21 = arith.addi %20, %c0_i32_12 : i32
    %c0_13 = arith.constant 0 : index
    %22 = arith.index_cast %21 : i32 to index
    %c0_14 = arith.constant 0 : index
    %23 = vector.load %arg2[%c0_13, %22, %c0_14] : memref<1x440x4xf32, #tpu.memory_space<vmem>>, vector<1x384x4xf32>
    %24 = vector.shape_cast %23 : vector<1x384x4xf32> to vector<384x4xf32>
    %c0_15 = arith.constant 0 : index
    %c12 = arith.constant 12 : index
    %25 = vector.load %arg6[%c0_15, %c12] : memref<384x36xf32, #tpu.memory_space<vmem>>, vector<384x4xf32>
    tpu.vector_store %arg6[%c0_15, %c12], %24 {strides = array<i32>} : memref<384x36xf32, #tpu.memory_space<vmem>>, vector<384x4xf32>,
    %c24_i32_16 = arith.constant 24 : i32
    %26 = arith.addi %1, %c24_i32_16 : i32
    %c1_i32_17 = arith.constant 1 : i32
    %27 = arith.addi %26, %c1_i32_17 : i32
    %c0_18 = arith.constant 0 : index
    %28 = arith.index_cast %27 : i32 to index
    %c0_19 = arith.constant 0 : index
    %29 = vector.load %arg2[%c0_18, %28, %c0_19] : memref<1x440x4xf32, #tpu.memory_space<vmem>>, vector<1x384x4xf32>
    %30 = vector.shape_cast %29 : vector<1x384x4xf32> to vector<384x4xf32>
    %c0_20 = arith.constant 0 : index
    %c16 = arith.constant 16 : index
    %31 = vector.load %arg6[%c0_20, %c16] : memref<384x36xf32, #tpu.memory_space<vmem>>, vector<384x4xf32>
    tpu.vector_store %arg6[%c0_20, %c16], %30 {strides = array<i32>} : memref<384x36xf32, #tpu.memory_space<vmem>>, vector<384x4xf32>,
    %c24_i32_21 = arith.constant 24 : i32
    %32 = arith.addi %1, %c24_i32_21 : i32
    %c2_i32_22 = arith.constant 2 : i32
    %33 = arith.addi %32, %c2_i32_22 : i32
    %c0_23 = arith.constant 0 : index
    %34 = arith.index_cast %33 : i32 to index
    %c0_24 = arith.constant 0 : index
    %35 = vector.load %arg2[%c0_23, %34, %c0_24] : memref<1x440x4xf32, #tpu.memory_space<vmem>>, vector<1x384x4xf32>
    %36 = vector.shape_cast %35 : vector<1x384x4xf32> to vector<384x4xf32>
    %c0_25 = arith.constant 0 : index
    %c20 = arith.constant 20 : index
    %37 = vector.load %arg6[%c0_25, %c20] : memref<384x36xf32, #tpu.memory_space<vmem>>, vector<384x4xf32>
    tpu.vector_store %arg6[%c0_25, %c20], %36 {strides = array<i32>} : memref<384x36xf32, #tpu.memory_space<vmem>>, vector<384x4xf32>,
    %c48_i32 = arith.constant 48 : i32
    %38 = arith.addi %1, %c48_i32 : i32
    %c0_i32_26 = arith.constant 0 : i32
    %39 = arith.addi %38, %c0_i32_26 : i32
    %c0_27 = arith.constant 0 : index
    %40 = arith.index_cast %39 : i32 to index
    %c0_28 = arith.constant 0 : index
    %41 = vector.load %arg2[%c0_27, %40, %c0_28] : memref<1x440x4xf32, #tpu.memory_space<vmem>>, vector<1x384x4xf32>
    %42 = vector.shape_cast %41 : vector<1x384x4xf32> to vector<384x4xf32>
    %c0_29 = arith.constant 0 : index
    %c24 = arith.constant 24 : index
    %43 = vector.load %arg6[%c0_29, %c24] : memref<384x36xf32, #tpu.memory_space<vmem>>, vector<384x4xf32>
    tpu.vector_store %arg6[%c0_29, %c24], %42 {strides = array<i32>} : memref<384x36xf32, #tpu.memory_space<vmem>>, vector<384x4xf32>,
    %c48_i32_30 = arith.constant 48 : i32
    %44 = arith.addi %1, %c48_i32_30 : i32
    %c1_i32_31 = arith.constant 1 : i32
    %45 = arith.addi %44, %c1_i32_31 : i32
    %c0_32 = arith.constant 0 : index
    %46 = arith.index_cast %45 : i32 to index
    %c0_33 = arith.constant 0 : index
    %47 = vector.load %arg2[%c0_32, %46, %c0_33] : memref<1x440x4xf32, #tpu.memory_space<vmem>>, vector<1x384x4xf32>
    %48 = vector.shape_cast %47 : vector<1x384x4xf32> to vector<384x4xf32>
    %c0_34 = arith.constant 0 : index
    %c28 = arith.constant 28 : index
    %49 = vector.load %arg6[%c0_34, %c28] : memref<384x36xf32, #tpu.memory_space<vmem>>, vector<384x4xf32>
    tpu.vector_store %arg6[%c0_34, %c28], %48 {strides = array<i32>} : memref<384x36xf32, #tpu.memory_space<vmem>>, vector<384x4xf32>,
    %c48_i32_35 = arith.constant 48 : i32
    %50 = arith.addi %1, %c48_i32_35 : i32
    %c2_i32_36 = arith.constant 2 : i32
    %51 = arith.addi %50, %c2_i32_36 : i32
    %c0_37 = arith.constant 0 : index
    %52 = arith.index_cast %51 : i32 to index
    %c0_38 = arith.constant 0 : index
    %53 = vector.load %arg2[%c0_37, %52, %c0_38] : memref<1x440x4xf32, #tpu.memory_space<vmem>>, vector<1x384x4xf32>
    %54 = vector.shape_cast %53 : vector<1x384x4xf32> to vector<384x4xf32>
    %c0_39 = arith.constant 0 : index
    %c32 = arith.constant 32 : index
    %55 = vector.load %arg6[%c0_39, %c32] : memref<384x36xf32, #tpu.memory_space<vmem>>, vector<384x4xf32>
    tpu.vector_store %arg6[%c0_39, %c32], %54 {strides = array<i32>} : memref<384x36xf32, #tpu.memory_space<vmem>>, vector<384x4xf32>,
    %c0_40 = arith.constant 0 : index
    %c0_41 = arith.constant 0 : index
    %56 = vector.load %arg6[%c0_40, %c0_41] : memref<384x36xf32, #tpu.memory_space<vmem>>, vector<384x36xf32>
    %c0_42 = arith.constant 0 : index
    %c0_43 = arith.constant 0 : index
    %57 = vector.load %arg3[%c0_42, %c0_43] : memref<36x8xf32, #tpu.memory_space<vmem>>, vector<36x8xf32>
    %cst = arith.constant dense<0.000000e+00> : vector<384x8xf32>
    %58 = tpu.matmul %56, %57, %cst {dimension_numbers = #tpu.dot_dimension_numbers<[1], [0], [0], [1], [0, 0, 1, 1], [], []>} : vector<384x36xf32>, vector<36x8xf32>, vector<384x8xf32> -> vector<384x8xf32>
    %c0_44 = arith.constant 0 : index
    %c0_45 = arith.constant 0 : index
    %59 = vector.load %arg4[%c0_44, %c0_45] : memref<1x8xf32, #tpu.memory_space<vmem>>, vector<1x8xf32>
    %60 = vector.broadcast %59 : vector<1x8xf32> to vector<384x8xf32>
    %61 = arith.addf %58, %60 : vector<384x8xf32>
    %cst_46 = arith.constant 0.000000e+00 : f32
    %62 = vector.broadcast %cst_46 : f32 to vector<384x8xf32>
    %63 = arith.maximumf %61, %62 : vector<384x8xf32>
    %c0_47 = arith.constant 0 : index
    %c0_48 = arith.constant 0 : index
    %c0_49 = arith.constant 0 : index
    %64 = vector.load %arg5[%c0_47, %c0_48, %c0_49] : memref<1x384x8xf32, #tpu.memory_space<vmem>>, vector<1x384x8xf32>
    %65 = vector.shape_cast %64 : vector<1x384x8xf32> to vector<384x8xf32>
    %66 = vector.shape_cast %63 : vector<384x8xf32> to vector<1x384x8xf32>
    tpu.vector_store %arg5[%c0_47, %c0_48, %c0_49], %66 {strides = array<i32>} : memref<1x384x8xf32, #tpu.memory_space<vmem>>, vector<1x384x8xf32>,
    return
  }
  func.func @transform_0(%arg0: i32, %arg1: i32) -> (i32, i32, i32) {
    %c0_i32 = arith.constant 0 : i32
    %c0_i32_0 = arith.constant 0 : i32
    %c0_i32_1 = arith.constant 0 : i32
    return %arg0, %c0_i32, %c0_i32_0 : i32, i32, i32
  }
  func.func @transform_1(%arg0: i32, %arg1: i32) -> (i32, i32) {
    %c0_i32 = arith.constant 0 : i32
    %c0_i32_0 = arith.constant 0 : i32
    %c0_i32_1 = arith.constant 0 : i32
    return %c0_i32, %c0_i32_0 : i32, i32
  }
  func.func @transform_2(%arg0: i32, %arg1: i32) -> (i32, i32) {
    %c0_i32 = arith.constant 0 : i32
    %c0_i32_0 = arith.constant 0 : i32
    %c0_i32_1 = arith.constant 0 : i32
    return %c0_i32, %c0_i32_0 : i32, i32
  }
  func.func @transform_3(%arg0: i32, %arg1: i32) -> (i32, i32, i32) {
    %c0_i32 = arith.constant 0 : i32
    %c0_i32_0 = arith.constant 0 : i32
    return %arg0, %arg1, %c0_i32 : i32, i32, i32
  }
}

</mosaic_0001>

<bundles_post_ra>
// kernel: tpu_custom_call.1
= control target key start
LH: loop header
LB: loop body
LE: loop exit
PB: predicated region body
PF: predicated region fallthrough
CT: control target
= control target key end

     0   :  { %s4017_s12 = smov 0   ;;  %s4019_s13 = smov 0   ;;  %s5740_s0 = inlined_call_operand.vmem [shape: f32[2,440,4], index: 0, kind: input, shape index: {}]   ;;  %s5741_s1 = inlined_call_operand.vmem [shape: f32[36,8], index: 1, kind: input, shape index: {}]   ;;  %s5742_s2 = inlined_call_operand.vmem [shape: f32[1,8], index: 2, kind: input, shape index: {}]   ;;  %s5743_s3 = inlined_call_operand.vmem [shape: f32[2,384,8], index: 3, kind: output, shape index: {}]  }
   0x1   :  { %s4021_s14 = smov 0  }
   0x2 LB: > { %s25_s15 = sadd.s32 1, %s3983_s13  ;;  %p3343_p0 = scmp.ge.s32.totalorder %s3987_s14, 1  ;;  %s3987_s14 = sphi %s4021_s14, %s13_s14   ;;  %s3983_s13 = sphi %s4019_s13, %s5745_s13   ;;  %s3979_s12 = sphi %s4017_s12, %s5744_s12  }
   0x3   : > { %p27_p1 = scmp.ge.s32.totalorder %s25_s15, 2  ;;  %p151_p2 = scmp.lt.s32.totalorder %s3987_s14, 3 }
   0x5   : > { %s5747_s15 = smov (%p27_p1, %s25_s15), 0  ;;  %p152_p3 = pnand %p3343_p0, %p151_p2 }
   0x6   : > { %p179_p4 = scmp.lt.s32.totalorder (!%p152_p3), %s3979_s12, 1  ;;  %s3989_s20 = smov (!%p152_p3), 4   ;;  %vm244_vm0 = vcmask (!%p152_p3), 31744   ;;  %vm535_vm1 = vcmask (!%p152_p3), 64544   ;;  %vm826_vm2 = vcmask (!%p152_p3), 97344   ;;  %vm1117_vm3 = vcmask (!%p152_p3), 130144  }
   0x7   : > { %155 = sbr.rel (%p152_p3) target bundleno = 1125 (0x465), region = 32  ;;  %s3990_s21 = smov (!%p152_p3), 8   ;;  %vm1408_vm4 = vcmask (!%p152_p3), 162944   ;;  %vm2826_vm5 = vcmask (!%p152_p3), 1043456   ;;  %vm1699_vm6 = vcmask (!%p152_p3), 195744   ;;  %vm1990_vm7 = vcmask (!%p152_p3), 228544  }
   0x8   : > { %s3991_s22 = smov (!%p152_p3), 12   ;;  %s3992_s23 = smov (!%p152_p3), 16   ;;  %vm2281_vm8 = vcmask (!%p152_p3), 261344   ;;  %vm2572_vm9 = vcmask (!%p152_p3), 294144   ;;  %vm2681_vm10 = vcmask (!%p152_p3), 293888   ;;  %vm3183_vm11 = vcmask (!%p152_p3), 64512  }
   0x9   : > { %s3993_s24 = smov (!%p152_p3), 20   ;;  %s3994_s25 = smov (!%p152_p3), 24  }
   0xa   : > { %s3995_s7 = smov (!%p152_p3), 28   ;;  %s3996_s10 = smov (!%p152_p3), 32  }
   0xe   : > { %s5749_s12 = smov (!%p179_p4, %s3979_s12), 1 }
   0xf   : > { %s3931_s16 = smul.u32 440, %s5749_s12 }
  0x10   : > { %s3932_s11 = smul.u32 384, %s5749_s12 }
  0x11   : > { %s4041_s19 = scalar_lea.vmem %s5740_s0, %s3931_s16 }
  0x12   : > { %v3348_v0 = vld [vmem:[%s4041_s19 + $0x11] sm:$0xff]  ;;  %v3346_v1 = vld [vmem:[%s4041_s19 + $0x1] sm:$0xff]  ;;  %v3349_v2 = vld [vmem:[%s4041_s19 + $0x19] sm:$0xff] }
  0x13   : > { %395 = vrot.lane.b32.xlu1 %v3348_v0, %s3989_s20  ;;  %391 = vrot.lane.b32.xlu0 %v3346_v1, %s3989_s20  ;;  %v3347_v3 = vld [vmem:[%s4041_s19 + $0x9] sm:$0xff]  ;;  %v3350_v5 = vld [vmem:[%s4041_s19 + $0x21] sm:$0xff] }
  0x14   : > { %v3351_v4 = vld [vmem:[%s4041_s19 + $0x29] sm:$0xff]  ;;  %v3353_v6 = vld [vmem:[%s4041_s19 + $0x39] sm:$0xff]  ;;  %v3352_v7 = vld [vmem:[%s4041_s19 + $0x31] sm:$0xff] }
  0x15   : > { %v3355_v8 = vld [vmem:[%s4041_s19 + $0x49] sm:$0xff]  ;;  %v3354_v9 = vld [vmem:[%s4041_s19 + $0x41] sm:$0xff]  ;;  %v3357_v10 = vld [vmem:[%s4041_s19 + $0x59] sm:$0xff] }
  0x16   : > { %v3356_v11 = vld [vmem:[%s4041_s19 + $0x51] sm:$0xff]  ;;  %v196_v13 = vld [vmem:[%s4041_s19] sm:$0xff]  ;;  %v3359_v14 = vld [vmem:[%s4041_s19 + $0x69] sm:$0xff] }
  0x17   : > { %397 = vrot.lane.b32.xlu1 %v3349_v2, %s3989_s20  ;;  %393 = vrot.lane.b32.xlu0 %v3347_v3, %s3989_s20  ;;  %v198_v12 = vld [vmem:[%s4041_s19 + $0x10] sm:$0xff]  ;;  %v3358_v15 = vld [vmem:[%s4041_s19 + $0x61] sm:$0xff]  ;;  %245 = vst.msk [vmem:[#allocation2] sm:$0xff] %vm244_vm0, %v196_v13 }
  0x18   : > { %247 = vst.msk [vmem:[#allocation2 + $0x10] sm:$0xff] %vm244_vm0, %v198_v12  ;;  %v4074_v16 = vld [vmem:[%s4041_s19 + $0x18] sm:$0xff]  ;;  %v197_v17 = vld [vmem:[%s4041_s19 + $0x8] sm:$0xff]  ;;  %v4084_v19 = vld [vmem:[%s4041_s19 + $0x20] sm:$0xff] }
  0x19   : > { %248 = vst.msk [vmem:[#allocation2 + $0x18] sm:$0xff] %vm244_vm0, %v4074_v16  ;;  %246 = vst.msk [vmem:[#allocation2 + $0x8] sm:$0xff] %vm244_vm0, %v197_v17  ;;  %v4081_v18 = vld [vmem:[%s4041_s19 + $0x28] sm:$0xff]  ;;  %v4093_v20 = vld [vmem:[%s4041_s19 + $0x38] sm:$0xff] }
  0x1a   : > { %250 = vst.msk [vmem:[#allocation2 + $0x28] sm:$0xff] %vm244_vm0, %v4081_v18  ;;  %249 = vst.msk [vmem:[#allocation2 + $0x20] sm:$0xff] %vm244_vm0, %v4084_v19  ;;  %v3361_v21 = vld [vmem:[%s4041_s19 + $0x79] sm:$0xff]  ;;  %v3360_v22 = vld [vmem:[%s4041_s19 + $0x71] sm:$0xff] }
  0x1b   : > { %401 = vrot.lane.b32.xlu1 %v3351_v4, %s3989_s20  ;;  %399 = vrot.lane.b32.xlu0 %v3350_v5, %s3989_s20  ;;  %252 = vst.msk [vmem:[#allocation2 + $0x38] sm:$0xff] %vm244_vm0, %v4093_v20  ;;  %v4100_v23 = vld [vmem:[%s4041_s19 + $0x30] sm:$0xff]  ;;  %v4105_v24 = vld [vmem:[%s4041_s19 + $0x48] sm:$0xff] }
  0x1c   : > { %251 = vst.msk [vmem:[#allocation2 + $0x30] sm:$0xff] %vm244_vm0, %v4100_v23  ;;  %v4108_v25 = vld [vmem:[%s4041_s19 + $0x40] sm:$0xff]  ;;  %254 = vst.msk [vmem:[#allocation2 + $0x48] sm:$0xff] %vm244_vm0, %v4105_v24  ;;  %v4115_v26 = vld [vmem:[%s4041_s19 + $0x58] sm:$0xff] }
  0x1d   : > { %253 = vst.msk [vmem:[#allocation2 + $0x40] sm:$0xff] %vm244_vm0, %v4108_v25  ;;  %v4118_v27 = vld [vmem:[%s4041_s19 + $0x50] sm:$0xff]  ;;  %256 = vst.msk [vmem:[#allocation2 + $0x58] sm:$0xff] %vm244_vm0, %v4115_v26  ;;  %v3362_v29 = vld [vmem:[%s4041_s19 + $0x81] sm:$0xff] }
  0x1e   : > { %v3363_v28 = vld [vmem:[%s4041_s19 + $0x89] sm:$0xff]  ;;  %255 = vst.msk [vmem:[#allocation2 + $0x50] sm:$0xff] %vm244_vm0, %v4118_v27  ;;  %v4132_v31 = vld [vmem:[%s4041_s19 + $0x60] sm:$0xff]  ;;  %v4139_v32 = vld [vmem:[%s4041_s19 + $0x78] sm:$0xff] }
  0x1f   : > { %405 = vrot.lane.b32.xlu1 %v3353_v6, %s3989_s20  ;;  %403 = vrot.lane.b32.xlu0 %v3352_v7, %s3989_s20  ;;  %v4129_v30 = vld [vmem:[%s4041_s19 + $0x68] sm:$0xff]  ;;  %257 = vst.msk [vmem:[#allocation2 + $0x60] sm:$0xff] %vm244_vm0, %v4132_v31  ;;  %v4142_v33 = vld [vmem:[%s4041_s19 + $0x70] sm:$0xff]  ;;  %260 = vst.msk [vmem:[#allocation2 + $0x78] sm:$0xff] %vm244_vm0, %v4139_v32 }
  0x20   : > { %258 = vst.msk [vmem:[#allocation2 + $0x68] sm:$0xff] %vm244_vm0, %v4129_v30  ;;  %259 = vst.msk [vmem:[#allocation2 + $0x70] sm:$0xff] %vm244_vm0, %v4142_v33  ;;  %v4149_v34 = vld [vmem:[%s4041_s19 + $0x88] sm:$0xff]  ;;  %v3365_v35 = vld [vmem:[%s4041_s19 + $0x99] sm:$0xff] }
  0x21   : > { %262 = vst.msk [vmem:[#allocation2 + $0x88] sm:$0xff] %vm244_vm0, %v4149_v34  ;;  %v4157_v36 = vld [vmem:[%s4041_s19 + $0x80] sm:$0xff]  ;;  %v3364_v37 = vld [vmem:[%s4041_s19 + $0x91] sm:$0xff]  ;;  %v4173_v40 = vld [vmem:[%s4041_s19 + $0xa8] sm:$0xff] }
  0x22   : > { %261 = vst.msk [vmem:[#allocation2 + $0x80] sm:$0xff] %vm244_vm0, %v4157_v36  ;;  %v4163_v38 = vld [vmem:[%s4041_s19 + $0x98] sm:$0xff]  ;;  %v4166_v39 = vld [vmem:[%s4041_s19 + $0x90] sm:$0xff]  ;;  %266 = vst.msk [vmem:[#allocation2 + $0xa8] sm:$0xff] %vm244_vm0, %v4173_v40 }
  0x23   : > { %409 = vrot.lane.b32.xlu1 %v3355_v8, %s3989_s20  ;;  %407 = vrot.lane.b32.xlu0 %v3354_v9, %s3989_s20  ;;  %264 = vst.msk [vmem:[#allocation2 + $0x98] sm:$0xff] %vm244_vm0, %v4163_v38  ;;  %263 = vst.msk [vmem:[#allocation2 + $0x90] sm:$0xff] %vm244_vm0, %v4166_v39  ;;  %v4178_v41 = vld [vmem:[%s4041_s19 + $0xa0] sm:$0xff]  ;;  %v4185_v42 = vld [vmem:[%s4041_s19 + $0xb8] sm:$0xff] }
  0x24   : > { %265 = vst.msk [vmem:[#allocation2 + $0xa0] sm:$0xff] %vm244_vm0, %v4178_v41  ;;  %v4188_v43 = vld [vmem:[%s4041_s19 + $0xb0] sm:$0xff]  ;;  %v3366_v45 = vld [vmem:[%s4041_s19 + $0xa1] sm:$0xff]  ;;  %268 = vst.msk [vmem:[#allocation2 + $0xb8] sm:$0xff] %vm244_vm0, %v4185_v42 }
  0x25   : > { %v3367_v44 = vld [vmem:[%s4041_s19 + $0xa9] sm:$0xff]  ;;  %267 = vst.msk [vmem:[#allocation2 + $0xb0] sm:$0xff] %vm244_vm0, %v4188_v43  ;;  %v4202_v47 = vld [vmem:[%s4041_s19 + $0xc0] sm:$0xff]  ;;  %v4207_v48 = vld [vmem:[%s4041_s19 + $0xd8] sm:$0xff] }
  0x26   : > { %v4197_v46 = vld [vmem:[%s4041_s19 + $0xc8] sm:$0xff]  ;;  %269 = vst.msk [vmem:[#allocation2 + $0xc0] sm:$0xff] %vm244_vm0, %v4202_v47  ;;  %v4210_v49 = vld [vmem:[%s4041_s19 + $0xd0] sm:$0xff]  ;;  %v3369_v50 = vld [vmem:[%s4041_s19 + $0xb9] sm:$0xff] }
  0x27   : > { %413 = vrot.lane.b32.xlu1 %v3357_v10, %s3989_s20  ;;  %411 = vrot.lane.b32.xlu0 %v3356_v11, %s3989_s20  ;;  %270 = vst.msk [vmem:[#allocation2 + $0xc8] sm:$0xff] %vm244_vm0, %v4197_v46  ;;  %272 = vst.msk [vmem:[#allocation2 + $0xd8] sm:$0xff] %vm244_vm0, %v4207_v48  ;;  %v3368_v51 = vld [vmem:[%s4041_s19 + $0xb1] sm:$0xff]  ;;  %v4221_v52 = vld [vmem:[%s4041_s19 + $0xe8] sm:$0xff] }
  0x28   : > { %271 = vst.msk [vmem:[#allocation2 + $0xd0] sm:$0xff] %vm244_vm0, %v4210_v49  ;;  %v4224_v53 = vld [vmem:[%s4041_s19 + $0xe0] sm:$0xff]  ;;  %274 = vst.msk [vmem:[#allocation2 + $0xe8] sm:$0xff] %vm244_vm0, %v4221_v52  ;;  %v3371_v54 = vld [vmem:[%s4041_s19 + $0xc9] sm:$0xff] }
  0x29   : > { %273 = vst.msk [vmem:[#allocation2 + $0xe0] sm:$0xff] %vm244_vm0, %v4224_v53  ;;  %v3370_v55 = vld [vmem:[%s4041_s19 + $0xc1] sm:$0xff]  ;;  %v4235_v56 = vld [vmem:[%s4041_s19 + $0xf8] sm:$0xff]  ;;  %v4238_v57 = vld [vmem:[%s4041_s19 + $0xf0] sm:$0xff] }
  0x2a   : > { %276 = vst.msk [vmem:[#allocation2 + $0xf8] sm:$0xff] %vm244_vm0, %v4235_v56  ;;  %275 = vst.msk [vmem:[#allocation2 + $0xf0] sm:$0xff] %vm244_vm0, %v4238_v57  ;;  %v3373_v58 = vld [vmem:[%s4041_s19 + $0xd9] sm:$0xff]  ;;  %v3372_v59 = vld [vmem:[%s4041_s19 + $0xd1] sm:$0xff] }
  0x2b   : > { %417 = vrot.lane.b32.xlu1 %v3359_v14, %s3989_s20  ;;  %415 = vrot.lane.b32.xlu0 %v3358_v15, %s3989_s20  ;;  %v4249_v60 = vld [vmem:[%s4041_s19 + $0x108] sm:$0xff]  ;;  %v4252_v61 = vld [vmem:[%s4041_s19 + $0x100] sm:$0xff] }
  0x2c   : > { %278 = vst.msk [vmem:[#allocation2 + $0x108] sm:$0xff] %vm244_vm0, %v4249_v60  ;;  %277 = vst.msk [vmem:[#allocation2 + $0x100] sm:$0xff] %vm244_vm0, %v4252_v61  ;;  %v3375_v62 = vld [vmem:[%s4041_s19 + $0xe9] sm:$0xff]  ;;  %v3374_v63 = vld [vmem:[%s4041_s19 + $0xe1] sm:$0xff] }
  0x2d   : > { %v4263_v0 = vld [vmem:[%s4041_s19 + $0x118] sm:$0xff]  ;;  %v4266_v1 = vld [vmem:[%s4041_s19 + $0x110] sm:$0xff]  ;;  %v4277_v4 = vld [vmem:[%s4041_s19 + $0x128] sm:$0xff] }
  0x2e   : > { %280 = vst.msk [vmem:[#allocation2 + $0x118] sm:$0xff] %vm244_vm0, %v4263_v0  ;;  %279 = vst.msk [vmem:[#allocation2 + $0x110] sm:$0xff] %vm244_vm0, %v4266_v1  ;;  %v3377_v2 = vld [vmem:[%s4041_s19 + $0xf9] sm:$0xff]  ;;  %v3376_v3 = vld [vmem:[%s4041_s19 + $0xf1] sm:$0xff] }
  0x2f   : > { %421 = vrot.lane.b32.xlu1 %v3361_v21, %s3989_s20  ;;  %419 = vrot.lane.b32.xlu0 %v3360_v22, %s3989_s20  ;;  %v4280_v5 = vld [vmem:[%s4041_s19 + $0x120] sm:$0xff]  ;;  %282 = vst.msk [vmem:[#allocation2 + $0x128] sm:$0xff] %vm244_vm0, %v4277_v4  ;;  %v3379_v6 = vld [vmem:[%s4041_s19 + $0x109] sm:$0xff] }
  0x30   : > { %281 = vst.msk [vmem:[#allocation2 + $0x120] sm:$0xff] %vm244_vm0, %v4280_v5  ;;  %v3378_v7 = vld [vmem:[%s4041_s19 + $0x101] sm:$0xff]  ;;  %v4291_v8 = vld [vmem:[%s4041_s19 + $0x138] sm:$0xff]  ;;  %v4294_v9 = vld [vmem:[%s4041_s19 + $0x130] sm:$0xff] }
  0x31   : > { %284 = vst.msk [vmem:[#allocation2 + $0x138] sm:$0xff] %vm244_vm0, %v4291_v8  ;;  %283 = vst.msk [vmem:[#allocation2 + $0x130] sm:$0xff] %vm244_vm0, %v4294_v9  ;;  %v3381_v10 = vld [vmem:[%s4041_s19 + $0x119] sm:$0xff]  ;;  %v3380_v11 = vld [vmem:[%s4041_s19 + $0x111] sm:$0xff] }
  0x32   : > { %v4305_v12 = vld [vmem:[%s4041_s19 + $0x148] sm:$0xff]  ;;  %v4308_v13 = vld [vmem:[%s4041_s19 + $0x140] sm:$0xff]  ;;  %v4319_v17 = vld [vmem:[%s4041_s19 + $0x158] sm:$0xff] }
  0x33   : > { %425 = vrot.lane.b32.xlu1 %v3363_v28, %s3989_s20  ;;  %423 = vrot.lane.b32.xlu0 %v3362_v29, %s3989_s20  ;;  %286 = vst.msk [vmem:[#allocation2 + $0x148] sm:$0xff] %vm244_vm0, %v4305_v12  ;;  %285 = vst.msk [vmem:[#allocation2 + $0x140] sm:$0xff] %vm244_vm0, %v4308_v13  ;;  %v3383_v14 = vld [vmem:[%s4041_s19 + $0x129] sm:$0xff]  ;;  %v3382_v15 = vld [vmem:[%s4041_s19 + $0x121] sm:$0xff] }
  0x34   : > { %v4322_v21 = vld [vmem:[%s4041_s19 + $0x150] sm:$0xff]  ;;  %288 = vst.msk [vmem:[#allocation2 + $0x158] sm:$0xff] %vm244_vm0, %v4319_v17  ;;  %v3385_v22 = vld [vmem:[%s4041_s19 + $0x139] sm:$0xff]  ;;  %v4333_v29 = vld [vmem:[%s4041_s19 + $0x168] sm:$0xff] }
  0x35   : > { %287 = vst.msk [vmem:[#allocation2 + $0x150] sm:$0xff] %vm244_vm0, %v4322_v21  ;;  %v3384_v28 = vld [vmem:[%s4041_s19 + $0x131] sm:$0xff]  ;;  %290 = vst.msk [vmem:[#allocation2 + $0x168] sm:$0xff] %vm244_vm0, %v4333_v29 }
  0x37   : > { %429 = vrot.lane.b32.xlu1 %v3365_v35, %s3989_s20  ;;  %427 = vrot.lane.b32.xlu0 %v3364_v37, %s3989_s20  ;;  %v4336_v35 = vld [vmem:[%s4041_s19 + $0x160] sm:$0xff]  ;;  %v3387_v37 = vld [vmem:[%s4041_s19 + $0x149] sm:$0xff] }
  0x38   : > { %289 = vst.msk [vmem:[#allocation2 + $0x160] sm:$0xff] %vm244_vm0, %v4336_v35 }
  0x3b   : > { %433 = vrot.lane.b32.xlu1 %v3367_v44, %s3989_s20  ;;  %431 = vrot.lane.b32.xlu0 %v3366_v45, %s3989_s20  ;;  %v3386_v44 = vld [vmem:[%s4041_s19 + $0x141] sm:$0xff]  ;;  %v4347_v45 = vld [vmem:[%s4041_s19 + $0x178] sm:$0xff] }
  0x3c   : > { %292 = vst.msk [vmem:[#allocation2 + $0x178] sm:$0xff] %vm244_vm0, %v4347_v45 }
  0x3f   : > { %437 = vrot.lane.b32.xlu1 %v3369_v50, %s3989_s20  ;;  %435 = vrot.lane.b32.xlu0 %v3368_v51, %s3989_s20  ;;  %v4350_v50 = vld [vmem:[%s4041_s19 + $0x170] sm:$0xff]  ;;  %v3389_v51 = vld [vmem:[%s4041_s19 + $0x159] sm:$0xff] }
  0x40   : > { %291 = vst.msk [vmem:[#allocation2 + $0x170] sm:$0xff] %vm244_vm0, %v4350_v50 }
  0x43   : > { %441 = vrot.lane.b32.xlu1 %v3371_v54, %s3989_s20  ;;  %439 = vrot.lane.b32.xlu0 %v3370_v55, %s3989_s20  ;;  %v3388_v54 = vld [vmem:[%s4041_s19 + $0x151] sm:$0xff]  ;;  %v3391_v55 = vld [vmem:[%s4041_s19 + $0x169] sm:$0xff] }
  0x47   : > { %445 = vrot.lane.b32.xlu1 %v3373_v58, %s3989_s20  ;;  %443 = vrot.lane.b32.xlu0 %v3372_v59, %s3989_s20  ;;  %v3390_v58 = vld [vmem:[%s4041_s19 + $0x161] sm:$0xff]  ;;  %v3393_v59 = vld [vmem:[%s4041_s19 + $0x179] sm:$0xff] }
  0x4b   : > { %449 = vrot.lane.b32.xlu1 %v3375_v62, %s3989_s20  ;;  %447 = vrot.lane.b32.xlu0 %v3374_v63, %s3989_s20  ;;  %v3392_v62 = vld [vmem:[%s4041_s19 + $0x171] sm:$0xff] }
  0x4c   : > { %v3395_v63 = vld [vmem:[%s4041_s19 + $0xa] sm:$0xff] }
  0x4f   : > { %453 = vrot.lane.b32.xlu1 %v3377_v2, %s3989_s20  ;;  %451 = vrot.lane.b32.xlu0 %v3376_v3, %s3989_s20  ;;  %v3394_v2 = vld [vmem:[%s4041_s19 + $0x2] sm:$0xff]  ;;  %v3397_v3 = vld [vmem:[%s4041_s19 + $0x1a] sm:$0xff] }
  0x53   : > { %457 = vrot.lane.b32.xlu1 %v3379_v6, %s3989_s20  ;;  %455 = vrot.lane.b32.xlu0 %v3378_v7, %s3989_s20  ;;  %v3396_v6 = vld [vmem:[%s4041_s19 + $0x12] sm:$0xff]  ;;  %v3399_v7 = vld [vmem:[%s4041_s19 + $0x2a] sm:$0xff] }
  0x57   : > { %461 = vrot.lane.b32.xlu1 %v3381_v10, %s3989_s20  ;;  %459 = vrot.lane.b32.xlu0 %v3380_v11, %s3989_s20  ;;  %v3398_v10 = vld [vmem:[%s4041_s19 + $0x22] sm:$0xff]  ;;  %v3401_v11 = vld [vmem:[%s4041_s19 + $0x3a] sm:$0xff] }
  0x5b   : > { %465 = vrot.lane.b32.xlu1 %v3383_v14, %s3989_s20  ;;  %463 = vrot.lane.b32.xlu0 %v3382_v15, %s3989_s20  ;;  %v3400_v14 = vld [vmem:[%s4041_s19 + $0x32] sm:$0xff]  ;;  %v3403_v15 = vld [vmem:[%s4041_s19 + $0x4a] sm:$0xff] }
  0x5f   : > { %469 = vrot.lane.b32.xlu1 %v3385_v22, %s3989_s20  ;;  %467 = vrot.lane.b32.xlu0 %v3384_v28, %s3989_s20  ;;  %v3402_v22 = vld [vmem:[%s4041_s19 + $0x42] sm:$0xff]  ;;  %v3405_v28 = vld [vmem:[%s4041_s19 + $0x5a] sm:$0xff] }
  0x63   : > { %473 = vrot.lane.b32.xlu1 %v3387_v37, %s3989_s20  ;;  %471 = vrot.lane.b32.xlu0 %v3386_v44, %s3989_s20  ;;  %v3404_v37 = vld [vmem:[%s4041_s19 + $0x52] sm:$0xff] }
  0x67   : > { %477 = vrot.lane.b32.xlu1 %v3389_v51, %s3989_s20  ;;  %475 = vrot.lane.b32.xlu0 %v3388_v54, %s3989_s20  ;;  %v3407_v54 = vld [vmem:[%s4041_s19 + $0x6a] sm:$0xff] }
  0x6b   : > { %481 = vrot.lane.b32.xlu1 %v3391_v55, %s3989_s20  ;;  %479 = vrot.lane.b32.xlu0 %v3390_v58, %s3989_s20  ;;  %v3406_v55 = vld [vmem:[%s4041_s19 + $0x62] sm:$0xff] }
  0x6f   : > { %485 = vrot.lane.b32.xlu1 %v3393_v59, %s3989_s20  ;;  %483 = vrot.lane.b32.xlu0 %v3392_v62, %s3989_s20  ;;  %v3409_v62 = vld [vmem:[%s4041_s19 + $0x7a] sm:$0xff]  ;;  %s5526_s20 = scalar_lea.vmem %s5743_s3, %s3932_s11 }
  0x73   : > { %684 = vrot.lane.b32.xlu1 %v3395_v63, %s3990_s21  ;;  %682 = vrot.lane.b32.xlu0 %v3394_v2, %s3990_s21  ;;  %v3408_v63 = vld [vmem:[%s4041_s19 + $0x72] sm:$0xff] }
  0x77   : > { %688 = vrot.lane.b32.xlu1 %v3397_v3, %s3990_s21  ;;  %686 = vrot.lane.b32.xlu0 %v3396_v6, %s3990_s21  ;;  %v3411_v6 = vld [vmem:[%s4041_s19 + $0x8a] sm:$0xff] }
  0x7b   : > { %692 = vrot.lane.b32.xlu1 %v3399_v7, %s3990_s21  ;;  %690 = vrot.lane.b32.xlu0 %v3398_v10, %s3990_s21  ;;  %v3410_v7 = vld [vmem:[%s4041_s19 + $0x82] sm:$0xff] }
  0x7f   : > { %696 = vrot.lane.b32.xlu1 %v3401_v11, %s3990_s21  ;;  %694 = vrot.lane.b32.xlu0 %v3400_v14, %s3990_s21  ;;  %v3413_v14 = vld [vmem:[%s4041_s19 + $0x9a] sm:$0xff] }
  0x83   : > { %700 = vrot.lane.b32.xlu1 %v3403_v15, %s3990_s21  ;;  %698 = vrot.lane.b32.xlu0 %v3402_v22, %s3990_s21  ;;  %v3412_v15 = vld [vmem:[%s4041_s19 + $0x92] sm:$0xff] }
  0x85   : > { %v396_v44 = vpop.permute.xlu1 %395  ;;  %v392_v51 = vpop.permute.xlu0 %391 }
  0x86   : > { %538 = vst.msk [vmem:[#allocation2 + $0x10] sm:$0xff] %vm535_vm1, %v396_v44  ;;  %536 = vst.msk [vmem:[#allocation2] sm:$0xff] %vm535_vm1, %v392_v51  ;;  %v3414_v44 = vld [vmem:[%s4041_s19 + $0xa2] sm:$0xff] }
  0x87   : > { %704 = vrot.lane.b32.xlu1 %v3405_v28, %s3990_s21  ;;  %702 = vrot.lane.b32.xlu0 %v3404_v37, %s3990_s21  ;;  %v3415_v37 = vld [vmem:[%s4041_s19 + $0xaa] sm:$0xff] }
  0x89   : > { %v398_v58 = vpop.permute.xlu1 %397  ;;  %v394_v59 = vpop.permute.xlu0 %393 }
  0x8a   : > { %539 = vst.msk [vmem:[#allocation2 + $0x18] sm:$0xff] %vm535_vm1, %v398_v58  ;;  %537 = vst.msk [vmem:[#allocation2 + $0x8] sm:$0xff] %vm535_vm1, %v394_v59  ;;  %v3416_v58 = vld [vmem:[%s4041_s19 + $0xb2] sm:$0xff] }
  0x8b   : > { %708 = vrot.lane.b32.xlu1 %v3407_v54, %s3990_s21  ;;  %706 = vrot.lane.b32.xlu0 %v3406_v55, %s3990_s21  ;;  %v3417_v55 = vld [vmem:[%s4041_s19 + $0xba] sm:$0xff] }
  0x8d   : > { %v402_v2 = vpop.permute.xlu1 %401  ;;  %v400_v3 = vpop.permute.xlu0 %399 }
  0x8e   : > { %541 = vst.msk [vmem:[#allocation2 + $0x28] sm:$0xff] %vm535_vm1, %v402_v2  ;;  %540 = vst.msk [vmem:[#allocation2 + $0x20] sm:$0xff] %vm535_vm1, %v400_v3  ;;  %v3418_v2 = vld [vmem:[%s4041_s19 + $0xc2] sm:$0xff] }
  0x8f   : > { %712 = vrot.lane.b32.xlu1 %v3409_v62, %s3990_s21  ;;  %710 = vrot.lane.b32.xlu0 %v3408_v63, %s3990_s21  ;;  %v3419_v63 = vld [vmem:[%s4041_s19 + $0xca] sm:$0xff] }
  0x91   : > { %v406_v10 = vpop.permute.xlu1 %405  ;;  %v404_v11 = vpop.permute.xlu0 %403 }
  0x92   : > { %543 = vst.msk [vmem:[#allocation2 + $0x38] sm:$0xff] %vm535_vm1, %v406_v10  ;;  %542 = vst.msk [vmem:[#allocation2 + $0x30] sm:$0xff] %vm535_vm1, %v404_v11  ;;  %v3420_v10 = vld [vmem:[%s4041_s19 + $0xd2] sm:$0xff] }
  0x93   : > { %716 = vrot.lane.b32.xlu1 %v3411_v6, %s3990_s21  ;;  %714 = vrot.lane.b32.xlu0 %v3410_v7, %s3990_s21  ;;  %v3421_v7 = vld [vmem:[%s4041_s19 + $0xda] sm:$0xff] }
  0x95   : > { %v410_v22 = vpop.permute.xlu1 %409  ;;  %v408_v28 = vpop.permute.xlu0 %407 }
  0x96   : > { %545 = vst.msk [vmem:[#allocation2 + $0x48] sm:$0xff] %vm535_vm1, %v410_v22  ;;  %544 = vst.msk [vmem:[#allocation2 + $0x40] sm:$0xff] %vm535_vm1, %v408_v28  ;;  %v3422_v22 = vld [vmem:[%s4041_s19 + $0xe2] sm:$0xff] }
  0x97   : > { %720 = vrot.lane.b32.xlu1 %v3413_v14, %s3990_s21  ;;  %718 = vrot.lane.b32.xlu0 %v3412_v15, %s3990_s21  ;;  %v3423_v15 = vld [vmem:[%s4041_s19 + $0xea] sm:$0xff] }
  0x99   : > { %v414_v51 = vpop.permute.xlu1 %413  ;;  %v412_v54 = vpop.permute.xlu0 %411 }
  0x9a   : > { %547 = vst.msk [vmem:[#allocation2 + $0x58] sm:$0xff] %vm535_vm1, %v414_v51  ;;  %546 = vst.msk [vmem:[#allocation2 + $0x50] sm:$0xff] %vm535_vm1, %v412_v54  ;;  %v3424_v51 = vld [vmem:[%s4041_s19 + $0xf2] sm:$0xff] }
  0x9b   : > { %724 = vrot.lane.b32.xlu1 %v3415_v37, %s3990_s21  ;;  %722 = vrot.lane.b32.xlu0 %v3414_v44, %s3990_s21  ;;  %v3425_v44 = vld [vmem:[%s4041_s19 + $0xfa] sm:$0xff] }
  0x9d   : > { %v418_v59 = vpop.permute.xlu1 %417  ;;  %v416_v62 = vpop.permute.xlu0 %415 }
  0x9e   : > { %549 = vst.msk [vmem:[#allocation2 + $0x68] sm:$0xff] %vm535_vm1, %v418_v59  ;;  %548 = vst.msk [vmem:[#allocation2 + $0x60] sm:$0xff] %vm535_vm1, %v416_v62  ;;  %v3426_v59 = vld [vmem:[%s4041_s19 + $0x102] sm:$0xff] }
  0x9f   : > { %728 = vrot.lane.b32.xlu1 %v3417_v55, %s3990_s21  ;;  %726 = vrot.lane.b32.xlu0 %v3416_v58, %s3990_s21  ;;  %v3427_v58 = vld [vmem:[%s4041_s19 + $0x10a] sm:$0xff] }
  0xa1   : > { %v422_v3 = vpop.permute.xlu1 %421  ;;  %v420_v6 = vpop.permute.xlu0 %419 }
  0xa2   : > { %551 = vst.msk [vmem:[#allocation2 + $0x78] sm:$0xff] %vm535_vm1, %v422_v3  ;;  %550 = vst.msk [vmem:[#allocation2 + $0x70] sm:$0xff] %vm535_vm1, %v420_v6  ;;  %v3428_v3 = vld [vmem:[%s4041_s19 + $0x112] sm:$0xff] }
  0xa3   : > { %732 = vrot.lane.b32.xlu1 %v3419_v63, %s3990_s21  ;;  %730 = vrot.lane.b32.xlu0 %v3418_v2, %s3990_s21  ;;  %v3429_v2 = vld [vmem:[%s4041_s19 + $0x11a] sm:$0xff] }
  0xa5   : > { %v426_v11 = vpop.permute.xlu1 %425  ;;  %v424_v14 = vpop.permute.xlu0 %423 }
  0xa6   : > { %553 = vst.msk [vmem:[#allocation2 + $0x88] sm:$0xff] %vm535_vm1, %v426_v11  ;;  %552 = vst.msk [vmem:[#allocation2 + $0x80] sm:$0xff] %vm535_vm1, %v424_v14  ;;  %v3430_v11 = vld [vmem:[%s4041_s19 + $0x122] sm:$0xff] }
  0xa7   : > { %736 = vrot.lane.b32.xlu1 %v3421_v7, %s3990_s21  ;;  %734 = vrot.lane.b32.xlu0 %v3420_v10, %s3990_s21  ;;  %v3431_v10 = vld [vmem:[%s4041_s19 + $0x12a] sm:$0xff] }
  0xa9   : > { %v430_v28 = vpop.permute.xlu1 %429  ;;  %v428_v37 = vpop.permute.xlu0 %427 }
  0xaa   : > { %555 = vst.msk [vmem:[#allocation2 + $0x98] sm:$0xff] %vm535_vm1, %v430_v28  ;;  %554 = vst.msk [vmem:[#allocation2 + $0x90] sm:$0xff] %vm535_vm1, %v428_v37  ;;  %v3432_v28 = vld [vmem:[%s4041_s19 + $0x132] sm:$0xff] }
  0xab   : > { %740 = vrot.lane.b32.xlu1 %v3423_v15, %s3990_s21  ;;  %738 = vrot.lane.b32.xlu0 %v3422_v22, %s3990_s21  ;;  %v3433_v22 = vld [vmem:[%s4041_s19 + $0x13a] sm:$0xff] }
  0xad   : > { %v434_v54 = vpop.permute.xlu1 %433  ;;  %v432_v55 = vpop.permute.xlu0 %431 }
  0xae   : > { %557 = vst.msk [vmem:[#allocation2 + $0xa8] sm:$0xff] %vm535_vm1, %v434_v54  ;;  %556 = vst.msk [vmem:[#allocation2 + $0xa0] sm:$0xff] %vm535_vm1, %v432_v55  ;;  %v3434_v54 = vld [vmem:[%s4041_s19 + $0x142] sm:$0xff] }
  0xaf   : > { %744 = vrot.lane.b32.xlu1 %v3425_v44, %s3990_s21  ;;  %742 = vrot.lane.b32.xlu0 %v3424_v51, %s3990_s21  ;;  %v3435_v51 = vld [vmem:[%s4041_s19 + $0x14a] sm:$0xff] }
  0xb1   : > { %v438_v62 = vpop.permute.xlu1 %437  ;;  %v436_v63 = vpop.permute.xlu0 %435 }
  0xb2   : > { %559 = vst.msk [vmem:[#allocation2 + $0xb8] sm:$0xff] %vm535_vm1, %v438_v62  ;;  %558 = vst.msk [vmem:[#allocation2 + $0xb0] sm:$0xff] %vm535_vm1, %v436_v63  ;;  %v3436_v62 = vld [vmem:[%s4041_s19 + $0x152] sm:$0xff] }
  0xb3   : > { %748 = vrot.lane.b32.xlu1 %v3427_v58, %s3990_s21  ;;  %746 = vrot.lane.b32.xlu0 %v3426_v59, %s3990_s21  ;;  %v3437_v59 = vld [vmem:[%s4041_s19 + $0x15a] sm:$0xff] }
  0xb5   : > { %v442_v6 = vpop.permute.xlu1 %441  ;;  %v440_v7 = vpop.permute.xlu0 %439 }
  0xb6   : > { %561 = vst.msk [vmem:[#allocation2 + $0xc8] sm:$0xff] %vm535_vm1, %v442_v6  ;;  %560 = vst.msk [vmem:[#allocation2 + $0xc0] sm:$0xff] %vm535_vm1, %v440_v7  ;;  %v3438_v6 = vld [vmem:[%s4041_s19 + $0x162] sm:$0xff] }
  0xb7   : > { %752 = vrot.lane.b32.xlu1 %v3429_v2, %s3990_s21  ;;  %750 = vrot.lane.b32.xlu0 %v3428_v3, %s3990_s21  ;;  %v3439_v3 = vld [vmem:[%s4041_s19 + $0x16a] sm:$0xff] }
  0xb9   : > { %v446_v14 = vpop.permute.xlu1 %445  ;;  %v444_v15 = vpop.permute.xlu0 %443 }
  0xba   : > { %563 = vst.msk [vmem:[#allocation2 + $0xd8] sm:$0xff] %vm535_vm1, %v446_v14  ;;  %562 = vst.msk [vmem:[#allocation2 + $0xd0] sm:$0xff] %vm535_vm1, %v444_v15  ;;  %v3440_v14 = vld [vmem:[%s4041_s19 + $0x172] sm:$0xff] }
  0xbb   : > { %756 = vrot.lane.b32.xlu1 %v3431_v10, %s3990_s21  ;;  %754 = vrot.lane.b32.xlu0 %v3430_v11, %s3990_s21  ;;  %v3441_v11 = vld [vmem:[%s4041_s19 + $0x17a] sm:$0xff] }
  0xbd   : > { %v450_v37 = vpop.permute.xlu1 %449  ;;  %v448_v44 = vpop.permute.xlu0 %447 }
  0xbe   : > { %565 = vst.msk [vmem:[#allocation2 + $0xe8] sm:$0xff] %vm535_vm1, %v450_v37  ;;  %564 = vst.msk [vmem:[#allocation2 + $0xe0] sm:$0xff] %vm535_vm1, %v448_v44 }
  0xbf   : > { %760 = vrot.lane.b32.xlu1 %v3433_v22, %s3990_s21  ;;  %758 = vrot.lane.b32.xlu0 %v3432_v28, %s3990_s21 }
  0xc1   : > { %v454_v55 = vpop.permute.xlu1 %453  ;;  %v452_v58 = vpop.permute.xlu0 %451 }
  0xc2   : > { %567 = vst.msk [vmem:[#allocation2 + $0xf8] sm:$0xff] %vm535_vm1, %v454_v55  ;;  %566 = vst.msk [vmem:[#allocation2 + $0xf0] sm:$0xff] %vm535_vm1, %v452_v58  ;;  %v3488_v58 = vld [vmem:[%s4041_s19 + $0x188] sm:$0xff] }
  0xc3   : > { %764 = vrot.lane.b32.xlu1 %v3435_v51, %s3990_s21  ;;  %762 = vrot.lane.b32.xlu0 %v3434_v54, %s3990_s21 }
  0xc5   : > { %v458_v63 = vpop.permute.xlu1 %457  ;;  %v456_v2 = vpop.permute.xlu0 %455 }
  0xc6   : > { %569 = vst.msk [vmem:[#allocation2 + $0x108] sm:$0xff] %vm535_vm1, %v458_v63  ;;  %568 = vst.msk [vmem:[#allocation2 + $0x100] sm:$0xff] %vm535_vm1, %v456_v2  ;;  %v4655_v2 = vld [vmem:[%s4041_s19 + $0x31] sm:$0xff] }
  0xc7   : > { %768 = vrot.lane.b32.xlu1 %v3437_v59, %s3990_s21  ;;  %766 = vrot.lane.b32.xlu0 %v3436_v62, %s3990_s21  ;;  %v3491_v59 = vld [vmem:[%s4041_s19 + $0x21] sm:$0xff]  ;;  %v3490_v62 = vld [vmem:[%s4041_s19 + $0x19] sm:$0xff] }
  0xc9   : > { %v462_v7 = vpop.permute.xlu1 %461  ;;  %v460_v10 = vpop.permute.xlu0 %459 }
  0xca   : > { %571 = vst.msk [vmem:[#allocation2 + $0x118] sm:$0xff] %vm535_vm1, %v462_v7  ;;  %570 = vst.msk [vmem:[#allocation2 + $0x110] sm:$0xff] %vm535_vm1, %v460_v10  ;;  %v4664_v10 = vld [vmem:[%s4041_s19 + $0x41] sm:$0xff] }
  0xcb   : > { %772 = vrot.lane.b32.xlu1 %v3439_v3, %s3990_s21  ;;  %770 = vrot.lane.b32.xlu0 %v3438_v6, %s3990_s21  ;;  %v3492_v3 = vld [vmem:[%s4041_s19 + $0x29] sm:$0xff] }
  0xcd   : > { %v466_v15 = vpop.permute.xlu1 %465  ;;  %v464_v22 = vpop.permute.xlu0 %463 }
  0xce   : > { %573 = vst.msk [vmem:[#allocation2 + $0x128] sm:$0xff] %vm535_vm1, %v466_v15  ;;  %572 = vst.msk [vmem:[#allocation2 + $0x120] sm:$0xff] %vm535_vm1, %v464_v22  ;;  %v4676_v22 = vld [vmem:[%s4041_s19 + $0x51] sm:$0xff] }
  0xcf   : > { %776 = vrot.lane.b32.xlu1 %v3441_v11, %s3990_s21  ;;  %774 = vrot.lane.b32.xlu0 %v3440_v14, %s3990_s21  ;;  %v4667_v11 = vld [vmem:[%s4041_s19 + $0x39] sm:$0xff] }
  0xd1   : > { %v470_v28 = vpop.permute.xlu1 %469  ;;  %v468_v37 = vpop.permute.xlu0 %467 }
  0xd2   : > { %575 = vst.msk [vmem:[#allocation2 + $0x138] sm:$0xff] %vm535_vm1, %v470_v28  ;;  %574 = vst.msk [vmem:[#allocation2 + $0x130] sm:$0xff] %vm535_vm1, %v468_v37  ;;  %v4679_v28 = vld [vmem:[%s4041_s19 + $0x49] sm:$0xff] }
  0xd3   : > { %975 = vrot.lane.b32.xlu1 %v4084_v19, %s3991_s22  ;;  %973 = vrot.lane.b32.xlu0 %v4074_v16, %s3991_s22 }
  0xd5   : > { %v474_v44 = vpop.permute.xlu1 %473  ;;  %v472_v51 = vpop.permute.xlu0 %471 }
  0xd6   : > { %577 = vst.msk [vmem:[#allocation2 + $0x148] sm:$0xff] %vm535_vm1, %v474_v44  ;;  %576 = vst.msk [vmem:[#allocation2 + $0x140] sm:$0xff] %vm535_vm1, %v472_v51  ;;  %v4688_v51 = vld [vmem:[%s4041_s19 + $0x61] sm:$0xff] }
  0xd7   : > { %979 = vrot.lane.b32.xlu1 %v4100_v23, %s3991_s22  ;;  %977 = vrot.lane.b32.xlu0 %v4081_v18, %s3991_s22 }
  0xd9   : > { %v478_v54 = vpop.permute.xlu1 %477  ;;  %v476_v55 = vpop.permute.xlu0 %475 }
  0xda   : > { %579 = vst.msk [vmem:[#allocation2 + $0x158] sm:$0xff] %vm535_vm1, %v478_v54  ;;  %578 = vst.msk [vmem:[#allocation2 + $0x150] sm:$0xff] %vm535_vm1, %v476_v55  ;;  %v4691_v54 = vld [vmem:[%s4041_s19 + $0x59] sm:$0xff] }
  0xdb   : > { %983 = vrot.lane.b32.xlu1 %v4108_v25, %s3991_s22  ;;  %981 = vrot.lane.b32.xlu0 %v4093_v20, %s3991_s22 }
  0xdd   : > { %v482_v16 = vpop.permute.xlu1 %481  ;;  %v480_v19 = vpop.permute.xlu0 %479 }
  0xde   : > { %581 = vst.msk [vmem:[#allocation2 + $0x168] sm:$0xff] %vm535_vm1, %v482_v16  ;;  %580 = vst.msk [vmem:[#allocation2 + $0x160] sm:$0xff] %vm535_vm1, %v480_v19  ;;  %v4700_v19 = vld [vmem:[%s4041_s19 + $0x71] sm:$0xff] }
  0xdf   : > { %987 = vrot.lane.b32.xlu1 %v4118_v27, %s3991_s22  ;;  %985 = vrot.lane.b32.xlu0 %v4105_v24, %s3991_s22 }
  0xe1   : > { %v486_v18 = vpop.permute.xlu1 %485  ;;  %v484_v23 = vpop.permute.xlu0 %483 }
  0xe2   : > { %583 = vst.msk [vmem:[#allocation2 + $0x178] sm:$0xff] %vm535_vm1, %v486_v18  ;;  %582 = vst.msk [vmem:[#allocation2 + $0x170] sm:$0xff] %vm535_vm1, %v484_v23  ;;  %v4703_v18 = vld [vmem:[%s4041_s19 + $0x69] sm:$0xff] }
  0xe3   : > { %991 = vrot.lane.b32.xlu1 %v4132_v31, %s3991_s22  ;;  %989 = vrot.lane.b32.xlu0 %v4115_v26, %s3991_s22 }
  0xe5   : > { %v685_v20 = vpop.permute.xlu1 %684  ;;  %v683_v25 = vpop.permute.xlu0 %682 }
  0xe6   : > { %828 = vst.msk [vmem:[#allocation2 + $0x8] sm:$0xff] %vm826_vm2, %v685_v20  ;;  %827 = vst.msk [vmem:[#allocation2] sm:$0xff] %vm826_vm2, %v683_v25  ;;  %v3503_v25 = vld [vmem:[%s4041_s19 + $0x81] sm:$0xff] }
  0xe7   : > { %995 = vrot.lane.b32.xlu1 %v4142_v33, %s3991_s22  ;;  %993 = vrot.lane.b32.xlu0 %v4129_v30, %s3991_s22 }
  0xe9   : > { %v689_v24 = vpop.permute.xlu1 %688  ;;  %v687_v27 = vpop.permute.xlu0 %686 }
  0xea   : > { %830 = vst.msk [vmem:[#allocation2 + $0x18] sm:$0xff] %vm826_vm2, %v689_v24  ;;  %829 = vst.msk [vmem:[#allocation2 + $0x10] sm:$0xff] %vm826_vm2, %v687_v27  ;;  %v4713_v24 = vld [vmem:[%s4041_s19 + $0x79] sm:$0xff] }
  0xeb   : > { %999 = vrot.lane.b32.xlu1 %v4157_v36, %s3991_s22  ;;  %997 = vrot.lane.b32.xlu0 %v4139_v32, %s3991_s22 }
  0xed   : > { %v693_v26 = vpop.permute.xlu1 %692  ;;  %v691_v31 = vpop.permute.xlu0 %690 }
  0xee   : > { %832 = vst.msk [vmem:[#allocation2 + $0x28] sm:$0xff] %vm826_vm2, %v693_v26  ;;  %831 = vst.msk [vmem:[#allocation2 + $0x20] sm:$0xff] %vm826_vm2, %v691_v31  ;;  %v3505_v31 = vld [vmem:[%s4041_s19 + $0x91] sm:$0xff] }
  0xef   : > { %1003 = vrot.lane.b32.xlu1 %v4166_v39, %s3991_s22  ;;  %1001 = vrot.lane.b32.xlu0 %v4149_v34, %s3991_s22 }
  0xf1   : > { %v697_v30 = vpop.permute.xlu1 %696  ;;  %v695_v33 = vpop.permute.xlu0 %694 }
  0xf2   : > { %834 = vst.msk [vmem:[#allocation2 + $0x38] sm:$0xff] %vm826_vm2, %v697_v30  ;;  %833 = vst.msk [vmem:[#allocation2 + $0x30] sm:$0xff] %vm826_vm2, %v695_v33  ;;  %v3504_v30 = vld [vmem:[%s4041_s19 + $0x89] sm:$0xff] }
  0xf3   : > { %1007 = vrot.lane.b32.xlu1 %v4178_v41, %s3991_s22  ;;  %1005 = vrot.lane.b32.xlu0 %v4163_v38, %s3991_s22 }
  0xf5   : > { %v701_v32 = vpop.permute.xlu1 %700  ;;  %v699_v36 = vpop.permute.xlu0 %698 }
  0xf6   : > { %836 = vst.msk [vmem:[#allocation2 + $0x48] sm:$0xff] %vm826_vm2, %v701_v32  ;;  %835 = vst.msk [vmem:[#allocation2 + $0x40] sm:$0xff] %vm826_vm2, %v699_v36  ;;  %v3507_v36 = vld [vmem:[%s4041_s19 + $0xa1] sm:$0xff] }
  0xf7   : > { %1011 = vrot.lane.b32.xlu1 %v4188_v43, %s3991_s22  ;;  %1009 = vrot.lane.b32.xlu0 %v4173_v40, %s3991_s22 }
  0xf9   : > { %v705_v34 = vpop.permute.xlu1 %704  ;;  %v703_v39 = vpop.permute.xlu0 %702 }
  0xfa   : > { %838 = vst.msk [vmem:[#allocation2 + $0x58] sm:$0xff] %vm826_vm2, %v705_v34  ;;  %837 = vst.msk [vmem:[#allocation2 + $0x50] sm:$0xff] %vm826_vm2, %v703_v39  ;;  %v3506_v34 = vld [vmem:[%s4041_s19 + $0x99] sm:$0xff] }
  0xfb   : > { %1015 = vrot.lane.b32.xlu1 %v4202_v47, %s3991_s22  ;;  %1013 = vrot.lane.b32.xlu0 %v4185_v42, %s3991_s22 }
  0xfd   : > { %v709_v38 = vpop.permute.xlu1 %708  ;;  %v707_v41 = vpop.permute.xlu0 %706 }
  0xfe   : > { %840 = vst.msk [vmem:[#allocation2 + $0x68] sm:$0xff] %vm826_vm2, %v709_v38  ;;  %839 = vst.msk [vmem:[#allocation2 + $0x60] sm:$0xff] %vm826_vm2, %v707_v41  ;;  %v3509_v41 = vld [vmem:[%s4041_s19 + $0xb1] sm:$0xff] }
  0xff   : > { %1019 = vrot.lane.b32.xlu1 %v4210_v49, %s3991_s22  ;;  %1017 = vrot.lane.b32.xlu0 %v4197_v46, %s3991_s22 }
 0x101   : > { %v713_v40 = vpop.permute.xlu1 %712  ;;  %v711_v43 = vpop.permute.xlu0 %710 }
 0x102   : > { %842 = vst.msk [vmem:[#allocation2 + $0x78] sm:$0xff] %vm826_vm2, %v713_v40  ;;  %841 = vst.msk [vmem:[#allocation2 + $0x70] sm:$0xff] %vm826_vm2, %v711_v43  ;;  %v3508_v40 = vld [vmem:[%s4041_s19 + $0xa9] sm:$0xff] }
 0x103   : > { %1023 = vrot.lane.b32.xlu1 %v4224_v53, %s3991_s22  ;;  %1021 = vrot.lane.b32.xlu0 %v4207_v48, %s3991_s22 }
 0x105   : > { %v717_v42 = vpop.permute.xlu1 %716  ;;  %v715_v47 = vpop.permute.xlu0 %714 }
 0x106   : > { %844 = vst.msk [vmem:[#allocation2 + $0x88] sm:$0xff] %vm826_vm2, %v717_v42  ;;  %843 = vst.msk [vmem:[#allocation2 + $0x80] sm:$0xff] %vm826_vm2, %v715_v47  ;;  %v3511_v47 = vld [vmem:[%s4041_s19 + $0xc1] sm:$0xff] }
 0x107   : > { %1027 = vrot.lane.b32.xlu1 %v4238_v57, %s3991_s22  ;;  %1025 = vrot.lane.b32.xlu0 %v4221_v52, %s3991_s22 }
 0x109   : > { %v721_v46 = vpop.permute.xlu1 %720  ;;  %v719_v49 = vpop.permute.xlu0 %718 }
 0x10a   : > { %846 = vst.msk [vmem:[#allocation2 + $0x98] sm:$0xff] %vm826_vm2, %v721_v46  ;;  %845 = vst.msk [vmem:[#allocation2 + $0x90] sm:$0xff] %vm826_vm2, %v719_v49  ;;  %v3510_v46 = vld [vmem:[%s4041_s19 + $0xb9] sm:$0xff] }
 0x10b   : > { %1031 = vrot.lane.b32.xlu1 %v4252_v61, %s3991_s22  ;;  %1029 = vrot.lane.b32.xlu0 %v4235_v56, %s3991_s22 }
 0x10d   : > { %v725_v48 = vpop.permute.xlu1 %724  ;;  %v723_v53 = vpop.permute.xlu0 %722 }
 0x10e   : > { %848 = vst.msk [vmem:[#allocation2 + $0xa8] sm:$0xff] %vm826_vm2, %v725_v48  ;;  %847 = vst.msk [vmem:[#allocation2 + $0xa0] sm:$0xff] %vm826_vm2, %v723_v53  ;;  %v3513_v53 = vld [vmem:[%s4041_s19 + $0xd1] sm:$0xff] }
 0x10f   : > { %1035 = vrot.lane.b32.xlu1 %v4266_v1, %s3991_s22  ;;  %1033 = vrot.lane.b32.xlu0 %v4249_v60, %s3991_s22 }
 0x111   : > { %v729_v52 = vpop.permute.xlu1 %728  ;;  %v727_v57 = vpop.permute.xlu0 %726 }
 0x112   : > { %850 = vst.msk [vmem:[#allocation2 + $0xb8] sm:$0xff] %vm826_vm2, %v729_v52  ;;  %849 = vst.msk [vmem:[#allocation2 + $0xb0] sm:$0xff] %vm826_vm2, %v727_v57  ;;  %v3512_v52 = vld [vmem:[%s4041_s19 + $0xc9] sm:$0xff] }
 0x113   : > { %1039 = vrot.lane.b32.xlu1 %v4280_v5, %s3991_s22  ;;  %1037 = vrot.lane.b32.xlu0 %v4263_v0, %s3991_s22 }
 0x115   : > { %v733_v56 = vpop.permute.xlu1 %732  ;;  %v731_v61 = vpop.permute.xlu0 %730 }
 0x116   : > { %852 = vst.msk [vmem:[#allocation2 + $0xc8] sm:$0xff] %vm826_vm2, %v733_v56  ;;  %851 = vst.msk [vmem:[#allocation2 + $0xc0] sm:$0xff] %vm826_vm2, %v731_v61  ;;  %v3515_v61 = vld [vmem:[%s4041_s19 + $0xe1] sm:$0xff] }
 0x117   : > { %1043 = vrot.lane.b32.xlu1 %v4294_v9, %s3991_s22  ;;  %1041 = vrot.lane.b32.xlu0 %v4277_v4, %s3991_s22 }
 0x119   : > { %v737_v60 = vpop.permute.xlu1 %736  ;;  %v735_v1 = vpop.permute.xlu0 %734 }
 0x11a   : > { %854 = vst.msk [vmem:[#allocation2 + $0xd8] sm:$0xff] %vm826_vm2, %v737_v60  ;;  %853 = vst.msk [vmem:[#allocation2 + $0xd0] sm:$0xff] %vm826_vm2, %v735_v1  ;;  %v3514_v60 = vld [vmem:[%s4041_s19 + $0xd9] sm:$0xff] }
 0x11b   : > { %1047 = vrot.lane.b32.xlu1 %v4308_v13, %s3991_s22  ;;  %1045 = vrot.lane.b32.xlu0 %v4291_v8, %s3991_s22 }
 0x11d   : > { %v741_v0 = vpop.permute.xlu1 %740  ;;  %v739_v5 = vpop.permute.xlu0 %738 }
 0x11e   : > { %856 = vst.msk [vmem:[#allocation2 + $0xe8] sm:$0xff] %vm826_vm2, %v741_v0  ;;  %855 = vst.msk [vmem:[#allocation2 + $0xe0] sm:$0xff] %vm826_vm2, %v739_v5  ;;  %v4757_v5 = vld [vmem:[%s4041_s19 + $0xf1] sm:$0xff] }
 0x11f   : > { %1051 = vrot.lane.b32.xlu1 %v4322_v21, %s3991_s22  ;;  %1049 = vrot.lane.b32.xlu0 %v4305_v12, %s3991_s22  ;;  %v3487_v12 = vld [vmem:[%s4041_s19 + $0x180] sm:$0xff] }
 0x121   : > { %v745_v4 = vpop.permute.xlu1 %744  ;;  %v743_v9 = vpop.permute.xlu0 %742 }
 0x122   : > { %858 = vst.msk [vmem:[#allocation2 + $0xf8] sm:$0xff] %vm826_vm2, %v745_v4  ;;  %857 = vst.msk [vmem:[#allocation2 + $0xf0] sm:$0xff] %vm826_vm2, %v743_v9  ;;  %v3516_v4 = vld [vmem:[%s4041_s19 + $0xe9] sm:$0xff] }
 0x123   : > { %1055 = vrot.lane.b32.xlu1 %v4336_v35, %s3991_s22  ;;  %1053 = vrot.lane.b32.xlu0 %v4319_v17, %s3991_s22  ;;  %v3489_v17 = vld [vmem:[%s4041_s19 + $0x190] sm:$0xff] }
 0x125   : > { %v749_v8 = vpop.permute.xlu1 %748  ;;  %v747_v13 = vpop.permute.xlu0 %746 }
 0x126   : > { %860 = vst.msk [vmem:[#allocation2 + $0x108] sm:$0xff] %vm826_vm2, %v749_v8  ;;  %859 = vst.msk [vmem:[#allocation2 + $0x100] sm:$0xff] %vm826_vm2, %v747_v13  ;;  %v4766_v13 = vld [vmem:[%s4041_s19 + $0x101] sm:$0xff] }
 0x127   : > { %1059 = vrot.lane.b32.xlu1 %v4350_v50, %s3991_s22  ;;  %1057 = vrot.lane.b32.xlu0 %v4333_v29, %s3991_s22 }
 0x129   : > { %v753_v21 = vpop.permute.xlu1 %752  ;;  %v751_v35 = vpop.permute.xlu0 %750 }
 0x12a   : > { %862 = vst.msk [vmem:[#allocation2 + $0x118] sm:$0xff] %vm826_vm2, %v753_v21  ;;  %861 = vst.msk [vmem:[#allocation2 + $0x110] sm:$0xff] %vm826_vm2, %v751_v35 }
 0x12b   : > { %1063 = vrot.lane.b32.xlu1 %v3487_v12, %s3991_s22  ;;  %1061 = vrot.lane.b32.xlu0 %v4347_v45, %s3991_s22  ;;  %v4769_v12 = vld [vmem:[%s4041_s19 + $0xf9] sm:$0xff] }
 0x12d   : > { %v757_v50 = vpop.permute.xlu1 %756  ;;  %v755_v29 = vpop.permute.xlu0 %754 }
 0x12e   : > { %864 = vst.msk [vmem:[#allocation2 + $0x128] sm:$0xff] %vm826_vm2, %v757_v50  ;;  %863 = vst.msk [vmem:[#allocation2 + $0x120] sm:$0xff] %vm826_vm2, %v755_v29 }
 0x12f   : > { %1067 = vrot.lane.b32.xlu1 %v3489_v17, %s3991_s22  ;;  %1065 = vrot.lane.b32.xlu0 %v3488_v58, %s3991_s22  ;;  %v4778_v17 = vld [vmem:[%s4041_s19 + $0x111] sm:$0xff]  ;;  %v4781_v58 = vld [vmem:[%s4041_s19 + $0x109] sm:$0xff] }
 0x131   : > { %v761_v63 = vpop.permute.xlu1 %760  ;;  %v759_v45 = vpop.permute.xlu0 %758 }
 0x132   : > { %866 = vst.msk [vmem:[#allocation2 + $0x138] sm:$0xff] %vm826_vm2, %v761_v63  ;;  %865 = vst.msk [vmem:[#allocation2 + $0x130] sm:$0xff] %vm826_vm2, %v759_v45 }
 0x133   : > { %1266 = vrot.lane.b32.xlu1 %v3491_v59, %s3992_s23  ;;  %1264 = vrot.lane.b32.xlu0 %v3490_v62, %s3992_s23  ;;  %v4790_v59 = vld [vmem:[%s4041_s19 + $0x121] sm:$0xff]  ;;  %v4793_v62 = vld [vmem:[%s4041_s19 + $0x119] sm:$0xff] }
 0x135   : > { %v765_v6 = vpop.permute.xlu1 %764  ;;  %v763_v7 = vpop.permute.xlu0 %762 }
 0x136   : > { %868 = vst.msk [vmem:[#allocation2 + $0x148] sm:$0xff] %vm826_vm2, %v765_v6  ;;  %867 = vst.msk [vmem:[#allocation2 + $0x140] sm:$0xff] %vm826_vm2, %v763_v7  ;;  %v4805_v6 = vld [vmem:[%s4041_s19 + $0x129] sm:$0xff] }
 0x137   : > { %1270 = vrot.lane.b32.xlu1 %v4655_v2, %s3992_s23  ;;  %1268 = vrot.lane.b32.xlu0 %v3492_v3, %s3992_s23  ;;  %v4802_v3 = vld [vmem:[%s4041_s19 + $0x131] sm:$0xff] }
 0x139   : > { %v769_v14 = vpop.permute.xlu1 %768  ;;  %v767_v15 = vpop.permute.xlu0 %766 }
 0x13a   : > { %870 = vst.msk [vmem:[#allocation2 + $0x158] sm:$0xff] %vm826_vm2, %v769_v14  ;;  %869 = vst.msk [vmem:[#allocation2 + $0x150] sm:$0xff] %vm826_vm2, %v767_v15  ;;  %v4814_v15 = vld [vmem:[%s4041_s19 + $0x141] sm:$0xff] }
 0x13b   : > { %1274 = vrot.lane.b32.xlu1 %v4664_v10, %s3992_s23  ;;  %1272 = vrot.lane.b32.xlu0 %v4667_v11, %s3992_s23 }
 0x13d   : > { %v773_v37 = vpop.permute.xlu1 %772  ;;  %v771_v44 = vpop.permute.xlu0 %770 }
 0x13e   : > { %872 = vst.msk [vmem:[#allocation2 + $0x168] sm:$0xff] %vm826_vm2, %v773_v37  ;;  %871 = vst.msk [vmem:[#allocation2 + $0x160] sm:$0xff] %vm826_vm2, %v771_v44  ;;  %v4817_v37 = vld [vmem:[%s4041_s19 + $0x139] sm:$0xff] }
 0x13f   : > { %1278 = vrot.lane.b32.xlu1 %v4676_v22, %s3992_s23  ;;  %1276 = vrot.lane.b32.xlu0 %v4679_v28, %s3992_s23 }
 0x141   : > { %v777_v55 = vpop.permute.xlu1 %776  ;;  %v775_v16 = vpop.permute.xlu0 %774 }
 0x142   : > { %874 = vst.msk [vmem:[#allocation2 + $0x178] sm:$0xff] %vm826_vm2, %v777_v55  ;;  %873 = vst.msk [vmem:[#allocation2 + $0x170] sm:$0xff] %vm826_vm2, %v775_v16  ;;  %v3529_v16 = vld [vmem:[%s4041_s19 + $0x151] sm:$0xff] }
 0x143   : > { %1282 = vrot.lane.b32.xlu1 %v4688_v51, %s3992_s23  ;;  %1280 = vrot.lane.b32.xlu0 %v4691_v54, %s3992_s23 }
 0x145   : > { %v976_v23 = vpop.permute.xlu1 %975  ;;  %v974_v20 = vpop.permute.xlu0 %973 }
 0x146   : > { %1119 = vst.msk [vmem:[#allocation2 + $0x8] sm:$0xff] %vm1117_vm3, %v976_v23  ;;  %1118 = vst.msk [vmem:[#allocation2] sm:$0xff] %vm1117_vm3, %v974_v20  ;;  %v4827_v23 = vld [vmem:[%s4041_s19 + $0x149] sm:$0xff] }
 0x147   : > { %1286 = vrot.lane.b32.xlu1 %v4700_v19, %s3992_s23  ;;  %1284 = vrot.lane.b32.xlu0 %v4703_v18, %s3992_s23 }
 0x149   : > { %v980_v27 = vpop.permute.xlu1 %979  ;;  %v978_v26 = vpop.permute.xlu0 %977 }
 0x14a   : > { %1121 = vst.msk [vmem:[#allocation2 + $0x18] sm:$0xff] %vm1117_vm3, %v980_v27  ;;  %1120 = vst.msk [vmem:[#allocation2 + $0x10] sm:$0xff] %vm1117_vm3, %v978_v26  ;;  %v3531_v27 = vld [vmem:[%s4041_s19 + $0x161] sm:$0xff]  ;;  %v3530_v26 = vld [vmem:[%s4041_s19 + $0x159] sm:$0xff] }
 0x14b   : > { %1290 = vrot.lane.b32.xlu1 %v3503_v25, %s3992_s23  ;;  %1288 = vrot.lane.b32.xlu0 %v4713_v24, %s3992_s23 }
 0x14d   : > { %v984_v33 = vpop.permute.xlu1 %983  ;;  %v982_v32 = vpop.permute.xlu0 %981 }
 0x14e   : > { %1123 = vst.msk [vmem:[#allocation2 + $0x28] sm:$0xff] %vm1117_vm3, %v984_v33  ;;  %1122 = vst.msk [vmem:[#allocation2 + $0x20] sm:$0xff] %vm1117_vm3, %v982_v32  ;;  %v3533_v33 = vld [vmem:[%s4041_s19 + $0x171] sm:$0xff]  ;;  %v3532_v32 = vld [vmem:[%s4041_s19 + $0x169] sm:$0xff] }
 0x14f   : > { %1294 = vrot.lane.b32.xlu1 %v3505_v31, %s3992_s23  ;;  %1292 = vrot.lane.b32.xlu0 %v3504_v30, %s3992_s23 }
 0x151   : > { %v988_v39 = vpop.permute.xlu1 %987  ;;  %v986_v38 = vpop.permute.xlu0 %985 }
 0x152   : > { %1125 = vst.msk [vmem:[#allocation2 + $0x38] sm:$0xff] %vm1117_vm3, %v988_v39  ;;  %1124 = vst.msk [vmem:[#allocation2 + $0x30] sm:$0xff] %vm1117_vm3, %v986_v38  ;;  %v3535_v39 = vld [vmem:[%s4041_s19 + $0x181] sm:$0xff]  ;;  %v3534_v38 = vld [vmem:[%s4041_s19 + $0x179] sm:$0xff] }
 0x153   : > { %1298 = vrot.lane.b32.xlu1 %v3507_v36, %s3992_s23  ;;  %1296 = vrot.lane.b32.xlu0 %v3506_v34, %s3992_s23 }
 0x155   : > { %v992_v43 = vpop.permute.xlu1 %991  ;;  %v990_v42 = vpop.permute.xlu0 %989 }
 0x156   : > { %1127 = vst.msk [vmem:[#allocation2 + $0x48] sm:$0xff] %vm1117_vm3, %v992_v43  ;;  %1126 = vst.msk [vmem:[#allocation2 + $0x40] sm:$0xff] %vm1117_vm3, %v990_v42  ;;  %v3537_v43 = vld [vmem:[%s4041_s19 + $0x191] sm:$0xff]  ;;  %v3536_v42 = vld [vmem:[%s4041_s19 + $0x189] sm:$0xff] }
 0x157   : > { %1302 = vrot.lane.b32.xlu1 %v3509_v41, %s3992_s23  ;;  %1300 = vrot.lane.b32.xlu0 %v3508_v40, %s3992_s23 }
 0x159   : > { %v996_v49 = vpop.permute.xlu1 %995  ;;  %v994_v48 = vpop.permute.xlu0 %993 }
 0x15a   : > { %1129 = vst.msk [vmem:[#allocation2 + $0x58] sm:$0xff] %vm1117_vm3, %v996_v49  ;;  %1128 = vst.msk [vmem:[#allocation2 + $0x50] sm:$0xff] %vm1117_vm3, %v994_v48  ;;  %v3539_v49 = vld [vmem:[%s4041_s19 + $0x22] sm:$0xff]  ;;  %v3538_v48 = vld [vmem:[%s4041_s19 + $0x1a] sm:$0xff] }
 0x15b   : > { %1306 = vrot.lane.b32.xlu1 %v3511_v47, %s3992_s23  ;;  %1304 = vrot.lane.b32.xlu0 %v3510_v46, %s3992_s23 }
 0x15d   : > { %v1000_v57 = vpop.permute.xlu1 %999  ;;  %v998_v56 = vpop.permute.xlu0 %997 }
 0x15e   : > { %1131 = vst.msk [vmem:[#allocation2 + $0x68] sm:$0xff] %vm1117_vm3, %v1000_v57  ;;  %1130 = vst.msk [vmem:[#allocation2 + $0x60] sm:$0xff] %vm1117_vm3, %v998_v56  ;;  %v4865_v57 = vld [vmem:[%s4041_s19 + $0x32] sm:$0xff]  ;;  %v3540_v56 = vld [vmem:[%s4041_s19 + $0x2a] sm:$0xff] }
 0x15f   : > { %1310 = vrot.lane.b32.xlu1 %v3513_v53, %s3992_s23  ;;  %1308 = vrot.lane.b32.xlu0 %v3512_v52, %s3992_s23 }
 0x161   : > { %v1004_v1 = vpop.permute.xlu1 %1003  ;;  %v1002_v0 = vpop.permute.xlu0 %1001 }
 0x162   : > { %1133 = vst.msk [vmem:[#allocation2 + $0x78] sm:$0xff] %vm1117_vm3, %v1004_v1  ;;  %1132 = vst.msk [vmem:[#allocation2 + $0x70] sm:$0xff] %vm1117_vm3, %v1002_v0  ;;  %v4874_v1 = vld [vmem:[%s4041_s19 + $0x42] sm:$0xff]  ;;  %v4877_v0 = vld [vmem:[%s4041_s19 + $0x3a] sm:$0xff] }
 0x163   : > { %1314 = vrot.lane.b32.xlu1 %v3515_v61, %s3992_s23  ;;  %1312 = vrot.lane.b32.xlu0 %v3514_v60, %s3992_s23 }
 0x165   : > { %v1008_v9 = vpop.permute.xlu1 %1007  ;;  %v1006_v8 = vpop.permute.xlu0 %1005 }
 0x166   : > { %1135 = vst.msk [vmem:[#allocation2 + $0x88] sm:$0xff] %vm1117_vm3, %v1008_v9  ;;  %1134 = vst.msk [vmem:[#allocation2 + $0x80] sm:$0xff] %vm1117_vm3, %v1006_v8  ;;  %v4886_v8 = vld [vmem:[%s4041_s19 + $0x52] sm:$0xff] }
 0x167   : > { %1318 = vrot.lane.b32.xlu1 %v4757_v5, %s3992_s23  ;;  %1316 = vrot.lane.b32.xlu0 %v3516_v4, %s3992_s23 }
 0x169   : > { %v1012_v21 = vpop.permute.xlu1 %1011  ;;  %v1010_v35 = vpop.permute.xlu0 %1009 }
 0x16a   : > { %1137 = vst.msk [vmem:[#allocation2 + $0x98] sm:$0xff] %vm1117_vm3, %v1012_v21  ;;  %1136 = vst.msk [vmem:[#allocation2 + $0x90] sm:$0xff] %vm1117_vm3, %v1010_v35  ;;  %v4889_v21 = vld [vmem:[%s4041_s19 + $0x4a] sm:$0xff] }
 0x16b   : > { %1322 = vrot.lane.b32.xlu1 %v4766_v13, %s3992_s23  ;;  %1320 = vrot.lane.b32.xlu0 %v4769_v12, %s3992_s23 }
 0x16d   : > { %v1016_v50 = vpop.permute.xlu1 %1015  ;;  %v1014_v29 = vpop.permute.xlu0 %1013 }
 0x16e   : > { %1139 = vst.msk [vmem:[#allocation2 + $0xa8] sm:$0xff] %vm1117_vm3, %v1016_v50  ;;  %1138 = vst.msk [vmem:[#allocation2 + $0xa0] sm:$0xff] %vm1117_vm3, %v1014_v29  ;;  %v4898_v29 = vld [vmem:[%s4041_s19 + $0x62] sm:$0xff] }
 0x16f   : > { %1326 = vrot.lane.b32.xlu1 %v4778_v17, %s3992_s23  ;;  %1324 = vrot.lane.b32.xlu0 %v4781_v58, %s3992_s23 }
 0x171   : > { %v1020_v63 = vpop.permute.xlu1 %1019  ;;  %v1018_v45 = vpop.permute.xlu0 %1017 }
 0x172   : > { %1141 = vst.msk [vmem:[#allocation2 + $0xb8] sm:$0xff] %vm1117_vm3, %v1020_v63  ;;  %1140 = vst.msk [vmem:[#allocation2 + $0xb0] sm:$0xff] %vm1117_vm3, %v1018_v45  ;;  %v4901_v63 = vld [vmem:[%s4041_s19 + $0x5a] sm:$0xff] }
 0x173   : > { %1330 = vrot.lane.b32.xlu1 %v4790_v59, %s3992_s23  ;;  %1328 = vrot.lane.b32.xlu0 %v4793_v62, %s3992_s23 }
 0x175   : > { %v1024_v7 = vpop.permute.xlu1 %1023  ;;  %v1022_v14 = vpop.permute.xlu0 %1021 }
 0x176   : > { %1143 = vst.msk [vmem:[#allocation2 + $0xc8] sm:$0xff] %vm1117_vm3, %v1024_v7  ;;  %1142 = vst.msk [vmem:[#allocation2 + $0xc0] sm:$0xff] %vm1117_vm3, %v1022_v14  ;;  %v4910_v14 = vld [vmem:[%s4041_s19 + $0x72] sm:$0xff] }
 0x177   : > { %1334 = vrot.lane.b32.xlu1 %v4802_v3, %s3992_s23  ;;  %1332 = vrot.lane.b32.xlu0 %v4805_v6, %s3992_s23 }
 0x179   : > { %v1028_v44 = vpop.permute.xlu1 %1027  ;;  %v1026_v55 = vpop.permute.xlu0 %1025 }
 0x17a   : > { %1145 = vst.msk [vmem:[#allocation2 + $0xd8] sm:$0xff] %vm1117_vm3, %v1028_v44  ;;  %1144 = vst.msk [vmem:[#allocation2 + $0xd0] sm:$0xff] %vm1117_vm3, %v1026_v55  ;;  %v4913_v44 = vld [vmem:[%s4041_s19 + $0x6a] sm:$0xff] }
 0x17b   : > { %1338 = vrot.lane.b32.xlu1 %v4814_v15, %s3992_s23  ;;  %1336 = vrot.lane.b32.xlu0 %v4817_v37, %s3992_s23 }
 0x17d   : > { %v1032_v20 = vpop.permute.xlu1 %1031  ;;  %v1030_v25 = vpop.permute.xlu0 %1029 }
 0x17e   : > { %1147 = vst.msk [vmem:[#allocation2 + $0xe8] sm:$0xff] %vm1117_vm3, %v1032_v20  ;;  %1146 = vst.msk [vmem:[#allocation2 + $0xe0] sm:$0xff] %vm1117_vm3, %v1030_v25  ;;  %v4922_v20 = vld [vmem:[%s4041_s19 + $0x82] sm:$0xff]  ;;  %v4925_v25 = vld [vmem:[%s4041_s19 + $0x7a] sm:$0xff] }
 0x17f   : > { %1342 = vrot.lane.b32.xlu1 %v3529_v16, %s3992_s23  ;;  %1340 = vrot.lane.b32.xlu0 %v4827_v23, %s3992_s23 }
 0x181   : > { %v1036_v31 = vpop.permute.xlu1 %1035  ;;  %v1034_v30 = vpop.permute.xlu0 %1033 }
 0x182   : > { %1149 = vst.msk [vmem:[#allocation2 + $0xf8] sm:$0xff] %vm1117_vm3, %v1036_v31  ;;  %1148 = vst.msk [vmem:[#allocation2 + $0xf0] sm:$0xff] %vm1117_vm3, %v1034_v30  ;;  %v4934_v31 = vld [vmem:[%s4041_s19 + $0x92] sm:$0xff]  ;;  %v4937_v30 = vld [vmem:[%s4041_s19 + $0x8a] sm:$0xff] }
 0x183   : > { %1346 = vrot.lane.b32.xlu1 %v3531_v27, %s3992_s23  ;;  %1344 = vrot.lane.b32.xlu0 %v3530_v26, %s3992_s23 }
 0x185   : > { %v1040_v36 = vpop.permute.xlu1 %1039  ;;  %v1038_v34 = vpop.permute.xlu0 %1037 }
 0x186   : > { %1151 = vst.msk [vmem:[#allocation2 + $0x108] sm:$0xff] %vm1117_vm3, %v1040_v36  ;;  %1150 = vst.msk [vmem:[#allocation2 + $0x100] sm:$0xff] %vm1117_vm3, %v1038_v34  ;;  %v3555_v36 = vld [vmem:[%s4041_s19 + $0xa2] sm:$0xff]  ;;  %v4947_v34 = vld [vmem:[%s4041_s19 + $0x9a] sm:$0xff] }
 0x187   : > { %1350 = vrot.lane.b32.xlu1 %v3533_v33, %s3992_s23  ;;  %1348 = vrot.lane.b32.xlu0 %v3532_v32, %s3992_s23 }
 0x189   : > { %v1044_v41 = vpop.permute.xlu1 %1043  ;;  %v1042_v40 = vpop.permute.xlu0 %1041 }
 0x18a   : > { %1153 = vst.msk [vmem:[#allocation2 + $0x118] sm:$0xff] %vm1117_vm3, %v1044_v41  ;;  %1152 = vst.msk [vmem:[#allocation2 + $0x110] sm:$0xff] %vm1117_vm3, %v1042_v40  ;;  %v3557_v41 = vld [vmem:[%s4041_s19 + $0xb2] sm:$0xff]  ;;  %v3556_v40 = vld [vmem:[%s4041_s19 + $0xaa] sm:$0xff] }
 0x18b   : > { %1354 = vrot.lane.b32.xlu1 %v3535_v39, %s3992_s23  ;;  %1352 = vrot.lane.b32.xlu0 %v3534_v38, %s3992_s23 }
 0x18d   : > { %v1048_v47 = vpop.permute.xlu1 %1047  ;;  %v1046_v46 = vpop.permute.xlu0 %1045 }
 0x18e   : > { %1155 = vst.msk [vmem:[#allocation2 + $0x128] sm:$0xff] %vm1117_vm3, %v1048_v47  ;;  %1154 = vst.msk [vmem:[#allocation2 + $0x120] sm:$0xff] %vm1117_vm3, %v1046_v46  ;;  %v3559_v47 = vld [vmem:[%s4041_s19 + $0xc2] sm:$0xff]  ;;  %v3558_v46 = vld [vmem:[%s4041_s19 + $0xba] sm:$0xff] }
 0x18f   : > { %1358 = vrot.lane.b32.xlu1 %v3537_v43, %s3992_s23  ;;  %1356 = vrot.lane.b32.xlu0 %v3536_v42, %s3992_s23 }
 0x191   : > { %v1052_v53 = vpop.permute.xlu1 %1051  ;;  %v1050_v52 = vpop.permute.xlu0 %1049 }
 0x192   : > { %1157 = vst.msk [vmem:[#allocation2 + $0x138] sm:$0xff] %vm1117_vm3, %v1052_v53  ;;  %1156 = vst.msk [vmem:[#allocation2 + $0x130] sm:$0xff] %vm1117_vm3, %v1050_v52  ;;  %v3561_v53 = vld [vmem:[%s4041_s19 + $0xd2] sm:$0xff]  ;;  %v3560_v52 = vld [vmem:[%s4041_s19 + $0xca] sm:$0xff] }
 0x193   : > { %1557 = vrot.lane.b32.xlu1 %v3539_v49, %s3993_s24  ;;  %1555 = vrot.lane.b32.xlu0 %v3538_v48, %s3993_s24 }
 0x195   : > { %v1056_v61 = vpop.permute.xlu1 %1055  ;;  %v1054_v60 = vpop.permute.xlu0 %1053 }
 0x196   : > { %1159 = vst.msk [vmem:[#allocation2 + $0x148] sm:$0xff] %vm1117_vm3, %v1056_v61  ;;  %1158 = vst.msk [vmem:[#allocation2 + $0x140] sm:$0xff] %vm1117_vm3, %v1054_v60  ;;  %v3563_v60 = vld [vmem:[%s4041_s19 + $0xe2] sm:$0xff] }
 0x197   : > { %1561 = vrot.lane.b32.xlu1 %v4865_v57, %s3993_s24  ;;  %1559 = vrot.lane.b32.xlu0 %v3540_v56, %s3993_s24 }
 0x199   : > { %v1060_v4 = vpop.permute.xlu1 %1059  ;;  %v1058_v9 = vpop.permute.xlu0 %1057 }
 0x19a   : > { %1161 = vst.msk [vmem:[#allocation2 + $0x158] sm:$0xff] %vm1117_vm3, %v1060_v4  ;;  %1160 = vst.msk [vmem:[#allocation2 + $0x150] sm:$0xff] %vm1117_vm3, %v1058_v9  ;;  %v3562_v4 = vld [vmem:[%s4041_s19 + $0xda] sm:$0xff] }
 0x19b   : > { %1565 = vrot.lane.b32.xlu1 %v4874_v1, %s3993_s24  ;;  %1563 = vrot.lane.b32.xlu0 %v4877_v0, %s3993_s24 }
 0x19d   : > { %v1064_v35 = vpop.permute.xlu1 %1063  ;;  %v1062_v50 = vpop.permute.xlu0 %1061 }
 0x19e   : > { %1163 = vst.msk [vmem:[#allocation2 + $0x168] sm:$0xff] %vm1117_vm3, %v1064_v35  ;;  %1162 = vst.msk [vmem:[#allocation2 + $0x160] sm:$0xff] %vm1117_vm3, %v1062_v50  ;;  %v3586_v50 = vld [vmem:[%s4041_s19 + $0x30] sm:$0xff] }
 0x19f   : > { %1569 = vrot.lane.b32.xlu1 %v4886_v8, %s3993_s24  ;;  %1567 = vrot.lane.b32.xlu0 %v4889_v21, %s3993_s24 }
 0x1a1   : > { %v1068_v45 = vpop.permute.xlu1 %1067  ;;  %v1066_v7 = vpop.permute.xlu0 %1065 }
 0x1a2   : > { %1165 = vst.msk [vmem:[#allocation2 + $0x178] sm:$0xff] %vm1117_vm3, %v1068_v45  ;;  %1164 = vst.msk [vmem:[#allocation2 + $0x170] sm:$0xff] %vm1117_vm3, %v1066_v7  ;;  %v3564_v45 = vld [vmem:[%s4041_s19 + $0xea] sm:$0xff] }
 0x1a3   : > { %1573 = vrot.lane.b32.xlu1 %v4898_v29, %s3993_s24  ;;  %1571 = vrot.lane.b32.xlu0 %v4901_v63, %s3993_s24 }
 0x1a5   : > { %v1267_v55 = vpop.permute.xlu1 %1266  ;;  %v1265_v16 = vpop.permute.xlu0 %1264 }
 0x1a6   : > { %1410 = vst.msk [vmem:[#allocation2 + $0x8] sm:$0xff] %vm1408_vm4, %v1267_v55  ;;  %1409 = vst.msk [vmem:[#allocation2] sm:$0xff] %vm1408_vm4, %v1265_v16  ;;  %v3587_v16 = vld [vmem:[%s4041_s19 + $0x38] sm:$0xff] }
 0x1a7   : > { %1577 = vrot.lane.b32.xlu1 %v4910_v14, %s3993_s24  ;;  %1575 = vrot.lane.b32.xlu0 %v4913_v44, %s3993_s24 }
 0x1a9   : > { %v1271_v27 = vpop.permute.xlu1 %1270  ;;  %v1269_v26 = vpop.permute.xlu0 %1268 }
 0x1aa   : > { %1412 = vst.msk [vmem:[#allocation2 + $0x18] sm:$0xff] %vm1408_vm4, %v1271_v27  ;;  %1411 = vst.msk [vmem:[#allocation2 + $0x10] sm:$0xff] %vm1408_vm4, %v1269_v26  ;;  %v3610_v27 = vld [vmem:[%s4041_s19 + $0xf0] sm:$0xff] }
 0x1ab   : > { %1581 = vrot.lane.b32.xlu1 %v4922_v20, %s3993_s24  ;;  %1579 = vrot.lane.b32.xlu0 %v4925_v25, %s3993_s24 }
 0x1ad   : > { %v1275_v33 = vpop.permute.xlu1 %1274  ;;  %v1273_v32 = vpop.permute.xlu0 %1272 }
 0x1ae   : > { %1414 = vst.msk [vmem:[#allocation2 + $0x28] sm:$0xff] %vm1408_vm4, %v1275_v33  ;;  %1413 = vst.msk [vmem:[#allocation2 + $0x20] sm:$0xff] %vm1408_vm4, %v1273_v32  ;;  %v2669_v32 = vld [vmem:[%s5741_s1] sm:$0xff] }
 0x1af   : > { %1585 = vrot.lane.b32.xlu1 %v4934_v31, %s3993_s24  ;;  %1583 = vrot.lane.b32.xlu0 %v4937_v30, %s3993_s24 }
 0x1b1   : > { %v1279_v39 = vpop.permute.xlu1 %1278  ;;  %v1277_v38 = vpop.permute.xlu0 %1276 }
 0x1b2   : > { %1416 = vst.msk [vmem:[#allocation2 + $0x38] sm:$0xff] %vm1408_vm4, %v1279_v39  ;;  %1415 = vst.msk [vmem:[#allocation2 + $0x30] sm:$0xff] %vm1408_vm4, %v1277_v38  ;;  %v3611_v38 = vld [vmem:[%s4041_s19 + $0xf8] sm:$0xff] }
 0x1b3   : > { %1589 = vrot.lane.b32.xlu1 %v3555_v36, %s3993_s24  ;;  %1587 = vrot.lane.b32.xlu0 %v4947_v34, %s3993_s24  ;;  %v2670_v36 = vld [vmem:[%s5741_s1 + $0x8] sm:$0xff] }
 0x1b4   : > { %v3917_v39 = vpack.c.bf16 %v2670_v36, %v2669_v32 }
 0x1b5   : > { %v1283_v43 = vpop.permute.xlu1 %1282  ;;  %v1281_v42 = vpop.permute.xlu0 %1280 }
 0x1b6   : > { %1418 = vst.msk [vmem:[#allocation2 + $0x48] sm:$0xff] %vm1408_vm4, %v1283_v43  ;;  %1417 = vst.msk [vmem:[#allocation2 + $0x40] sm:$0xff] %vm1408_vm4, %v1281_v42  ;;  %3918 = vmatprep.subr.bf16.mxu0 %v3917_v39  ;;  %3925 = vmatprep.subr.bf16.mxu1 %v3917_v39  ;;  %v2671_v43 = vld [vmem:[%s5741_s1 + $0x10] sm:$0xff]  ;;  %v2672_v42 = vld [vmem:[%s5741_s1 + $0x18] sm:$0xff] }
 0x1b7   : > { %1593 = vrot.lane.b32.xlu1 %v3557_v41, %s3993_s24  ;;  %1591 = vrot.lane.b32.xlu0 %v3556_v40, %s3993_s24 }
 0x1b8   : > { %3920 = vmatpush3.bf16.msra.mxu0 %v3917_v39  ;;  %3928 = vmatpush3.bf16.msra.mxu1 %v3917_v39  ;;  %v3590_v39 = vld [vmem:[%s4041_s19 + $0x50] sm:$0xff] }
 0x1b9   : > { %v1287_v49 = vpop.permute.xlu1 %1286  ;;  %v1285_v48 = vpop.permute.xlu0 %1284 }
 0x1ba   : > { %1420 = vst.msk [vmem:[#allocation2 + $0x58] sm:$0xff] %vm1408_vm4, %v1287_v49  ;;  %1419 = vst.msk [vmem:[#allocation2 + $0x50] sm:$0xff] %vm1408_vm4, %v1285_v48 }
 0x1bb   : > { %1597 = vrot.lane.b32.xlu1 %v3559_v47, %s3993_s24  ;;  %1595 = vrot.lane.b32.xlu0 %v3558_v46, %s3993_s24  ;;  %v3921_v47 = vpack.c.bf16 %v2672_v42, %v2671_v43 }
 0x1bd   : > { %v1291_v56 = vpop.permute.xlu1 %1290  ;;  %v1289_v61 = vpop.permute.xlu0 %1288  ;;  %3922 = vmatprep.subr.bf16.mxu0 %v3921_v47  ;;  %3926 = vmatprep.subr.bf16.mxu1 %v3921_v47 }
 0x1be   : > { %1422 = vst.msk [vmem:[#allocation2 + $0x68] sm:$0xff] %vm1408_vm4, %v1291_v56  ;;  %1421 = vst.msk [vmem:[#allocation2 + $0x60] sm:$0xff] %vm1408_vm4, %v1289_v61  ;;  %3924 = vmatpush3.bf16.msra.mxu0 %v3921_v47  ;;  %3929 = vmatpush3.bf16.msra.mxu1 %v3921_v47  ;;  %v3707_v56 = vld [vmem:[%s4041_s19 + $0xfa] sm:$0xff] }
 0x1bf   : > { %1601 = vrot.lane.b32.xlu1 %v3561_v53, %s3993_s24  ;;  %1599 = vrot.lane.b32.xlu0 %v3560_v52, %s3993_s24 }
 0x1c1   : > { %v1295_v9 = vpop.permute.xlu1 %1294  ;;  %v1293_v35 = vpop.permute.xlu0 %1292 }
 0x1c2   : > { %1424 = vst.msk [vmem:[#allocation2 + $0x78] sm:$0xff] %vm1408_vm4, %v1295_v9  ;;  %1423 = vst.msk [vmem:[#allocation2 + $0x70] sm:$0xff] %vm1408_vm4, %v1293_v35  ;;  %v3589_v35 = vld [vmem:[%s4041_s19 + $0x48] sm:$0xff] }
 0x1c3   : > { %1605 = vrot.lane.b32.xlu1 %v3563_v60, %s3993_s24  ;;  %1603 = vrot.lane.b32.xlu0 %v3562_v4, %s3993_s24  ;;  %v3588_v60 = vld [vmem:[%s4041_s19 + $0x40] sm:$0xff] }
 0x1c5   : > { %v1299_v7 = vpop.permute.xlu1 %1298  ;;  %v1297_v55 = vpop.permute.xlu0 %1296 }
 0x1c6   : > { %1426 = vst.msk [vmem:[#allocation2 + $0x88] sm:$0xff] %vm1408_vm4, %v1299_v7  ;;  %1425 = vst.msk [vmem:[#allocation2 + $0x80] sm:$0xff] %vm1408_vm4, %v1297_v55 }
 0x1c7   : > { %1846 = vrot.lane.b32.xlu1 %v3586_v50, %s3994_s25  ;;  %1607 = vrot.lane.b32.xlu0 %v3564_v45, %s3993_s24 }
 0x1c9   : > { %v1303_v26 = vpop.permute.xlu1 %1302  ;;  %v1301_v33 = vpop.permute.xlu0 %1300 }
 0x1ca   : > { %1428 = vst.msk [vmem:[#allocation2 + $0x98] sm:$0xff] %vm1408_vm4, %v1303_v26  ;;  %1427 = vst.msk [vmem:[#allocation2 + $0x90] sm:$0xff] %vm1408_vm4, %v1301_v33  ;;  %v3708_v26 = vld [vmem:[%s4041_s19 + $0x102] sm:$0xff] }
 0x1cb   : > { %1848 = vrot.lane.b32.xlu1 %v3587_v16, %s3994_s25  ;;  %1894 = vrot.lane.b32.xlu0 %v3610_v27, %s3994_s25 }
 0x1cd   : > { %v1307_v41 = vpop.permute.xlu1 %1306  ;;  %v1305_v40 = vpop.permute.xlu0 %1304 }
 0x1ce   : > { %1430 = vst.msk [vmem:[#allocation2 + $0xa8] sm:$0xff] %vm1408_vm4, %v1307_v41  ;;  %1429 = vst.msk [vmem:[#allocation2 + $0xa0] sm:$0xff] %vm1408_vm4, %v1305_v40  ;;  %v3591_v40 = vld [vmem:[%s4041_s19 + $0x58] sm:$0xff] }
 0x1cf   : > { %2137 = vrot.lane.b32.xlu1 %v4655_v2, %s3995_s7  ;;  %1896 = vrot.lane.b32.xlu0 %v3611_v38, %s3994_s25  ;;  %v2673_v2 = vld [vmem:[%s5741_s1 + $0x20] sm:$0xf] }
 0x1d0   : > { %3843 = vmatprep.subr.msk.mxu0 %vm2826_vm5, %v2673_v2  ;;  %3927 = vmatprep.subr.msk.mxu1 %vm2826_vm5, %v2673_v2 }
 0x1d1   : > { %v1311_v46 = vpop.permute.xlu1 %1310  ;;  %v1309_v49 = vpop.permute.xlu0 %1308  ;;  %3844 = vmatpush3.msk.msra.mxu0 %vm2826_vm5, %v2673_v2  ;;  %3930 = vmatpush3.msk.msra.mxu1 %vm2826_vm5, %v2673_v2 }
 0x1d2   : > { %1432 = vst.msk [vmem:[#allocation2 + $0xb8] sm:$0xff] %vm1408_vm4, %v1311_v46  ;;  %1431 = vst.msk [vmem:[#allocation2 + $0xb0] sm:$0xff] %vm1408_vm4, %v1309_v49 }
 0x1d3   : > { %2139 = vrot.lane.b32.xlu1 %v4667_v11, %s3995_s7  ;;  %2185 = vrot.lane.b32.xlu0 %v4757_v5, %s3995_s7  ;;  %v3706_v11 = vld [vmem:[%s4041_s19 + $0xf2] sm:$0xff] }
 0x1d5   : > { %v1315_v48 = vpop.permute.xlu1 %1314  ;;  %v1313_v53 = vpop.permute.xlu0 %1312 }
 0x1d6   : > { %1434 = vst.msk [vmem:[#allocation2 + $0xc8] sm:$0xff] %vm1408_vm4, %v1315_v48  ;;  %1433 = vst.msk [vmem:[#allocation2 + $0xc0] sm:$0xff] %vm1408_vm4, %v1313_v53  ;;  %v3710_v48 = vld [vmem:[%s4041_s19 + $0x112] sm:$0xff] }
 0x1d7   : > { %2428 = vrot.lane.b32.xlu1 %v4865_v57, %s3996_s10  ;;  %2187 = vrot.lane.b32.xlu0 %v4769_v12, %s3995_s7  ;;  %v3612_v12 = vld [vmem:[%s4041_s19 + $0x100] sm:$0xff] }
 0x1d9   : > { %v1319_v5 = vpop.permute.xlu1 %1318  ;;  %v1317_v52 = vpop.permute.xlu0 %1316 }
 0x1da   : > { %1436 = vst.msk [vmem:[#allocation2 + $0xd8] sm:$0xff] %vm1408_vm4, %v1319_v5  ;;  %1435 = vst.msk [vmem:[#allocation2 + $0xd0] sm:$0xff] %vm1408_vm4, %v1317_v52  ;;  %v3592_v52 = vld [vmem:[%s4041_s19 + $0x60] sm:$0xff] }
 0x1db   : > { %2430 = vrot.lane.b32.xlu1 %v4877_v0, %s3996_s10  ;;  %2476 = vrot.lane.b32.xlu0 %v3706_v11, %s3996_s10  ;;  %v3613_v0 = vld [vmem:[%s4041_s19 + $0x108] sm:$0xff] }
 0x1dd   : > { %v1323_v57 = vpop.permute.xlu1 %1322  ;;  %v1321_v61 = vpop.permute.xlu0 %1320 }
 0x1de   : > { %1438 = vst.msk [vmem:[#allocation2 + $0xe8] sm:$0xff] %vm1408_vm4, %v1323_v57  ;;  %1437 = vst.msk [vmem:[#allocation2 + $0xe0] sm:$0xff] %vm1408_vm4, %v1321_v61  ;;  %v3593_v61 = vld [vmem:[%s4041_s19 + $0x68] sm:$0xff] }
 0x1df   : > { %1609 = vrot.lane.b32.xlu1 %v3706_v11, %s3993_s24  ;;  %2478 = vrot.lane.b32.xlu0 %v3707_v56, %s3996_s10 }
 0x1e1   : > { %v1327_v4 = vpop.permute.xlu1 %1326  ;;  %v1325_v9 = vpop.permute.xlu0 %1324 }
 0x1e2   : > { %1440 = vst.msk [vmem:[#allocation2 + $0xf8] sm:$0xff] %vm1408_vm4, %v1327_v4  ;;  %1439 = vst.msk [vmem:[#allocation2 + $0xf0] sm:$0xff] %vm1408_vm4, %v1325_v9 }
 0x1e3   : > { %1898 = vrot.lane.b32.xlu1 %v3612_v12, %s3994_s25  ;;  %1850 = vrot.lane.b32.xlu0 %v3588_v60, %s3994_s25 }
 0x1e5   : > { %v1331_v50 = vpop.permute.xlu1 %1330  ;;  %v1329_v45 = vpop.permute.xlu0 %1328 }
 0x1e6   : > { %1442 = vst.msk [vmem:[#allocation2 + $0x108] sm:$0xff] %vm1408_vm4, %v1331_v50  ;;  %1441 = vst.msk [vmem:[#allocation2 + $0x100] sm:$0xff] %vm1408_vm4, %v1329_v45  ;;  %v3712_v50 = vld [vmem:[%s4041_s19 + $0x122] sm:$0xff] }
 0x1e7   : > { %1900 = vrot.lane.b32.xlu1 %v3613_v0, %s3994_s25  ;;  %1852 = vrot.lane.b32.xlu0 %v3589_v35, %s3994_s25 }
 0x1e9   : > { %v1335_v7 = vpop.permute.xlu1 %1334  ;;  %v1333_v55 = vpop.permute.xlu0 %1332 }
 0x1ea   : > { %1444 = vst.msk [vmem:[#allocation2 + $0x118] sm:$0xff] %vm1408_vm4, %v1335_v7  ;;  %1443 = vst.msk [vmem:[#allocation2 + $0x110] sm:$0xff] %vm1408_vm4, %v1333_v55 }
 0x1eb   : > { %2189 = vrot.lane.b32.xlu1 %v4766_v13, %s3995_s7  ;;  %2141 = vrot.lane.b32.xlu0 %v4664_v10, %s3995_s7 }
 0x1ed   : > { %v1339_v16 = vpop.permute.xlu1 %1338  ;;  %v1337_v27 = vpop.permute.xlu0 %1336 }
 0x1ee   : > { %1446 = vst.msk [vmem:[#allocation2 + $0x128] sm:$0xff] %vm1408_vm4, %v1339_v16  ;;  %1445 = vst.msk [vmem:[#allocation2 + $0x120] sm:$0xff] %vm1408_vm4, %v1337_v27  ;;  %v3594_v16 = vld [vmem:[%s4041_s19 + $0x70] sm:$0xff] }
 0x1ef   : > { %2191 = vrot.lane.b32.xlu1 %v4781_v58, %s3995_s7  ;;  %2143 = vrot.lane.b32.xlu0 %v4679_v28, %s3995_s7  ;;  %v3709_v28 = vld [vmem:[%s4041_s19 + $0x10a] sm:$0xff] }
 0x1f1   : > { %v1343_v33 = vpop.permute.xlu1 %1342  ;;  %v1341_v32 = vpop.permute.xlu0 %1340 }
 0x1f2   : > { %1448 = vst.msk [vmem:[#allocation2 + $0x138] sm:$0xff] %vm1408_vm4, %v1343_v33  ;;  %1447 = vst.msk [vmem:[#allocation2 + $0x130] sm:$0xff] %vm1408_vm4, %v1341_v32  ;;  %v3595_v33 = vld [vmem:[%s4041_s19 + $0x78] sm:$0xff] }
 0x1f3   : > { %2480 = vrot.lane.b32.xlu1 %v3708_v26, %s3996_s10  ;;  %2432 = vrot.lane.b32.xlu0 %v4874_v1, %s3996_s10  ;;  %v3614_v1 = vld [vmem:[%s4041_s19 + $0x110] sm:$0xff] }
 0x1f5   : > { %v1347_v10 = vpop.permute.xlu1 %1346  ;;  %v1345_v13 = vpop.permute.xlu0 %1344 }
 0x1f6   : > { %1450 = vst.msk [vmem:[#allocation2 + $0x148] sm:$0xff] %vm1408_vm4, %v1347_v10  ;;  %1449 = vst.msk [vmem:[#allocation2 + $0x140] sm:$0xff] %vm1408_vm4, %v1345_v13 }
 0x1f7   : > { %2434 = vrot.lane.b32.xlu1 %v4889_v21, %s3996_s10  ;;  %1611 = vrot.lane.b32.xlu0 %v3707_v56, %s3993_s24  ;;  %v3615_v21 = vld [vmem:[%s4041_s19 + $0x118] sm:$0xff] }
 0x1f9   : > { %v1351_v58 = vpop.permute.xlu1 %1350  ;;  %v1349_v36 = vpop.permute.xlu0 %1348 }
 0x1fa   : > { %1452 = vst.msk [vmem:[#allocation2 + $0x158] sm:$0xff] %vm1408_vm4, %v1351_v58  ;;  %1451 = vst.msk [vmem:[#allocation2 + $0x150] sm:$0xff] %vm1408_vm4, %v1349_v36 }
 0x1fb   : > { %1613 = vrot.lane.b32.xlu1 %v3708_v26, %s3993_s24  ;;  %2482 = vrot.lane.b32.xlu0 %v3709_v28, %s3996_s10 }
 0x1fd   : > { %v1355_v38 = vpop.permute.xlu1 %1354  ;;  %v1353_v41 = vpop.permute.xlu0 %1352 }
 0x1fe   : > { %1454 = vst.msk [vmem:[#allocation2 + $0x168] sm:$0xff] %vm1408_vm4, %v1355_v38  ;;  %1453 = vst.msk [vmem:[#allocation2 + $0x160] sm:$0xff] %vm1408_vm4, %v1353_v41 }
 0x1ff   : > { %1902 = vrot.lane.b32.xlu1 %v3614_v1, %s3994_s25  ;;  %1854 = vrot.lane.b32.xlu0 %v3590_v39, %s3994_s25  ;;  %v3714_v1 = vld [vmem:[%s4041_s19 + $0x132] sm:$0xff] }
 0x201   : > { %v1359_v43 = vpop.permute.xlu1 %1358  ;;  %v1357_v42 = vpop.permute.xlu0 %1356 }
 0x202   : > { %1456 = vst.msk [vmem:[#allocation2 + $0x178] sm:$0xff] %vm1408_vm4, %v1359_v43  ;;  %1455 = vst.msk [vmem:[#allocation2 + $0x170] sm:$0xff] %vm1408_vm4, %v1357_v42  ;;  %v3621_v42 = vld [vmem:[%s4041_s19 + $0x148] sm:$0xff] }
 0x203   : > { %1904 = vrot.lane.b32.xlu1 %v3615_v21, %s3994_s25  ;;  %1856 = vrot.lane.b32.xlu0 %v3591_v40, %s3994_s25  ;;  %v3596_v21 = vld [vmem:[%s4041_s19 + $0x80] sm:$0xff] }
 0x205   : > { %v1558_v47 = vpop.permute.xlu1 %1557  ;;  %v1556_v46 = vpop.permute.xlu0 %1555 }
 0x206   : > { %1701 = vst.msk [vmem:[#allocation2 + $0x8] sm:$0xff] %vm1699_vm6, %v1558_v47  ;;  %1700 = vst.msk [vmem:[#allocation2] sm:$0xff] %vm1699_vm6, %v1556_v46  ;;  %v3597_v47 = vld [vmem:[%s4041_s19 + $0x88] sm:$0xff] }
 0x207   : > { %2193 = vrot.lane.b32.xlu1 %v4778_v17, %s3995_s7  ;;  %2145 = vrot.lane.b32.xlu0 %v4676_v22, %s3995_s7 }
 0x209   : > { %v1562_v49 = vpop.permute.xlu1 %1561  ;;  %v1560_v2 = vpop.permute.xlu0 %1559 }
 0x20a   : > { %1703 = vst.msk [vmem:[#allocation2 + $0x18] sm:$0xff] %vm1699_vm6, %v1562_v49  ;;  %1702 = vst.msk [vmem:[#allocation2 + $0x10] sm:$0xff] %vm1699_vm6, %v1560_v2 }
 0x20b   : > { %2195 = vrot.lane.b32.xlu1 %v4793_v62, %s3995_s7  ;;  %2147 = vrot.lane.b32.xlu0 %v4691_v54, %s3995_s7  ;;  %v3711_v54 = vld [vmem:[%s4041_s19 + $0x11a] sm:$0xff] }
 0x20d   : > { %v1566_v53 = vpop.permute.xlu1 %1565  ;;  %v1564_v11 = vpop.permute.xlu0 %1563 }
 0x20e   : > { %1705 = vst.msk [vmem:[#allocation2 + $0x28] sm:$0xff] %vm1699_vm6, %v1566_v53  ;;  %1704 = vst.msk [vmem:[#allocation2 + $0x20] sm:$0xff] %vm1699_vm6, %v1564_v11  ;;  %v3644_v53 = vld [vmem:[%s4041_s19 + $0x81] sm:$0xff] }
 0x20f   : > { %2484 = vrot.lane.b32.xlu1 %v3710_v48, %s3996_s10  ;;  %2436 = vrot.lane.b32.xlu0 %v4886_v8, %s3996_s10  ;;  %v3616_v8 = vld [vmem:[%s4041_s19 + $0x120] sm:$0xff] }
 0x211   : > { %v1570_v22 = vpop.permute.xlu1 %1569  ;;  %v1568_v17 = vpop.permute.xlu0 %1567 }
 0x212   : > { %1707 = vst.msk [vmem:[#allocation2 + $0x38] sm:$0xff] %vm1699_vm6, %v1570_v22  ;;  %1706 = vst.msk [vmem:[#allocation2 + $0x30] sm:$0xff] %vm1699_vm6, %v1568_v17 }
 0x213   : > { %2438 = vrot.lane.b32.xlu1 %v4901_v63, %s3996_s10  ;;  %1615 = vrot.lane.b32.xlu0 %v3709_v28, %s3993_s24  ;;  %v3617_v63 = vld [vmem:[%s4041_s19 + $0x128] sm:$0xff] }
 0x215   : > { %v1574_v62 = vpop.permute.xlu1 %1573  ;;  %v1572_v5 = vpop.permute.xlu0 %1571 }
 0x216   : > { %1709 = vst.msk [vmem:[#allocation2 + $0x48] sm:$0xff] %vm1699_vm6, %v1574_v62  ;;  %1708 = vst.msk [vmem:[#allocation2 + $0x40] sm:$0xff] %vm1699_vm6, %v1572_v5 }
 0x217   : > { %1617 = vrot.lane.b32.xlu1 %v3710_v48, %s3993_s24  ;;  %2486 = vrot.lane.b32.xlu0 %v3711_v54, %s3996_s10 }
 0x219   : > { %v1578_v56 = vpop.permute.xlu1 %1577  ;;  %v1576_v57 = vpop.permute.xlu0 %1575 }
 0x21a   : > { %1711 = vst.msk [vmem:[#allocation2 + $0x58] sm:$0xff] %vm1699_vm6, %v1578_v56  ;;  %1710 = vst.msk [vmem:[#allocation2 + $0x50] sm:$0xff] %vm1699_vm6, %v1576_v57 }
 0x21b   : > { %1906 = vrot.lane.b32.xlu1 %v3616_v8, %s3994_s25  ;;  %1858 = vrot.lane.b32.xlu0 %v3592_v52, %s3994_s25  ;;  %v3716_v8 = vld [vmem:[%s4041_s19 + $0x142] sm:$0xff] }
 0x21d   : > { %v1582_v12 = vpop.permute.xlu1 %1581  ;;  %v1580_v60 = vpop.permute.xlu0 %1579 }
 0x21e   : > { %1713 = vst.msk [vmem:[#allocation2 + $0x68] sm:$0xff] %vm1699_vm6, %v1582_v12  ;;  %1712 = vst.msk [vmem:[#allocation2 + $0x60] sm:$0xff] %vm1699_vm6, %v1580_v60  ;;  %v3598_v12 = vld [vmem:[%s4041_s19 + $0x90] sm:$0xff] }
 0x21f   : > { %1908 = vrot.lane.b32.xlu1 %v3617_v63, %s3994_s25  ;;  %1860 = vrot.lane.b32.xlu0 %v3593_v61, %s3994_s25 }
 0x221   : > { %v1586_v4 = vpop.permute.xlu1 %1585  ;;  %v1584_v9 = vpop.permute.xlu0 %1583 }
 0x222   : > { %1715 = vst.msk [vmem:[#allocation2 + $0x78] sm:$0xff] %vm1699_vm6, %v1586_v4  ;;  %1714 = vst.msk [vmem:[#allocation2 + $0x70] sm:$0xff] %vm1699_vm6, %v1584_v9 }
 0x223   : > { %2197 = vrot.lane.b32.xlu1 %v4790_v59, %s3995_s7  ;;  %2149 = vrot.lane.b32.xlu0 %v4688_v51, %s3995_s7 }
 0x225   : > { %v1590_v0 = vpop.permute.xlu1 %1589  ;;  %v1588_v35 = vpop.permute.xlu0 %1587 }
 0x226   : > { %1717 = vst.msk [vmem:[#allocation2 + $0x88] sm:$0xff] %vm1699_vm6, %v1590_v0  ;;  %1716 = vst.msk [vmem:[#allocation2 + $0x80] sm:$0xff] %vm1699_vm6, %v1588_v35  ;;  %v3623_v0 = vld [vmem:[%s4041_s19 + $0x158] sm:$0xff] }
 0x227   : > { %2199 = vrot.lane.b32.xlu1 %v4805_v6, %s3995_s7  ;;  %2151 = vrot.lane.b32.xlu0 %v4703_v18, %s3995_s7  ;;  %v3713_v18 = vld [vmem:[%s4041_s19 + $0x12a] sm:$0xff]  ;;  %v3599_v35 = vld [vmem:[%s4041_s19 + $0x98] sm:$0xff] }
 0x229   : > { %v1594_v45 = vpop.permute.xlu1 %1593  ;;  %v1592_v7 = vpop.permute.xlu0 %1591 }
 0x22a   : > { %1719 = vst.msk [vmem:[#allocation2 + $0x98] sm:$0xff] %vm1699_vm6, %v1594_v45  ;;  %1718 = vst.msk [vmem:[#allocation2 + $0x90] sm:$0xff] %vm1699_vm6, %v1592_v7 }
 0x22b   : > { %2488 = vrot.lane.b32.xlu1 %v3712_v50, %s3996_s10  ;;  %2440 = vrot.lane.b32.xlu0 %v4898_v29, %s3996_s10  ;;  %v3618_v29 = vld [vmem:[%s4041_s19 + $0x130] sm:$0xff] }
 0x22d   : > { %v1598_v51 = vpop.permute.xlu1 %1597  ;;  %v1596_v59 = vpop.permute.xlu0 %1595 }
 0x22e   : > { %1721 = vst.msk [vmem:[#allocation2 + $0xa8] sm:$0xff] %vm1699_vm6, %v1598_v51  ;;  %1720 = vst.msk [vmem:[#allocation2 + $0xa0] sm:$0xff] %vm1699_vm6, %v1596_v59  ;;  %v3670_v51 = vld [vmem:[%s4041_s19 + $0x151] sm:$0xff] }
 0x22f   : > { %2442 = vrot.lane.b32.xlu1 %v4913_v44, %s3996_s10  ;;  %1619 = vrot.lane.b32.xlu0 %v3711_v54, %s3993_s24  ;;  %v3619_v44 = vld [vmem:[%s4041_s19 + $0x138] sm:$0xff]  ;;  %v3645_v54 = vld [vmem:[%s4041_s19 + $0x89] sm:$0xff] }
 0x230   : > { %v3646_v59 = vld [vmem:[%s4041_s19 + $0x91] sm:$0xff] }
 0x231   : > { %v1602_v6 = vpop.permute.xlu1 %1601  ;;  %v1600_v55 = vpop.permute.xlu0 %1599 }
 0x232   : > { %1723 = vst.msk [vmem:[#allocation2 + $0xb8] sm:$0xff] %vm1699_vm6, %v1602_v6  ;;  %1722 = vst.msk [vmem:[#allocation2 + $0xb0] sm:$0xff] %vm1699_vm6, %v1600_v55 }
 0x233   : > { %1621 = vrot.lane.b32.xlu1 %v3712_v50, %s3993_s24  ;;  %2490 = vrot.lane.b32.xlu0 %v3713_v18, %s3996_s10 }
 0x235   : > { %v1606_v27 = vpop.permute.xlu1 %1605  ;;  %v1604_v26 = vpop.permute.xlu0 %1603 }
 0x236   : > { %1725 = vst.msk [vmem:[#allocation2 + $0xc8] sm:$0xff] %vm1699_vm6, %v1606_v27  ;;  %1724 = vst.msk [vmem:[#allocation2 + $0xc0] sm:$0xff] %vm1699_vm6, %v1604_v26 }
 0x237   : > { %1910 = vrot.lane.b32.xlu1 %v3618_v29, %s3994_s25  ;;  %1862 = vrot.lane.b32.xlu0 %v3594_v16, %s3994_s25  ;;  %v3671_v29 = vld [vmem:[%s4041_s19 + $0x159] sm:$0xff] }
 0x238   : > { %v3647_v16 = vld [vmem:[%s4041_s19 + $0x99] sm:$0xff] }
 0x239   : > { %v1847_v32 = vpop.permute.xlu1 %1846  ;;  %v1608_v10 = vpop.permute.xlu0 %1607 }
 0x23a   : > { %1991 = vst.msk [vmem:[#allocation2] sm:$0xff] %vm1990_vm7, %v1847_v32 }
 0x23b   : > { %1726 = vst.msk [vmem:[#allocation2 + $0xd0] sm:$0xff] %vm1699_vm6, %v1608_v10  ;;  %1912 = vrot.lane.b32.xlu1 %v3619_v44, %s3994_s25  ;;  %1864 = vrot.lane.b32.xlu0 %v3595_v33, %s3994_s25  ;;  %v3718_v44 = vld [vmem:[%s4041_s19 + $0x152] sm:$0xff] }
 0x23d   : > { %v1849_v13 = vpop.permute.xlu1 %1848  ;;  %v1895_v28 = vpop.permute.xlu0 %1894 }
 0x23e   : > { %1992 = vst.msk [vmem:[#allocation2 + $0x8] sm:$0xff] %vm1990_vm7, %v1849_v13  ;;  %2015 = vst.msk [vmem:[#allocation2 + $0xc0] sm:$0xff] %vm1990_vm7, %v1895_v28  ;;  %v3719_v28 = vld [vmem:[%s4041_s19 + $0x15a] sm:$0xff] }
 0x23f   : > { %2201 = vrot.lane.b32.xlu1 %v4802_v3, %s3995_s7  ;;  %2153 = vrot.lane.b32.xlu0 %v4700_v19, %s3995_s7 }
 0x241   : > { %v2138_v58 = vpop.permute.xlu1 %2137  ;;  %v1897_v36 = vpop.permute.xlu0 %1896 }
 0x242   : > { %2282 = vst.msk [vmem:[#allocation2] sm:$0xff] %vm2281_vm8, %v2138_v58 }
 0x243   : > { %2016 = vst.msk [vmem:[#allocation2 + $0xc8] sm:$0xff] %vm1990_vm7, %v1897_v36  ;;  %2203 = vrot.lane.b32.xlu1 %v4817_v37, %s3995_s7  ;;  %2155 = vrot.lane.b32.xlu0 %v4713_v24, %s3995_s7  ;;  %v3715_v24 = vld [vmem:[%s4041_s19 + $0x13a] sm:$0xff] }
 0x245   : > { %v2140_v39 = vpop.permute.xlu1 %2139  ;;  %v2186_v3 = vpop.permute.xlu0 %2185 }
 0x246   : > { %2283 = vst.msk [vmem:[#allocation2 + $0x8] sm:$0xff] %vm2281_vm8, %v2140_v39  ;;  %2306 = vst.msk [vmem:[#allocation2 + $0xc0] sm:$0xff] %vm2281_vm8, %v2186_v3 }
 0x247   : > { %2492 = vrot.lane.b32.xlu1 %v3714_v1, %s3996_s10  ;;  %2444 = vrot.lane.b32.xlu0 %v4910_v14, %s3996_s10  ;;  %v3620_v14 = vld [vmem:[%s4041_s19 + $0x140] sm:$0xff] }
 0x249   : > { %v2429_v19 = vpop.permute.xlu1 %2428  ;;  %v2188_v37 = vpop.permute.xlu0 %2187 }
 0x24a   : > { %2573 = vst.msk [vmem:[#allocation2] sm:$0xff] %vm2572_vm9, %v2429_v19 }
 0x24b   : > { %2307 = vst.msk [vmem:[#allocation2 + $0xc8] sm:$0xff] %vm2281_vm8, %v2188_v37  ;;  %2446 = vrot.lane.b32.xlu1 %v4925_v25, %s3996_s10  ;;  %1623 = vrot.lane.b32.xlu0 %v3713_v18, %s3993_s24  ;;  %v3625_v37 = vld [vmem:[%s4041_s19 + $0x168] sm:$0xff] }
 0x24d   : > { %v2431_v38 = vpop.permute.xlu1 %2430  ;;  %v2477_v41 = vpop.permute.xlu0 %2476 }
 0x24e   : > { %2574 = vst.msk [vmem:[#allocation2 + $0x8] sm:$0xff] %vm2572_vm9, %v2431_v38  ;;  %2597 = vst.msk [vmem:[#allocation2 + $0xc0] sm:$0xff] %vm2572_vm9, %v2477_v41 }
 0x24f   : > { %1625 = vrot.lane.b32.xlu1 %v3714_v1, %s3993_s24  ;;  %2494 = vrot.lane.b32.xlu0 %v3715_v24, %s3996_s10  ;;  %v3600_v1 = vld [vmem:[%s4041_s19 + $0xa0] sm:$0xff] }
 0x251   : > { %v1610_v40 = vpop.permute.xlu1 %1609  ;;  %v2479_v25 = vpop.permute.xlu0 %2478  ;;  %v2621_v43 = vld [vmem:[#allocation2] sm:$0xff] }
 0x252   : > { %1727 = vst.msk [vmem:[#allocation2 + $0xd8] sm:$0xff] %vm1699_vm6, %v1610_v40  ;;  %3845 = vmatprep.mubr.msk.f32.mxu0 %vm2681_vm10, %v2621_v43  ;;  %v3648_v40 = vld [vmem:[%s4041_s19 + $0xa1] sm:$0xff] }
 0x253   : > { %2598 = vst.msk [vmem:[#allocation2 + $0xc8] sm:$0xff] %vm2572_vm9, %v2479_v25  ;;  %1914 = vrot.lane.b32.xlu1 %v3620_v14, %s3994_s25  ;;  %1866 = vrot.lane.b32.xlu0 %v3596_v21, %s3994_s25  ;;  %v3672_v21 = vld [vmem:[%s4041_s19 + $0x161] sm:$0xff] }
 0x255   : > { %v1899_v46 = vpop.permute.xlu1 %1898  ;;  %v1851_v49 = vpop.permute.xlu0 %1850  ;;  %v2622_v2 = vld [vmem:[#allocation2 + $0x8] sm:$0xff]  ;;  %v2645_v48 = vld [vmem:[#allocation2 + $0xc0] sm:$0xff] }
 0x256   : > { %2017 = vst.msk [vmem:[#allocation2 + $0xd0] sm:$0xff] %vm1990_vm7, %v1899_v46  ;;  %1993 = vst.msk [vmem:[#allocation2 + $0x10] sm:$0xff] %vm1990_vm7, %v1851_v49  ;;  %3846 = vmatmul.mubr.msk.f32.vlgmr.msra.gmra.mrb[0].mxu0 %vm2681_vm10, %v2622_v2  ;;  %3881 = vmatprep.mubr.msk.f32.mxu1 %vm2681_vm10, %v2645_v48  ;;  %v3649_v46 = vld [vmem:[%s4041_s19 + $0xa9] sm:$0xff] }
 0x257   : > { %1916 = vrot.lane.b32.xlu1 %v3621_v42, %s3994_s25  ;;  %1868 = vrot.lane.b32.xlu0 %v3597_v47, %s3994_s25  ;;  %v3673_v47 = vld [vmem:[%s4041_s19 + $0x169] sm:$0xff] }
 0x258   : > { %v3720_v48 = vld [vmem:[%s4041_s19 + $0x162] sm:$0xff] }
 0x259   : > { %v1901_v11 = vpop.permute.xlu1 %1900  ;;  %v1853_v22 = vpop.permute.xlu0 %1852 }
 0x25a   : > { %v2646_v17 = vld [vmem:[#allocation2 + $0xc8] sm:$0xff]  ;;  %2018 = vst.msk [vmem:[#allocation2 + $0xd8] sm:$0xff] %vm1990_vm7, %v1901_v11  ;;  %1994 = vst.msk [vmem:[#allocation2 + $0x18] sm:$0xff] %vm1990_vm7, %v1853_v22 }
 0x25b   : > { %3882 = vmatmul.mubr.msk.f32.vlgmr.msra.gmra.mrb[0].mxu1 %vm2681_vm10, %v2646_v17  ;;  %2205 = vrot.lane.b32.xlu1 %v4814_v15, %s3995_s7  ;;  %v3697_v17 = vld [vmem:[%s4041_s19 + $0xaa] sm:$0xff] }
 0x25c   : > { %2157 = vrot.lane.b32.xlu0 %v3644_v53, %s3995_s7  ;;  %v3696_v53 = vld [vmem:[%s4041_s19 + $0xa2] sm:$0xff] }
 0x25d   : > { %v2190_v62 = vpop.permute.xlu1 %2189  ;;  %v2142_v5 = vpop.permute.xlu0 %2141 }
 0x25e   : > { %2308 = vst.msk [vmem:[#allocation2 + $0xd0] sm:$0xff] %vm2281_vm8, %v2190_v62  ;;  %2284 = vst.msk [vmem:[#allocation2 + $0x10] sm:$0xff] %vm2281_vm8, %v2142_v5  ;;  %v3721_v5 = vld [vmem:[%s4041_s19 + $0x16a] sm:$0xff] }
 0x25f   : > { %2207 = vrot.lane.b32.xlu1 %v4827_v23, %s3995_s7  ;;  %v3717_v23 = vld [vmem:[%s4041_s19 + $0x14a] sm:$0xff] }
 0x260   : > { %2159 = vrot.lane.b32.xlu0 %v3645_v54, %s3995_s7 }
 0x261   : > { %v2192_v52 = vpop.permute.xlu1 %2191  ;;  %v2144_v56 = vpop.permute.xlu0 %2143 }
 0x262   : > { %2309 = vst.msk [vmem:[#allocation2 + $0xd8] sm:$0xff] %vm2281_vm8, %v2192_v52  ;;  %2285 = vst.msk [vmem:[#allocation2 + $0x18] sm:$0xff] %vm2281_vm8, %v2144_v56  ;;  %v3626_v56 = vld [vmem:[%s4041_s19 + $0x170] sm:$0xff] }
 0x263   : > { %2496 = vrot.lane.b32.xlu1 %v3716_v8, %s3996_s10 }
 0x264   : > { %2448 = vrot.lane.b32.xlu0 %v4922_v20, %s3996_s10  ;;  %v3622_v20 = vld [vmem:[%s4041_s19 + $0x150] sm:$0xff] }
 0x265   : > { %v2481_v15 = vpop.permute.xlu1 %2480  ;;  %v2433_v57 = vpop.permute.xlu0 %2432 }
 0x266   : > { %2599 = vst.msk [vmem:[#allocation2 + $0xd0] sm:$0xff] %vm2572_vm9, %v2481_v15  ;;  %2575 = vst.msk [vmem:[#allocation2 + $0x10] sm:$0xff] %vm2572_vm9, %v2433_v57  ;;  %v3602_v15 = vld [vmem:[%s4041_s19 + $0xb0] sm:$0xff] }
 0x267   : > { %2450 = vrot.lane.b32.xlu1 %v4937_v30, %s3996_s10 }
 0x268   : > { %1627 = vrot.lane.b32.xlu0 %v3715_v24, %s3993_s24  ;;  %v3601_v24 = vld [vmem:[%s4041_s19 + $0xa8] sm:$0xff] }
 0x269   : > { %v2435_v63 = vpop.permute.xlu1 %2434  ;;  %v1612_v61 = vpop.permute.xlu0 %1611 }
 0x26a   : > { %2576 = vst.msk [vmem:[#allocation2 + $0x18] sm:$0xff] %vm2572_vm9, %v2435_v63 }
 0x26b   : > { %1728 = vst.msk [vmem:[#allocation2 + $0xe0] sm:$0xff] %vm1699_vm6, %v1612_v61  ;;  %1629 = vrot.lane.b32.xlu1 %v3716_v8, %s3993_s24 }
 0x26c   : > { %2498 = vrot.lane.b32.xlu0 %v3717_v23, %s3996_s10 }
 0x26d   : > { %v1614_v60 = vpop.permute.xlu1 %1613  ;;  %v2483_v4 = vpop.permute.xlu0 %2482  ;;  %v2623_v30 = vld [vmem:[#allocation2 + $0x10] sm:$0xff] }
 0x26e   : > { %v2647_v9 = vld [vmem:[#allocation2 + $0xd0] sm:$0xff]  ;;  %1729 = vst.msk [vmem:[#allocation2 + $0xe8] sm:$0xff] %vm1699_vm6, %v1614_v60  ;;  %3848 = vmatprep.mubr.msk.f32.mxu0 %vm2681_vm10, %v2623_v30 }
 0x26f   : > { %2600 = vst.msk [vmem:[#allocation2 + $0xd8] sm:$0xff] %vm2572_vm9, %v2483_v4  ;;  %3884 = vmatprep.mubr.msk.f32.mxu1 %vm2681_vm10, %v2647_v9  ;;  %1918 = vrot.lane.b32.xlu1 %v3622_v20, %s3994_s25  ;;  %v3627_v20 = vld [vmem:[%s4041_s19 + $0x178] sm:$0xff] }
 0x270   : > { %1870 = vrot.lane.b32.xlu0 %v3598_v12, %s3994_s25  ;;  %v3603_v12 = vld [vmem:[%s4041_s19 + $0xb8] sm:$0xff] }
 0x271   : > { %v1903_v50 = vpop.permute.xlu1 %1902  ;;  %v1855_v45 = vpop.permute.xlu0 %1854  ;;  %v2624_v7 = vld [vmem:[#allocation2 + $0x18] sm:$0xff] }
 0x272   : > { %2019 = vst.msk [vmem:[#allocation2 + $0xe0] sm:$0xff] %vm1990_vm7, %v1903_v50  ;;  %1995 = vst.msk [vmem:[#allocation2 + $0x20] sm:$0xff] %vm1990_vm7, %v1855_v45  ;;  %3849 = vmatmul.mubr.msk.f32.gmra.mrb[2].mxu0 %vm2681_vm10, %v2624_v7  ;;  %v3674_v9 = vld [vmem:[%s4041_s19 + $0x171] sm:$0xff]  ;;  %v3675_v7 = vld [vmem:[%s4041_s19 + $0x179] sm:$0xff] }
 0x273   : > { %1920 = vrot.lane.b32.xlu1 %v3623_v0, %s3994_s25  ;;  %v3650_v0 = vld [vmem:[%s4041_s19 + $0xb1] sm:$0xff] }
 0x274   : > { %1872 = vrot.lane.b32.xlu0 %v3599_v35, %s3994_s25 }
 0x275   : > { %v1905_v18 = vpop.permute.xlu1 %1904  ;;  %v1857_v6 = vpop.permute.xlu0 %1856 }
 0x276   : > { %v2648_v55 = vld [vmem:[#allocation2 + $0xd8] sm:$0xff]  ;;  %2020 = vst.msk [vmem:[#allocation2 + $0xe8] sm:$0xff] %vm1990_vm7, %v1905_v18  ;;  %1996 = vst.msk [vmem:[#allocation2 + $0x28] sm:$0xff] %vm1990_vm7, %v1857_v6 }
 0x277   : > { %3885 = vmatmul.mubr.msk.f32.gmra.mrb[2].mxu1 %vm2681_vm10, %v2648_v55  ;;  %2209 = vrot.lane.b32.xlu1 %v3670_v51, %s3995_s7  ;;  %v3651_v51 = vld [vmem:[%s4041_s19 + $0xb9] sm:$0xff] }
 0x278   : > { %2161 = vrot.lane.b32.xlu0 %v3646_v59, %s3995_s7  ;;  %v3722_v6 = vld [vmem:[%s4041_s19 + $0x172] sm:$0xff] }
 0x279   : > { %v2194_v27 = vpop.permute.xlu1 %2193  ;;  %v2146_v26 = vpop.permute.xlu0 %2145  ;;  %v3698_v55 = vld [vmem:[%s4041_s19 + $0xb2] sm:$0xff] }
 0x27a   : > { %2310 = vst.msk [vmem:[#allocation2 + $0xe0] sm:$0xff] %vm2281_vm8, %v2194_v27  ;;  %2286 = vst.msk [vmem:[#allocation2 + $0x20] sm:$0xff] %vm2281_vm8, %v2146_v26  ;;  %v3699_v27 = vld [vmem:[%s4041_s19 + $0xba] sm:$0xff] }
 0x27b   : > { %2211 = vrot.lane.b32.xlu1 %v3671_v29, %s3995_s7 }
 0x27c   : > { %2163 = vrot.lane.b32.xlu0 %v3647_v16, %s3995_s7 }
 0x27d   : > { %v2196_v33 = vpop.permute.xlu1 %2195  ;;  %v2148_v32 = vpop.permute.xlu0 %2147 }
 0x27e   : > { %2311 = vst.msk [vmem:[#allocation2 + $0xe8] sm:$0xff] %vm2281_vm8, %v2196_v33  ;;  %2287 = vst.msk [vmem:[#allocation2 + $0x28] sm:$0xff] %vm2281_vm8, %v2148_v32  ;;  %v3723_v33 = vld [vmem:[%s4041_s19 + $0x17a] sm:$0xff] }
 0x27f   : > { %2500 = vrot.lane.b32.xlu1 %v3718_v44, %s3996_s10 }
 0x280   : > { %2452 = vrot.lane.b32.xlu0 %v4934_v31, %s3996_s10  ;;  %v3624_v31 = vld [vmem:[%s4041_s19 + $0x160] sm:$0xff] }
 0x281   : > { %v2485_v10 = vpop.permute.xlu1 %2484  ;;  %v2437_v13 = vpop.permute.xlu0 %2436 }
 0x282   : > { %2601 = vst.msk [vmem:[#allocation2 + $0xe0] sm:$0xff] %vm2572_vm9, %v2485_v10  ;;  %2577 = vst.msk [vmem:[#allocation2 + $0x20] sm:$0xff] %vm2572_vm9, %v2437_v13  ;;  %v3628_v13 = vld [vmem:[%s4041_s19 + $0x180] sm:$0xff] }
 0x283   : > { %2454 = vrot.lane.b32.xlu1 %v4947_v34, %s3996_s10 }
 0x284   : > { %1631 = vrot.lane.b32.xlu0 %v3717_v23, %s3993_s24 }
 0x285   : > { %v2439_v58 = vpop.permute.xlu1 %2438  ;;  %v1616_v36 = vpop.permute.xlu0 %1615 }
 0x286   : > { %2578 = vst.msk [vmem:[#allocation2 + $0x28] sm:$0xff] %vm2572_vm9, %v2439_v58 }
 0x287   : > { %1730 = vst.msk [vmem:[#allocation2 + $0xf0] sm:$0xff] %vm1699_vm6, %v1616_v36  ;;  %1633 = vrot.lane.b32.xlu1 %v3718_v44, %s3993_s24 }
 0x288   : > { %2502 = vrot.lane.b32.xlu0 %v3719_v28, %s3996_s10 }
 0x289   : > { %v1618_v39 = vpop.permute.xlu1 %1617  ;;  %v2487_v3 = vpop.permute.xlu0 %2486  ;;  %v2625_v34 = vld [vmem:[#allocation2 + $0x20] sm:$0xff] }
 0x28a   : > { %v2649_v19 = vld [vmem:[#allocation2 + $0xe0] sm:$0xff]  ;;  %1731 = vst.msk [vmem:[#allocation2 + $0xf8] sm:$0xff] %vm1699_vm6, %v1618_v39  ;;  %3851 = vmatprep.mubr.msk.f32.mxu0 %vm2681_vm10, %v2625_v34  ;;  %v3629_v39 = vld [vmem:[%s4041_s19 + $0x188] sm:$0xff] }
 0x28b   : > { %2602 = vst.msk [vmem:[#allocation2 + $0xe8] sm:$0xff] %vm2572_vm9, %v2487_v3  ;;  %3887 = vmatprep.mubr.msk.f32.mxu1 %vm2681_vm10, %v2649_v19  ;;  %1922 = vrot.lane.b32.xlu1 %v3624_v31, %s3994_s25  ;;  %v3605_v3 = vld [vmem:[%s4041_s19 + $0xc8] sm:$0xff] }
 0x28c   : > { %1874 = vrot.lane.b32.xlu0 %v3600_v1, %s3994_s25 }
 0x28d   : > { %v1907_v38 = vpop.permute.xlu1 %1906  ;;  %v1859_v41 = vpop.permute.xlu0 %1858  ;;  %v2626_v14 = vld [vmem:[#allocation2 + $0x28] sm:$0xff] }
 0x28e   : > { %2021 = vst.msk [vmem:[#allocation2 + $0xf0] sm:$0xff] %vm1990_vm7, %v1907_v38  ;;  %1997 = vst.msk [vmem:[#allocation2 + $0x30] sm:$0xff] %vm1990_vm7, %v1859_v41  ;;  %3852 = vmatmul.mubr.msk.f32.gmra.mrb[4].mxu0 %vm2681_vm10, %v2626_v14  ;;  %v3652_v38 = vld [vmem:[%s4041_s19 + $0xc1] sm:$0xff] }
 0x28f   : > { %1924 = vrot.lane.b32.xlu1 %v3625_v37, %s3994_s25 }
 0x290   : > { %1876 = vrot.lane.b32.xlu0 %v3601_v24, %s3994_s25  ;;  %v3676_v24 = vld [vmem:[%s4041_s19 + $0x181] sm:$0xff] }
 0x291   : > { %v1909_v25 = vpop.permute.xlu1 %1908  ;;  %v1861_v43 = vpop.permute.xlu0 %1860 }
 0x292   : > { %v2650_v42 = vld [vmem:[#allocation2 + $0xe8] sm:$0xff]  ;;  %2022 = vst.msk [vmem:[#allocation2 + $0xf8] sm:$0xff] %vm1990_vm7, %v1909_v25  ;;  %1998 = vst.msk [vmem:[#allocation2 + $0x38] sm:$0xff] %vm1990_vm7, %v1861_v43 }
 0x293   : > { %3888 = vmatmul.mubr.msk.f32.gmra.mrb[4].mxu1 %vm2681_vm10, %v2650_v42  ;;  %2213 = vrot.lane.b32.xlu1 %v3672_v21, %s3995_s7  ;;  %v3653_v25 = vld [vmem:[%s4041_s19 + $0xc9] sm:$0xff] }
 0x294   : > { %2165 = vrot.lane.b32.xlu0 %v3648_v40, %s3995_s7  ;;  %v3677_v40 = vld [vmem:[%s4041_s19 + $0x189] sm:$0xff] }
 0x295   : > { %v2198_v49 = vpop.permute.xlu1 %2197  ;;  %v2150_v2 = vpop.permute.xlu0 %2149 }
 0x296   : > { %2312 = vst.msk [vmem:[#allocation2 + $0xf0] sm:$0xff] %vm2281_vm8, %v2198_v49  ;;  %2288 = vst.msk [vmem:[#allocation2 + $0x30] sm:$0xff] %vm2281_vm8, %v2150_v2 }
 0x297   : > { %2215 = vrot.lane.b32.xlu1 %v3673_v47, %s3995_s7  ;;  %v3724_v47 = vld [vmem:[%s4041_s19 + $0x182] sm:$0xff] }
 0x298   : > { %2167 = vrot.lane.b32.xlu0 %v3649_v46, %s3995_s7  ;;  %v3700_v46 = vld [vmem:[%s4041_s19 + $0xc2] sm:$0xff] }
 0x299   : > { %v2200_v11 = vpop.permute.xlu1 %2199  ;;  %v2152_v22 = vpop.permute.xlu0 %2151 }
 0x29a   : > { %2313 = vst.msk [vmem:[#allocation2 + $0xf8] sm:$0xff] %vm2281_vm8, %v2200_v11  ;;  %2289 = vst.msk [vmem:[#allocation2 + $0x38] sm:$0xff] %vm2281_vm8, %v2152_v22  ;;  %v3725_v22 = vld [vmem:[%s4041_s19 + $0x18a] sm:$0xff] }
 0x29b   : > { %2504 = vrot.lane.b32.xlu1 %v3720_v48, %s3996_s10 }
 0x29c   : > { %2456 = vrot.lane.b32.xlu0 %v3696_v53, %s3996_s10 }
 0x29d   : > { %v2489_v54 = vpop.permute.xlu1 %2488  ;;  %v2441_v62 = vpop.permute.xlu0 %2440 }
 0x29e   : > { %2603 = vst.msk [vmem:[#allocation2 + $0xf0] sm:$0xff] %vm2572_vm9, %v2489_v54  ;;  %2579 = vst.msk [vmem:[#allocation2 + $0x30] sm:$0xff] %vm2572_vm9, %v2441_v62  ;;  %v3630_v62 = vld [vmem:[%s4041_s19 + $0x190] sm:$0xff] }
 0x29f   : > { %2458 = vrot.lane.b32.xlu1 %v3697_v17, %s3996_s10 }
 0x2a0   : > { %1635 = vrot.lane.b32.xlu0 %v3719_v28, %s3993_s24  ;;  %v3604_v28 = vld [vmem:[%s4041_s19 + $0xc0] sm:$0xff] }
 0x2a1   : > { %v2443_v8 = vpop.permute.xlu1 %2442  ;;  %v1620_v52 = vpop.permute.xlu0 %1619 }
 0x2a2   : > { %2580 = vst.msk [vmem:[#allocation2 + $0x38] sm:$0xff] %vm2572_vm9, %v2443_v8 }
 0x2a3   : > { %1732 = vst.msk [vmem:[#allocation2 + $0x100] sm:$0xff] %vm1699_vm6, %v1620_v52  ;;  %1637 = vrot.lane.b32.xlu1 %v3720_v48, %s3993_s24  ;;  %v3701_v48 = vld [vmem:[%s4041_s19 + $0xca] sm:$0xff] }
 0x2a4   : > { %2506 = vrot.lane.b32.xlu0 %v3721_v5, %s3996_s10 }
 0x2a5   : > { %v1622_v57 = vpop.permute.xlu1 %1621  ;;  %v2491_v23 = vpop.permute.xlu0 %2490  ;;  %v2627_v63 = vld [vmem:[#allocation2 + $0x30] sm:$0xff] }
 0x2a6   : > { %v2651_v61 = vld [vmem:[#allocation2 + $0xf0] sm:$0xff]  ;;  %1733 = vst.msk [vmem:[#allocation2 + $0x108] sm:$0xff] %vm1699_vm6, %v1622_v57  ;;  %3854 = vmatprep.mubr.msk.f32.mxu0 %vm2681_vm10, %v2627_v63  ;;  %v3631_v57 = vld [vmem:[%s4041_s19 + $0x198] sm:$0xff] }
 0x2a7   : > { %2604 = vst.msk [vmem:[#allocation2 + $0xf8] sm:$0xff] %vm2572_vm9, %v2491_v23  ;;  %3890 = vmatprep.mubr.msk.f32.mxu1 %vm2681_vm10, %v2651_v61  ;;  %1926 = vrot.lane.b32.xlu1 %v3626_v56, %s3994_s25  ;;  %v3607_v23 = vld [vmem:[%s4041_s19 + $0xd8] sm:$0xff] }
 0x2a8   : > { %1878 = vrot.lane.b32.xlu0 %v3602_v15, %s3994_s25 }
 0x2a9   : > { %v1911_v60 = vpop.permute.xlu1 %1910  ;;  %v1863_v4 = vpop.permute.xlu0 %1862  ;;  %v2628_v30 = vld [vmem:[#allocation2 + $0x38] sm:$0xff] }
 0x2aa   : > { %2023 = vst.msk [vmem:[#allocation2 + $0x100] sm:$0xff] %vm1990_vm7, %v1911_v60  ;;  %1999 = vst.msk [vmem:[#allocation2 + $0x40] sm:$0xff] %vm1990_vm7, %v1863_v4  ;;  %3855 = vmatmul.mubr.msk.f32.gmra.mrb[6].mxu0 %vm2681_vm10, %v2628_v30  ;;  %v3654_v60 = vld [vmem:[%s4041_s19 + $0xd1] sm:$0xff] }
 0x2ab   : > { %1928 = vrot.lane.b32.xlu1 %v3627_v20, %s3994_s25 }
 0x2ac   : > { %1880 = vrot.lane.b32.xlu0 %v3603_v12, %s3994_s25  ;;  %v3678_v12 = vld [vmem:[%s4041_s19 + $0x191] sm:$0xff] }
 0x2ad   : > { %v1913_v35 = vpop.permute.xlu1 %1912  ;;  %v1865_v50 = vpop.permute.xlu0 %1864 }
 0x2ae   : > { %v2652_v45 = vld [vmem:[#allocation2 + $0xf8] sm:$0xff]  ;;  %2024 = vst.msk [vmem:[#allocation2 + $0x108] sm:$0xff] %vm1990_vm7, %v1913_v35  ;;  %2000 = vst.msk [vmem:[#allocation2 + $0x48] sm:$0xff] %vm1990_vm7, %v1865_v50 }
 0x2af   : > { %3891 = vmatmul.mubr.msk.f32.gmra.mrb[6].mxu1 %vm2681_vm10, %v2652_v45  ;;  %2217 = vrot.lane.b32.xlu1 %v3674_v9, %s3995_s7  ;;  %v3655_v35 = vld [vmem:[%s4041_s19 + $0xd9] sm:$0xff] }
 0x2b0   : > { %2169 = vrot.lane.b32.xlu0 %v3650_v0, %s3995_s7  ;;  %v3679_v0 = vld [vmem:[%s4041_s19 + $0x199] sm:$0xff] }
 0x2b1   : > { %v2202_v59 = vpop.permute.xlu1 %2201  ;;  %v2154_v18 = vpop.permute.xlu0 %2153 }
 0x2b2   : > { %2314 = vst.msk [vmem:[#allocation2 + $0x100] sm:$0xff] %vm2281_vm8, %v2202_v59  ;;  %2290 = vst.msk [vmem:[#allocation2 + $0x40] sm:$0xff] %vm2281_vm8, %v2154_v18 }
 0x2b3   : > { %2219 = vrot.lane.b32.xlu1 %v3675_v7, %s3995_s7  ;;  %v3726_v7 = vld [vmem:[%s4041_s19 + $0x192] sm:$0xff] }
 0x2b4   : > { %2171 = vrot.lane.b32.xlu0 %v3651_v51, %s3995_s7  ;;  %v3702_v51 = vld [vmem:[%s4041_s19 + $0xd2] sm:$0xff] }
 0x2b5   : > { %v2204_v29 = vpop.permute.xlu1 %2203  ;;  %v2156_v16 = vpop.permute.xlu0 %2155 }
 0x2b6   : > { %2315 = vst.msk [vmem:[#allocation2 + $0x108] sm:$0xff] %vm2281_vm8, %v2204_v29  ;;  %2291 = vst.msk [vmem:[#allocation2 + $0x48] sm:$0xff] %vm2281_vm8, %v2156_v16  ;;  %v3727_v16 = vld [vmem:[%s4041_s19 + $0x19a] sm:$0xff] }
 0x2b7   : > { %2508 = vrot.lane.b32.xlu1 %v3722_v6, %s3996_s10 }
 0x2b8   : > { %2460 = vrot.lane.b32.xlu0 %v3698_v55, %s3996_s10 }
 0x2b9   : > { %v2493_v26 = vpop.permute.xlu1 %2492  ;;  %v2445_v44 = vpop.permute.xlu0 %2444 }
 0x2ba   : > { %2605 = vst.msk [vmem:[#allocation2 + $0x100] sm:$0xff] %vm2572_vm9, %v2493_v26  ;;  %2581 = vst.msk [vmem:[#allocation2 + $0x40] sm:$0xff] %vm2572_vm9, %v2445_v44  ;;  %v3632_v44 = vld [vmem:[%s4041_s19 + $0x1a0] sm:$0xff] }
 0x2bb   : > { %2462 = vrot.lane.b32.xlu1 %v3699_v27, %s3996_s10 }
 0x2bc   : > { %1639 = vrot.lane.b32.xlu0 %v3721_v5, %s3993_s24  ;;  %v3606_v5 = vld [vmem:[%s4041_s19 + $0xd0] sm:$0xff] }
 0x2bd   : > { %v2447_v32 = vpop.permute.xlu1 %2446  ;;  %v1624_v10 = vpop.permute.xlu0 %1623 }
 0x2be   : > { %2582 = vst.msk [vmem:[#allocation2 + $0x48] sm:$0xff] %vm2572_vm9, %v2447_v32 }
 0x2bf   : > { %1734 = vst.msk [vmem:[#allocation2 + $0x110] sm:$0xff] %vm1699_vm6, %v1624_v10  ;;  %1641 = vrot.lane.b32.xlu1 %v3722_v6, %s3993_s24  ;;  %v3703_v6 = vld [vmem:[%s4041_s19 + $0xda] sm:$0xff] }
 0x2c0   : > { %2510 = vrot.lane.b32.xlu0 %v3723_v33, %s3996_s10 }
 0x2c1   : > { %v1626_v58 = vpop.permute.xlu1 %1625  ;;  %v2495_v36 = vpop.permute.xlu0 %2494  ;;  %v2629_v31 = vld [vmem:[#allocation2 + $0x40] sm:$0xff] }
 0x2c2   : > { %v2653_v1 = vld [vmem:[#allocation2 + $0x100] sm:$0xff]  ;;  %1735 = vst.msk [vmem:[#allocation2 + $0x118] sm:$0xff] %vm1699_vm6, %v1626_v58  ;;  %3857 = vmatprep.mubr.msk.f32.mxu0 %vm2681_vm10, %v2629_v31  ;;  %v3633_v58 = vld [vmem:[%s4041_s19 + $0x1a8] sm:$0xff] }
 0x2c3   : > { %2606 = vst.msk [vmem:[#allocation2 + $0x108] sm:$0xff] %vm2572_vm9, %v2495_v36  ;;  %3893 = vmatprep.mubr.msk.f32.mxu1 %vm2681_vm10, %v2653_v1  ;;  %1930 = vrot.lane.b32.xlu1 %v3628_v13, %s3994_s25  ;;  %v3609_v36 = vld [vmem:[%s4041_s19 + $0xe8] sm:$0xff] }
 0x2c4   : > { %1882 = vrot.lane.b32.xlu0 %v3604_v28, %s3994_s25 }
 0x2c5   : > { %v1915_v34 = vpop.permute.xlu1 %1914  ;;  %v1867_v19 = vpop.permute.xlu0 %1866  ;;  %v2630_v37 = vld [vmem:[#allocation2 + $0x48] sm:$0xff] }
 0x2c6   : > { %2025 = vst.msk [vmem:[#allocation2 + $0x110] sm:$0xff] %vm1990_vm7, %v1915_v34  ;;  %2001 = vst.msk [vmem:[#allocation2 + $0x50] sm:$0xff] %vm1990_vm7, %v1867_v19  ;;  %3858 = vmatmul.mubr.msk.f32.gmra.mrb[8].mxu0 %vm2681_vm10, %v2630_v37  ;;  %v3656_v34 = vld [vmem:[%s4041_s19 + $0xe1] sm:$0xff] }
 0x2c7   : > { %1932 = vrot.lane.b32.xlu1 %v3629_v39, %s3994_s25 }
 0x2c8   : > { %1884 = vrot.lane.b32.xlu0 %v3605_v3, %s3994_s25  ;;  %v3680_v3 = vld [vmem:[%s4041_s19 + $0x1a1] sm:$0xff] }
 0x2c9   : > { %v1917_v41 = vpop.permute.xlu1 %1916  ;;  %v1869_v14 = vpop.permute.xlu0 %1868 }
 0x2ca   : > { %v2654_v21 = vld [vmem:[#allocation2 + $0x108] sm:$0xff]  ;;  %2026 = vst.msk [vmem:[#allocation2 + $0x118] sm:$0xff] %vm1990_vm7, %v1917_v41  ;;  %2002 = vst.msk [vmem:[#allocation2 + $0x58] sm:$0xff] %vm1990_vm7, %v1869_v14 }
 0x2cb   : > { %3894 = vmatmul.mubr.msk.f32.gmra.mrb[8].mxu1 %vm2681_vm10, %v2654_v21  ;;  %2221 = vrot.lane.b32.xlu1 %v3676_v24, %s3995_s7  ;;  %v3657_v41 = vld [vmem:[%s4041_s19 + $0xe9] sm:$0xff] }
 0x2cc   : > { %2173 = vrot.lane.b32.xlu0 %v3652_v38, %s3995_s7  ;;  %v3681_v38 = vld [vmem:[%s4041_s19 + $0x1a9] sm:$0xff] }
 0x2cd   : > { %v2206_v43 = vpop.permute.xlu1 %2205 }
 0x2ce   : > { %v2158_v42 = vpop.permute.xlu0 %2157  ;;  %2316 = vst.msk [vmem:[#allocation2 + $0x110] sm:$0xff] %vm2281_vm8, %v2206_v43 }
 0x2cf   : > { %2292 = vst.msk [vmem:[#allocation2 + $0x50] sm:$0xff] %vm2281_vm8, %v2158_v42  ;;  %2223 = vrot.lane.b32.xlu1 %v3677_v40, %s3995_s7  ;;  %v3728_v40 = vld [vmem:[%s4041_s19 + $0x1a2] sm:$0xff] }
 0x2d0   : > { %2175 = vrot.lane.b32.xlu0 %v3653_v25, %s3995_s7  ;;  %v3704_v25 = vld [vmem:[%s4041_s19 + $0xe2] sm:$0xff] }
 0x2d1   : > { %v2208_v49 = vpop.permute.xlu1 %2207 }
 0x2d2   : > { %v2160_v2 = vpop.permute.xlu0 %2159  ;;  %2317 = vst.msk [vmem:[#allocation2 + $0x118] sm:$0xff] %vm2281_vm8, %v2208_v49 }
 0x2d3   : > { %2293 = vst.msk [vmem:[#allocation2 + $0x58] sm:$0xff] %vm2281_vm8, %v2160_v2  ;;  %2512 = vrot.lane.b32.xlu1 %v3724_v47, %s3996_s10 }
 0x2d4   : > { %2464 = vrot.lane.b32.xlu0 %v3700_v46, %s3996_s10  ;;  %v3705_v46 = vld [vmem:[%s4041_s19 + $0xea] sm:$0xff] }
 0x2d5   : > { %v2497_v53 = vpop.permute.xlu1 %2496 }
 0x2d6   : > { %v2449_v11 = vpop.permute.xlu0 %2448  ;;  %2607 = vst.msk [vmem:[#allocation2 + $0x110] sm:$0xff] %vm2572_vm9, %v2497_v53 }
 0x2d7   : > { %2583 = vst.msk [vmem:[#allocation2 + $0x50] sm:$0xff] %vm2572_vm9, %v2449_v11  ;;  %2466 = vrot.lane.b32.xlu1 %v3701_v48, %s3996_s10 }
 0x2d8   : > { %1643 = vrot.lane.b32.xlu0 %v3723_v33, %s3993_s24  ;;  %v3608_v33 = vld [vmem:[%s4041_s19 + $0xe0] sm:$0xff] }
 0x2d9   : > { %v2451_v17 = vpop.permute.xlu1 %2450 }
 0x2da   : > { %v1628_v54 = vpop.permute.xlu0 %1627  ;;  %2584 = vst.msk [vmem:[#allocation2 + $0x58] sm:$0xff] %vm2572_vm9, %v2451_v17 }
 0x2db   : > { %1736 = vst.msk [vmem:[#allocation2 + $0x120] sm:$0xff] %vm1699_vm6, %v1628_v54  ;;  %1645 = vrot.lane.b32.xlu1 %v3724_v47, %s3993_s24  ;;  %v3729_v47 = vld [vmem:[%s4041_s19 + $0x1aa] sm:$0xff] }
 0x2dc   : > { %2514 = vrot.lane.b32.xlu0 %v3725_v22, %s3996_s10 }
 0x2dd   : > { %v1630_v8 = vpop.permute.xlu1 %1629  ;;  %v2655_v15 = vld [vmem:[#allocation2 + $0x110] sm:$0xff] }
 0x2de   : > { %v2499_v52 = vpop.permute.xlu0 %2498  ;;  %v2631_v56 = vld [vmem:[#allocation2 + $0x50] sm:$0xff]  ;;  %1737 = vst.msk [vmem:[#allocation2 + $0x128] sm:$0xff] %vm1699_vm6, %v1630_v8  ;;  %3896 = vmatprep.mubr.msk.f32.mxu1 %vm2681_vm10, %v2655_v15 }
 0x2df   : > { %2608 = vst.msk [vmem:[#allocation2 + $0x118] sm:$0xff] %vm2572_vm9, %v2499_v52  ;;  %3860 = vmatprep.mubr.msk.f32.mxu0 %vm2681_vm10, %v2631_v56  ;;  %1934 = vrot.lane.b32.xlu1 %v3630_v62, %s3994_s25 }
 0x2e0   : > { %1886 = vrot.lane.b32.xlu0 %v3606_v5, %s3994_s25 }
 0x2e1   : > { %v1919_v63 = vpop.permute.xlu1 %1918  ;;  %v2632_v20 = vld [vmem:[#allocation2 + $0x58] sm:$0xff] }
 0x2e2   : > { %v1871_v61 = vpop.permute.xlu0 %1870  ;;  %2027 = vst.msk [vmem:[#allocation2 + $0x120] sm:$0xff] %vm1990_vm7, %v1919_v63  ;;  %3861 = vmatmul.mubr.msk.f32.gmra.mrb[10].mxu0 %vm2681_vm10, %v2632_v20  ;;  %v5518_v20 = vld [vmem:[%s5742_s2] ss:$0 sm:$0xff] }
 0x2e3   : > { %2003 = vst.msk [vmem:[#allocation2 + $0x60] sm:$0xff] %vm1990_vm7, %v1871_v61  ;;  %1936 = vrot.lane.b32.xlu1 %v3631_v57, %s3994_s25 }
 0x2e4   : > { %1888 = vrot.lane.b32.xlu0 %v3607_v23, %s3994_s25 }
 0x2e5   : > { %v1921_v4 = vpop.permute.xlu1 %1920 }
 0x2e6   : > { %v1873_v30 = vpop.permute.xlu0 %1872  ;;  %v2656_v9 = vld [vmem:[#allocation2 + $0x118] sm:$0xff]  ;;  %2028 = vst.msk [vmem:[#allocation2 + $0x128] sm:$0xff] %vm1990_vm7, %v1921_v4 }
 0x2e7   : > { %2004 = vst.msk [vmem:[#allocation2 + $0x68] sm:$0xff] %vm1990_vm7, %v1873_v30  ;;  %3897 = vmatmul.mubr.msk.f32.gmra.mrb[10].mxu1 %vm2681_vm10, %v2656_v9  ;;  %2225 = vrot.lane.b32.xlu1 %v3678_v12, %s3995_s7 }
 0x2e8   : > { %2177 = vrot.lane.b32.xlu0 %v3654_v60, %s3995_s7 }
 0x2e9   : > { %v2210_v50 = vpop.permute.xlu1 %2209 }
 0x2ea   : > { %v2162_v45 = vpop.permute.xlu0 %2161  ;;  %2318 = vst.msk [vmem:[#allocation2 + $0x120] sm:$0xff] %vm2281_vm8, %v2210_v50 }
 0x2eb   : > { %2294 = vst.msk [vmem:[#allocation2 + $0x60] sm:$0xff] %vm2281_vm8, %v2162_v45  ;;  %2227 = vrot.lane.b32.xlu1 %v3679_v0, %s3995_s7 }
 0x2ec   : > { %2179 = vrot.lane.b32.xlu0 %v3655_v35, %s3995_s7 }
 0x2ed   : > { %v2212_v59 = vpop.permute.xlu1 %2211 }
 0x2ee   : > { %v2164_v18 = vpop.permute.xlu0 %2163  ;;  %2319 = vst.msk [vmem:[#allocation2 + $0x128] sm:$0xff] %vm2281_vm8, %v2212_v59 }
 0x2ef   : > { %2295 = vst.msk [vmem:[#allocation2 + $0x68] sm:$0xff] %vm2281_vm8, %v2164_v18  ;;  %2516 = vrot.lane.b32.xlu1 %v3726_v7, %s3996_s10 }
 0x2f0   : > { %2468 = vrot.lane.b32.xlu0 %v3702_v51, %s3996_s10 }
 0x2f1   : > { %v2501_v55 = vpop.permute.xlu1 %2500 }
 0x2f2   : > { %v2453_v29 = vpop.permute.xlu0 %2452  ;;  %2609 = vst.msk [vmem:[#allocation2 + $0x120] sm:$0xff] %vm2572_vm9, %v2501_v55 }
 0x2f3   : > { %2585 = vst.msk [vmem:[#allocation2 + $0x60] sm:$0xff] %vm2572_vm9, %v2453_v29  ;;  %2470 = vrot.lane.b32.xlu1 %v3703_v6, %s3996_s10 }
 0x2f4   : > { %1647 = vrot.lane.b32.xlu0 %v3725_v22, %s3993_s24 }
 0x2f5   : > { %v2455_v27 = vpop.permute.xlu1 %2454 }
 0x2f6   : > { %v1632_v26 = vpop.permute.xlu0 %1631  ;;  %2586 = vst.msk [vmem:[#allocation2 + $0x68] sm:$0xff] %vm2572_vm9, %v2455_v27 }
 0x2f7   : > { %1738 = vst.msk [vmem:[#allocation2 + $0x130] sm:$0xff] %vm1699_vm6, %v1632_v26  ;;  %1649 = vrot.lane.b32.xlu1 %v3726_v7, %s3993_s24 }
 0x2f8   : > { %2518 = vrot.lane.b32.xlu0 %v3727_v16, %s3996_s10 }
 0x2f9   : > { %v1634_v32 = vpop.permute.xlu1 %1633  ;;  %v2657_v28 = vld [vmem:[#allocation2 + $0x120] sm:$0xff] }
 0x2fa   : > { %v2503_v10 = vpop.permute.xlu0 %2502  ;;  %v2633_v13 = vld [vmem:[#allocation2 + $0x60] sm:$0xff]  ;;  %1739 = vst.msk [vmem:[#allocation2 + $0x138] sm:$0xff] %vm1699_vm6, %v1634_v32  ;;  %3899 = vmatprep.mubr.msk.f32.mxu1 %vm2681_vm10, %v2657_v28 }
 0x2fb   : > { %2610 = vst.msk [vmem:[#allocation2 + $0x128] sm:$0xff] %vm2572_vm9, %v2503_v10  ;;  %3863 = vmatprep.mubr.msk.f32.mxu0 %vm2681_vm10, %v2633_v13  ;;  %1938 = vrot.lane.b32.xlu1 %v3632_v44, %s3994_s25 }
 0x2fc   : > { %1890 = vrot.lane.b32.xlu0 %v3608_v33, %s3994_s25 }
 0x2fd   : > { %v1923_v31 = vpop.permute.xlu1 %1922  ;;  %v2634_v39 = vld [vmem:[#allocation2 + $0x68] sm:$0xff] }
 0x2fe   : > { %v1875_v1 = vpop.permute.xlu0 %1874  ;;  %2029 = vst.msk [vmem:[#allocation2 + $0x130] sm:$0xff] %vm1990_vm7, %v1923_v31  ;;  %3864 = vmatmul.mubr.msk.f32.gmra.mrb[12].mxu0 %vm2681_vm10, %v2634_v39 }
 0x2ff   : > { %2005 = vst.msk [vmem:[#allocation2 + $0x70] sm:$0xff] %vm1990_vm7, %v1875_v1  ;;  %1940 = vrot.lane.b32.xlu1 %v3633_v58, %s3994_s25 }
 0x300   : > { %1892 = vrot.lane.b32.xlu0 %v3609_v36, %s3994_s25 }
 0x301   : > { %v1925_v19 = vpop.permute.xlu1 %1924 }
 0x302   : > { %v1877_v37 = vpop.permute.xlu0 %1876  ;;  %v2658_v24 = vld [vmem:[#allocation2 + $0x128] sm:$0xff]  ;;  %2030 = vst.msk [vmem:[#allocation2 + $0x138] sm:$0xff] %vm1990_vm7, %v1925_v19 }
 0x303   : > { %2006 = vst.msk [vmem:[#allocation2 + $0x78] sm:$0xff] %vm1990_vm7, %v1877_v37  ;;  %3900 = vmatmul.mubr.msk.f32.gmra.mrb[12].mxu1 %vm2681_vm10, %v2658_v24  ;;  %2229 = vrot.lane.b32.xlu1 %v3680_v3, %s3995_s7 }
 0x304   : > { %2181 = vrot.lane.b32.xlu0 %v3656_v34, %s3995_s7 }
 0x305   : > { %v2214_v14 = vpop.permute.xlu1 %2213 }
 0x306   : > { %v2166_v21 = vpop.permute.xlu0 %2165  ;;  %2320 = vst.msk [vmem:[#allocation2 + $0x130] sm:$0xff] %vm2281_vm8, %v2214_v14 }
 0x307   : > { %2296 = vst.msk [vmem:[#allocation2 + $0x70] sm:$0xff] %vm2281_vm8, %v2166_v21  ;;  %2231 = vrot.lane.b32.xlu1 %v3681_v38, %s3995_s7 }
 0x308   : > { %2183 = vrot.lane.b32.xlu0 %v3657_v41, %s3995_s7 }
 0x309   : > { %v2216_v43 = vpop.permute.xlu1 %2215 }
 0x30a   : > { %v2168_v42 = vpop.permute.xlu0 %2167  ;;  %2321 = vst.msk [vmem:[#allocation2 + $0x138] sm:$0xff] %vm2281_vm8, %v2216_v43 }
 0x30b   : > { %2297 = vst.msk [vmem:[#allocation2 + $0x78] sm:$0xff] %vm2281_vm8, %v2168_v42  ;;  %2520 = vrot.lane.b32.xlu1 %v3728_v40, %s3996_s10 }
 0x30c   : > { %2472 = vrot.lane.b32.xlu0 %v3704_v25, %s3996_s10 }
 0x30d   : > { %v2505_v49 = vpop.permute.xlu1 %2504 }
 0x30e   : > { %v2457_v2 = vpop.permute.xlu0 %2456  ;;  %2611 = vst.msk [vmem:[#allocation2 + $0x130] sm:$0xff] %vm2572_vm9, %v2505_v49 }
 0x30f   : > { %2587 = vst.msk [vmem:[#allocation2 + $0x70] sm:$0xff] %vm2572_vm9, %v2457_v2  ;;  %2522 = vrot.lane.b32.xlu1 %v3729_v47, %s3996_s10 }
 0x310   : > { %2474 = vrot.lane.b32.xlu0 %v3705_v46, %s3996_s10 }
 0x311   : > { %v2459_v48 = vpop.permute.xlu1 %2458 }
 0x312   : > { %v1636_v53 = vpop.permute.xlu0 %1635  ;;  %2588 = vst.msk [vmem:[#allocation2 + $0x78] sm:$0xff] %vm2572_vm9, %v2459_v48 }
 0x313   : > { %1740 = vst.msk [vmem:[#allocation2 + $0x140] sm:$0xff] %vm1699_vm6, %v1636_v53 }
 0x315   : > { %v1638_v11 = vpop.permute.xlu1 %1637  ;;  %v2659_v54 = vld [vmem:[#allocation2 + $0x130] sm:$0xff] }
 0x316   : > { %v2507_v22 = vpop.permute.xlu0 %2506  ;;  %v2635_v17 = vld [vmem:[#allocation2 + $0x70] sm:$0xff]  ;;  %1741 = vst.msk [vmem:[#allocation2 + $0x148] sm:$0xff] %vm1699_vm6, %v1638_v11  ;;  %3902 = vmatprep.mubr.msk.f32.mxu1 %vm2681_vm10, %v2659_v54 }
 0x317   : > { %2612 = vst.msk [vmem:[#allocation2 + $0x138] sm:$0xff] %vm2572_vm9, %v2507_v22  ;;  %3866 = vmatprep.mubr.msk.f32.mxu0 %vm2681_vm10, %v2635_v17 }
 0x319   : > { %v1927_v62 = vpop.permute.xlu1 %1926  ;;  %v2636_v8 = vld [vmem:[#allocation2 + $0x78] sm:$0xff] }
 0x31a   : > { %v1879_v5 = vpop.permute.xlu0 %1878  ;;  %2031 = vst.msk [vmem:[#allocation2 + $0x140] sm:$0xff] %vm1990_vm7, %v1927_v62  ;;  %3867 = vmatmul.mubr.msk.f32.gmra.mrb[14].mxu0 %vm2681_vm10, %v2636_v8 }
 0x31b   : > { %2007 = vst.msk [vmem:[#allocation2 + $0x80] sm:$0xff] %vm1990_vm7, %v1879_v5 }
 0x31d   : > { %v1929_v52 = vpop.permute.xlu1 %1928 }
 0x31e   : > { %v1881_v56 = vpop.permute.xlu0 %1880  ;;  %v2660_v15 = vld [vmem:[#allocation2 + $0x138] sm:$0xff]  ;;  %2032 = vst.msk [vmem:[#allocation2 + $0x148] sm:$0xff] %vm1990_vm7, %v1929_v52 }
 0x31f   : > { %2008 = vst.msk [vmem:[#allocation2 + $0x88] sm:$0xff] %vm1990_vm7, %v1881_v56  ;;  %3903 = vmatmul.mubr.msk.f32.gmra.mrb[14].mxu1 %vm2681_vm10, %v2660_v15 }
 0x321   : > { %v2218_v57 = vpop.permute.xlu1 %2217 }
 0x322   : > { %v2170_v23 = vpop.permute.xlu0 %2169  ;;  %2322 = vst.msk [vmem:[#allocation2 + $0x140] sm:$0xff] %vm2281_vm8, %v2218_v57 }
 0x323   : > { %2298 = vst.msk [vmem:[#allocation2 + $0x80] sm:$0xff] %vm2281_vm8, %v2170_v23 }
 0x325   : > { %v2220_v63 = vpop.permute.xlu1 %2219 }
 0x326   : > { %v2172_v61 = vpop.permute.xlu0 %2171  ;;  %2323 = vst.msk [vmem:[#allocation2 + $0x148] sm:$0xff] %vm2281_vm8, %v2220_v63 }
 0x327   : > { %2299 = vst.msk [vmem:[#allocation2 + $0x88] sm:$0xff] %vm2281_vm8, %v2172_v61 }
 0x329   : > { %v2509_v12 = vpop.permute.xlu1 %2508  ;;  %v3847_v4 = vpop.f32.mrb[0].mxu0 }
 0x32a   : > { %v2461_v60 = vpop.permute.xlu0 %2460  ;;  %2613 = vst.msk [vmem:[#allocation2 + $0x140] sm:$0xff] %vm2572_vm9, %v2509_v12  ;;  %v2902_v30 = vadd.f32 %v3847_v4, %v5518_v20  ;;  %v2896_v9 = vpop.f32.mrb[1].mxu0 }
 0x32b   : > { %2589 = vst.msk [vmem:[#allocation2 + $0x80] sm:$0xff] %vm2572_vm9, %v2461_v60  ;;  %v2897_v0 = vadd.f32 %v5518_v20, %v2896_v9 }
 0x32c   : > { %v3136_v35 = vmax.f32 %v2902_v30, 0.0 }
 0x32d   : > { %v2463_v50 = vpop.permute.xlu1 %2462  ;;  %v3135_v7 = vmax.f32 %v2897_v0, 0.0 }
 0x32e   : > { %v1640_v45 = vpop.permute.xlu0 %1639  ;;  %2590 = vst.msk [vmem:[#allocation2 + $0x88] sm:$0xff] %vm2572_vm9, %v2463_v50  ;;  %v3883_v51 = vpop.f32.mrb[0].mxu1 }
 0x32f   : > { %1742 = vst.msk [vmem:[#allocation2 + $0x150] sm:$0xff] %vm1699_vm6, %v1640_v45  ;;  %v3022_v59 = vadd.f32 %v3883_v51, %v5518_v20  ;;  %v3016_v18 = vpop.f32.mrb[1].mxu1 }
 0x330   : > { %3185 = vst.msk [vmem:[%s5526_s20 + $0x8] sm:$0xff] %vm3183_vm11, %v3136_v35  ;;  %3184 = vst.msk [vmem:[%s5526_s20] sm:$0xff] %vm3183_vm11, %v3135_v7  ;;  %v3017_v6 = vadd.f32 %v5518_v20, %v3016_v18 }
 0x331   : > { %v3160_v55 = vmax.f32 %v3022_v59, 0.0  ;;  %v1642_v29 = vpop.permute.xlu1 %1641  ;;  %v2661_v26 = vld [vmem:[#allocation2 + $0x140] sm:$0xff] }
 0x332   : > { %v2511_v16 = vpop.permute.xlu0 %2510  ;;  %v2637_v27 = vld [vmem:[#allocation2 + $0x80] sm:$0xff]  ;;  %v3159_v44 = vmax.f32 %v3017_v6, 0.0  ;;  %1743 = vst.msk [vmem:[#allocation2 + $0x158] sm:$0xff] %vm1699_vm6, %v1642_v29  ;;  %3905 = vmatprep.mubr.msk.f32.mxu1 %vm2681_vm10, %v2661_v26 }
 0x333   : > { %2614 = vst.msk [vmem:[#allocation2 + $0x148] sm:$0xff] %vm2572_vm9, %v2511_v16  ;;  %3869 = vmatprep.mubr.msk.f32.mxu0 %vm2681_vm10, %v2637_v27 }
 0x334   : > { %3209 = vst.msk [vmem:[%s5526_s20 + $0xc8] sm:$0xff] %vm3183_vm11, %v3160_v55  ;;  %3208 = vst.msk [vmem:[%s5526_s20 + $0xc0] sm:$0xff] %vm3183_vm11, %v3159_v44 }
 0x335   : > { %v1931_v33 = vpop.permute.xlu1 %1930  ;;  %v2638_v10 = vld [vmem:[#allocation2 + $0x88] sm:$0xff] }
 0x336   : > { %v1883_v32 = vpop.permute.xlu0 %1882  ;;  %2033 = vst.msk [vmem:[#allocation2 + $0x150] sm:$0xff] %vm1990_vm7, %v1931_v33  ;;  %3870 = vmatmul.mubr.msk.f32.gmra.mrb[16].mxu0 %vm2681_vm10, %v2638_v10 }
 0x337   : > { %2009 = vst.msk [vmem:[#allocation2 + $0x90] sm:$0xff] %vm1990_vm7, %v1883_v32 }
 0x339   : > { %v1933_v13 = vpop.permute.xlu1 %1932 }
 0x33a   : > { %v1885_v28 = vpop.permute.xlu0 %1884  ;;  %v2662_v58 = vld [vmem:[#allocation2 + $0x148] sm:$0xff]  ;;  %2034 = vst.msk [vmem:[#allocation2 + $0x158] sm:$0xff] %vm1990_vm7, %v1933_v13 }
 0x33b   : > { %2010 = vst.msk [vmem:[#allocation2 + $0x98] sm:$0xff] %vm1990_vm7, %v1885_v28  ;;  %3906 = vmatmul.mubr.msk.f32.gmra.mrb[16].mxu1 %vm2681_vm10, %v2662_v58 }
 0x33d   : > { %v2222_v36 = vpop.permute.xlu1 %2221 }
 0x33e   : > { %v2174_v31 = vpop.permute.xlu0 %2173  ;;  %2324 = vst.msk [vmem:[#allocation2 + $0x150] sm:$0xff] %vm2281_vm8, %v2222_v36 }
 0x33f   : > { %2300 = vst.msk [vmem:[#allocation2 + $0x90] sm:$0xff] %vm2281_vm8, %v2174_v31 }
 0x341   : > { %v2224_v1 = vpop.permute.xlu1 %2223 }
 0x342   : > { %v2176_v39 = vpop.permute.xlu0 %2175  ;;  %2325 = vst.msk [vmem:[#allocation2 + $0x158] sm:$0xff] %vm2281_vm8, %v2224_v1 }
 0x343   : > { %2301 = vst.msk [vmem:[#allocation2 + $0x98] sm:$0xff] %vm2281_vm8, %v2176_v39 }
 0x345   : > { %v2513_v3 = vpop.permute.xlu1 %2512  ;;  %v3850_v19 = vpop.f32.mrb[2].mxu0 }
 0x346   : > { %v2465_v34 = vpop.permute.xlu0 %2464  ;;  %2615 = vst.msk [vmem:[#allocation2 + $0x150] sm:$0xff] %vm2572_vm9, %v2513_v3  ;;  %v2912_v37 = vadd.f32 %v3850_v19, %v5518_v20  ;;  %v2906_v24 = vpop.f32.mrb[3].mxu0 }
 0x347   : > { %2591 = vst.msk [vmem:[#allocation2 + $0x90] sm:$0xff] %vm2572_vm9, %v2465_v34  ;;  %v2907_v38 = vadd.f32 %v5518_v20, %v2906_v24 }
 0x348   : > { %v3138_v41 = vmax.f32 %v2912_v37, 0.0 }
 0x349   : > { %v2467_v14 = vpop.permute.xlu1 %2466  ;;  %v3137_v40 = vmax.f32 %v2907_v38, 0.0 }
 0x34a   : > { %v1644_v21 = vpop.permute.xlu0 %1643  ;;  %2592 = vst.msk [vmem:[#allocation2 + $0x98] sm:$0xff] %vm2572_vm9, %v2467_v14  ;;  %v3886_v25 = vpop.f32.mrb[2].mxu1 }
 0x34b   : > { %1744 = vst.msk [vmem:[#allocation2 + $0x160] sm:$0xff] %vm1699_vm6, %v1644_v21  ;;  %v3032_v43 = vadd.f32 %v3886_v25, %v5518_v20  ;;  %v3026_v42 = vpop.f32.mrb[3].mxu1 }
 0x34c   : > { %3187 = vst.msk [vmem:[%s5526_s20 + $0x18] sm:$0xff] %vm3183_vm11, %v3138_v41  ;;  %3186 = vst.msk [vmem:[%s5526_s20 + $0x10] sm:$0xff] %vm3183_vm11, %v3137_v40  ;;  %v3027_v47 = vadd.f32 %v5518_v20, %v3026_v42 }
 0x34d   : > { %v3162_v46 = vmax.f32 %v3032_v43, 0.0  ;;  %v1646_v49 = vpop.permute.xlu1 %1645  ;;  %v2663_v53 = vld [vmem:[#allocation2 + $0x150] sm:$0xff] }
 0x34e   : > { %v2515_v2 = vpop.permute.xlu0 %2514  ;;  %v2639_v48 = vld [vmem:[#allocation2 + $0x90] sm:$0xff]  ;;  %v3161_v11 = vmax.f32 %v3027_v47, 0.0  ;;  %1745 = vst.msk [vmem:[#allocation2 + $0x168] sm:$0xff] %vm1699_vm6, %v1646_v49  ;;  %3908 = vmatprep.mubr.msk.f32.mxu1 %vm2681_vm10, %v2663_v53 }
 0x34f   : > { %2616 = vst.msk [vmem:[#allocation2 + $0x158] sm:$0xff] %vm2572_vm9, %v2515_v2  ;;  %3872 = vmatprep.mubr.msk.f32.mxu0 %vm2681_vm10, %v2639_v48 }
 0x350   : > { %3211 = vst.msk [vmem:[%s5526_s20 + $0xd8] sm:$0xff] %vm3183_vm11, %v3162_v46  ;;  %3210 = vst.msk [vmem:[%s5526_s20 + $0xd0] sm:$0xff] %vm3183_vm11, %v3161_v11 }
 0x351   : > { %v1935_v22 = vpop.permute.xlu1 %1934  ;;  %v2640_v54 = vld [vmem:[#allocation2 + $0x98] sm:$0xff] }
 0x352   : > { %v1887_v17 = vpop.permute.xlu0 %1886  ;;  %2035 = vst.msk [vmem:[#allocation2 + $0x160] sm:$0xff] %vm1990_vm7, %v1935_v22  ;;  %3873 = vmatmul.mubr.msk.f32.gmra.mrb[18].mxu0 %vm2681_vm10, %v2640_v54 }
 0x353   : > { %2011 = vst.msk [vmem:[#allocation2 + $0xa0] sm:$0xff] %vm1990_vm7, %v1887_v17 }
 0x355   : > { %v1937_v62 = vpop.permute.xlu1 %1936 }
 0x356   : > { %v1889_v5 = vpop.permute.xlu0 %1888  ;;  %v2664_v8 = vld [vmem:[#allocation2 + $0x158] sm:$0xff]  ;;  %2036 = vst.msk [vmem:[#allocation2 + $0x168] sm:$0xff] %vm1990_vm7, %v1937_v62 }
 0x357   : > { %2012 = vst.msk [vmem:[#allocation2 + $0xa8] sm:$0xff] %vm1990_vm7, %v1889_v5  ;;  %3909 = vmatmul.mubr.msk.f32.gmra.mrb[18].mxu1 %vm2681_vm10, %v2664_v8 }
 0x359   : > { %v2226_v52 = vpop.permute.xlu1 %2225 }
 0x35a   : > { %v2178_v56 = vpop.permute.xlu0 %2177  ;;  %2326 = vst.msk [vmem:[#allocation2 + $0x160] sm:$0xff] %vm2281_vm8, %v2226_v52 }
 0x35b   : > { %2302 = vst.msk [vmem:[#allocation2 + $0xa0] sm:$0xff] %vm2281_vm8, %v2178_v56 }
 0x35d   : > { %v2228_v15 = vpop.permute.xlu1 %2227 }
 0x35e   : > { %v2180_v57 = vpop.permute.xlu0 %2179  ;;  %2327 = vst.msk [vmem:[#allocation2 + $0x168] sm:$0xff] %vm2281_vm8, %v2228_v15 }
 0x35f   : > { %2303 = vst.msk [vmem:[#allocation2 + $0xa8] sm:$0xff] %vm2281_vm8, %v2180_v57 }
 0x361   : > { %v2517_v23 = vpop.permute.xlu1 %2516  ;;  %v3853_v61 = vpop.f32.mrb[4].mxu0 }
 0x362   : > { %v2469_v63 = vpop.permute.xlu0 %2468  ;;  %2617 = vst.msk [vmem:[#allocation2 + $0x160] sm:$0xff] %vm2572_vm9, %v2517_v23  ;;  %v2922_v12 = vadd.f32 %v3853_v61, %v5518_v20  ;;  %v2916_v60 = vpop.f32.mrb[5].mxu0 }
 0x363   : > { %2593 = vst.msk [vmem:[#allocation2 + $0xa0] sm:$0xff] %vm2572_vm9, %v2469_v63  ;;  %v2917_v4 = vadd.f32 %v5518_v20, %v2916_v60 }
 0x364   : > { %v3140_v30 = vmax.f32 %v2922_v12, 0.0 }
 0x365   : > { %v2471_v9 = vpop.permute.xlu1 %2470  ;;  %v3139_v35 = vmax.f32 %v2917_v4, 0.0 }
 0x366   : > { %v1648_v0 = vpop.permute.xlu0 %1647  ;;  %2594 = vst.msk [vmem:[#allocation2 + $0xa8] sm:$0xff] %vm2572_vm9, %v2471_v9  ;;  %v3889_v50 = vpop.f32.mrb[4].mxu1 }
 0x367   : > { %1746 = vst.msk [vmem:[#allocation2 + $0x170] sm:$0xff] %vm1699_vm6, %v1648_v0  ;;  %v3042_v45 = vadd.f32 %v3889_v50, %v5518_v20  ;;  %v3036_v7 = vpop.f32.mrb[5].mxu1 }
 0x368   : > { %3189 = vst.msk [vmem:[%s5526_s20 + $0x28] sm:$0xff] %vm3183_vm11, %v3140_v30  ;;  %3188 = vst.msk [vmem:[%s5526_s20 + $0x20] sm:$0xff] %vm3183_vm11, %v3139_v35  ;;  %v3037_v51 = vadd.f32 %v5518_v20, %v3036_v7 }
 0x369   : > { %v3164_v59 = vmax.f32 %v3042_v45, 0.0  ;;  %v1650_v18 = vpop.permute.xlu1 %1649  ;;  %v2665_v29 = vld [vmem:[#allocation2 + $0x160] sm:$0xff] }
 0x36a   : > { %v2519_v6 = vpop.permute.xlu0 %2518  ;;  %v2641_v55 = vld [vmem:[#allocation2 + $0xa0] sm:$0xff]  ;;  %v3163_v16 = vmax.f32 %v3037_v51, 0.0  ;;  %1747 = vst.msk [vmem:[#allocation2 + $0x178] sm:$0xff] %vm1699_vm6, %v1650_v18  ;;  %3911 = vmatprep.mubr.msk.f32.mxu1 %vm2681_vm10, %v2665_v29 }
 0x36b   : > { %2618 = vst.msk [vmem:[#allocation2 + $0x168] sm:$0xff] %vm2572_vm9, %v2519_v6  ;;  %3875 = vmatprep.mubr.msk.f32.mxu0 %vm2681_vm10, %v2641_v55 }
 0x36c   : > { %3213 = vst.msk [vmem:[%s5526_s20 + $0xe8] sm:$0xff] %vm3183_vm11, %v3164_v59  ;;  %3212 = vst.msk [vmem:[%s5526_s20 + $0xe0] sm:$0xff] %vm3183_vm11, %v3163_v16 }
 0x36d   : > { %v1939_v27 = vpop.permute.xlu1 %1938  ;;  %v2642_v44 = vld [vmem:[#allocation2 + $0xa8] sm:$0xff] }
 0x36e   : > { %v1891_v26 = vpop.permute.xlu0 %1890  ;;  %2037 = vst.msk [vmem:[#allocation2 + $0x170] sm:$0xff] %vm1990_vm7, %v1939_v27  ;;  %3876 = vmatmul.mubr.msk.f32.gmra.mrb[20].mxu0 %vm2681_vm10, %v2642_v44 }
 0x36f   : > { %2013 = vst.msk [vmem:[#allocation2 + $0xb0] sm:$0xff] %vm1990_vm7, %v1891_v26 }
 0x371   : > { %v1941_v33 = vpop.permute.xlu1 %1940 }
 0x372   : > { %v1893_v32 = vpop.permute.xlu0 %1892  ;;  %v2666_v10 = vld [vmem:[#allocation2 + $0x168] sm:$0xff]  ;;  %2038 = vst.msk [vmem:[#allocation2 + $0x178] sm:$0xff] %vm1990_vm7, %v1941_v33 }
 0x373   : > { %2014 = vst.msk [vmem:[#allocation2 + $0xb8] sm:$0xff] %vm1990_vm7, %v1893_v32  ;;  %3912 = vmatmul.mubr.msk.f32.gmra.mrb[20].mxu1 %vm2681_vm10, %v2666_v10 }
 0x375   : > { %v2230_v13 = vpop.permute.xlu1 %2229 }
 0x376   : > { %v2182_v28 = vpop.permute.xlu0 %2181  ;;  %2328 = vst.msk [vmem:[#allocation2 + $0x170] sm:$0xff] %vm2281_vm8, %v2230_v13 }
 0x377   : > { %2304 = vst.msk [vmem:[#allocation2 + $0xb0] sm:$0xff] %vm2281_vm8, %v2182_v28 }
 0x379   : > { %v2232_v58 = vpop.permute.xlu1 %2231 }
 0x37a   : > { %v2184_v36 = vpop.permute.xlu0 %2183  ;;  %2329 = vst.msk [vmem:[#allocation2 + $0x178] sm:$0xff] %vm2281_vm8, %v2232_v58 }
 0x37b   : > { %2305 = vst.msk [vmem:[#allocation2 + $0xb8] sm:$0xff] %vm2281_vm8, %v2184_v36 }
 0x37d   : > { %v2521_v31 = vpop.permute.xlu1 %2520  ;;  %v3856_v39 = vpop.f32.mrb[6].mxu0 }
 0x37e   : > { %v2473_v1 = vpop.permute.xlu0 %2472  ;;  %2619 = vst.msk [vmem:[#allocation2 + $0x170] sm:$0xff] %vm2572_vm9, %v2521_v31  ;;  %v2932_v3 = vadd.f32 %v3856_v39, %v5518_v20  ;;  %v2926_v34 = vpop.f32.mrb[7].mxu0 }
 0x37f   : > { %2595 = vst.msk [vmem:[#allocation2 + $0xb0] sm:$0xff] %vm2572_vm9, %v2473_v1  ;;  %v2927_v19 = vadd.f32 %v5518_v20, %v2926_v34 }
 0x380   : > { %v3142_v37 = vmax.f32 %v2932_v3, 0.0 }
 0x381   : > { %v2523_v24 = vpop.permute.xlu1 %2522  ;;  %v3141_v41 = vmax.f32 %v2927_v19, 0.0 }
 0x382   : > { %v2475_v38 = vpop.permute.xlu0 %2474  ;;  %2620 = vst.msk [vmem:[#allocation2 + $0x178] sm:$0xff] %vm2572_vm9, %v2523_v24  ;;  %v3892_v14 = vpop.f32.mrb[6].mxu1 }
 0x383   : > { %2596 = vst.msk [vmem:[#allocation2 + $0xb8] sm:$0xff] %vm2572_vm9, %v2475_v38  ;;  %v3052_v21 = vadd.f32 %v3892_v14, %v5518_v20  ;;  %v3046_v40 = vpop.f32.mrb[7].mxu1 }
 0x384   : > { %3191 = vst.msk [vmem:[%s5526_s20 + $0x38] sm:$0xff] %vm3183_vm11, %v3142_v37  ;;  %3190 = vst.msk [vmem:[%s5526_s20 + $0x30] sm:$0xff] %vm3183_vm11, %v3141_v41  ;;  %v3047_v25 = vadd.f32 %v5518_v20, %v3046_v40 }
 0x385   : > { %v3166_v43 = vmax.f32 %v3052_v21, 0.0  ;;  %v2667_v47 = vld [vmem:[#allocation2 + $0x170] sm:$0xff] }
 0x386   : > { %v2643_v42 = vld [vmem:[#allocation2 + $0xb0] sm:$0xff]  ;;  %v3165_v46 = vmax.f32 %v3047_v25, 0.0  ;;  %3914 = vmatprep.mubr.msk.f32.mxu1 %vm2681_vm10, %v2667_v47 }
 0x387   : > { %3878 = vmatprep.mubr.msk.f32.mxu0 %vm2681_vm10, %v2643_v42  ;;  %3215 = vst.msk [vmem:[%s5526_s20 + $0xf8] sm:$0xff] %vm3183_vm11, %v3166_v43 }
 0x388   : > { %3214 = vst.msk [vmem:[%s5526_s20 + $0xf0] sm:$0xff] %vm3183_vm11, %v3165_v46 }
 0x389   : > { %v2668_v2 = vld [vmem:[#allocation2 + $0x178] sm:$0xff] }
 0x38a   : > { %v2644_v49 = vld [vmem:[#allocation2 + $0xb8] sm:$0xff]  ;;  %3915 = vmatmul.mubr.msk.f32.gmra.mrb[22].mxu1 %vm2681_vm10, %v2668_v2 }
 0x38b   : > { %3879 = vmatmul.mubr.msk.f32.gmra.mrb[22].mxu0 %vm2681_vm10, %v2644_v49 }
 0x399   : > { %v3859_v48 = vpop.f32.mrb[8].mxu0 }
 0x39a   : > { %v2942_v53 = vadd.f32 %v3859_v48, %v5518_v20  ;;  %v2936_v11 = vpop.f32.mrb[9].mxu0 }
 0x39b   : > { %v2937_v22 = vadd.f32 %v5518_v20, %v2936_v11 }
 0x39c   : > { %v3144_v17 = vmax.f32 %v2942_v53, 0.0 }
 0x39d   : > { %v3143_v54 = vmax.f32 %v2937_v22, 0.0 }
 0x39e   : > { %v3895_v62 = vpop.f32.mrb[8].mxu1  ;;  %3193 = vst.msk [vmem:[%s5526_s20 + $0x48] sm:$0xff] %vm3183_vm11, %v3144_v17 }
 0x39f   : > { %v3062_v5 = vadd.f32 %v3895_v62, %v5518_v20  ;;  %v3056_v8 = vpop.f32.mrb[9].mxu1  ;;  %3192 = vst.msk [vmem:[%s5526_s20 + $0x40] sm:$0xff] %vm3183_vm11, %v3143_v54 }
 0x3a0   : > { %v3057_v52 = vadd.f32 %v5518_v20, %v3056_v8 }
 0x3a1   : > { %v3168_v56 = vmax.f32 %v3062_v5, 0.0 }
 0x3a2   : > { %v3167_v15 = vmax.f32 %v3057_v52, 0.0 }
 0x3a3   : > { %3217 = vst.msk [vmem:[%s5526_s20 + $0x108] sm:$0xff] %vm3183_vm11, %v3168_v56 }
 0x3a4   : > { %3216 = vst.msk [vmem:[%s5526_s20 + $0x100] sm:$0xff] %vm3183_vm11, %v3167_v15 }
 0x3b5   : > { %v3862_v57 = vpop.f32.mrb[10].mxu0 }
 0x3b6   : > { %v2952_v23 = vadd.f32 %v3862_v57, %v5518_v20  ;;  %v2946_v63 = vpop.f32.mrb[11].mxu0 }
 0x3b7   : > { %v2947_v61 = vadd.f32 %v5518_v20, %v2946_v63 }
 0x3b8   : > { %v3146_v12 = vmax.f32 %v2952_v23, 0.0 }
 0x3b9   : > { %v3145_v60 = vmax.f32 %v2947_v61, 0.0 }
 0x3ba   : > { %v3898_v4 = vpop.f32.mrb[10].mxu1  ;;  %3195 = vst.msk [vmem:[%s5526_s20 + $0x58] sm:$0xff] %vm3183_vm11, %v3146_v12 }
 0x3bb   : > { %v3072_v30 = vadd.f32 %v3898_v4, %v5518_v20  ;;  %v3066_v9 = vpop.f32.mrb[11].mxu1  ;;  %3194 = vst.msk [vmem:[%s5526_s20 + $0x50] sm:$0xff] %vm3183_vm11, %v3145_v60 }
 0x3bc   : > { %v3067_v0 = vadd.f32 %v5518_v20, %v3066_v9 }
 0x3bd   : > { %v3170_v35 = vmax.f32 %v3072_v30, 0.0 }
 0x3be   : > { %v3169_v50 = vmax.f32 %v3067_v0, 0.0 }
 0x3bf   : > { %3219 = vst.msk [vmem:[%s5526_s20 + $0x118] sm:$0xff] %vm3183_vm11, %v3170_v35 }
 0x3c0   : > { %3218 = vst.msk [vmem:[%s5526_s20 + $0x110] sm:$0xff] %vm3183_vm11, %v3169_v50 }
 0x3d1   : > { %v3865_v45 = vpop.f32.mrb[12].mxu0 }
 0x3d2   : > { %v2962_v7 = vadd.f32 %v3865_v45, %v5518_v20  ;;  %v2956_v51 = vpop.f32.mrb[13].mxu0 }
 0x3d3   : > { %v2957_v59 = vadd.f32 %v5518_v20, %v2956_v51 }
 0x3d4   : > { %v3148_v18 = vmax.f32 %v2962_v7, 0.0 }
 0x3d5   : > { %v3147_v6 = vmax.f32 %v2957_v59, 0.0 }
 0x3d6   : > { %v3901_v55 = vpop.f32.mrb[12].mxu1  ;;  %3197 = vst.msk [vmem:[%s5526_s20 + $0x68] sm:$0xff] %vm3183_vm11, %v3148_v18 }
 0x3d7   : > { %v3082_v29 = vadd.f32 %v3901_v55, %v5518_v20  ;;  %v3076_v16 = vpop.f32.mrb[13].mxu1  ;;  %3196 = vst.msk [vmem:[%s5526_s20 + $0x60] sm:$0xff] %vm3183_vm11, %v3147_v6 }
 0x3d8   : > { %v3077_v27 = vadd.f32 %v5518_v20, %v3076_v16 }
 0x3d9   : > { %v3172_v26 = vmax.f32 %v3082_v29, 0.0 }
 0x3da   : > { %v3171_v44 = vmax.f32 %v3077_v27, 0.0 }
 0x3db   : > { %3221 = vst.msk [vmem:[%s5526_s20 + $0x128] sm:$0xff] %vm3183_vm11, %v3172_v26 }
 0x3dc   : > { %3220 = vst.msk [vmem:[%s5526_s20 + $0x120] sm:$0xff] %vm3183_vm11, %v3171_v44 }
 0x3ed   : > { %v3868_v33 = vpop.f32.mrb[14].mxu0 }
 0x3ee   : > { %v2972_v32 = vadd.f32 %v3868_v33, %v5518_v20  ;;  %v2966_v10 = vpop.f32.mrb[15].mxu0 }
 0x3ef   : > { %v2967_v13 = vadd.f32 %v5518_v20, %v2966_v10 }
 0x3f0   : > { %v3150_v28 = vmax.f32 %v2972_v32, 0.0 }
 0x3f1   : > { %v3149_v58 = vmax.f32 %v2967_v13, 0.0 }
 0x3f2   : > { %v3904_v36 = vpop.f32.mrb[14].mxu1  ;;  %3199 = vst.msk [vmem:[%s5526_s20 + $0x78] sm:$0xff] %vm3183_vm11, %v3150_v28 }
 0x3f3   : > { %v3092_v31 = vadd.f32 %v3904_v36, %v5518_v20  ;;  %v3086_v1 = vpop.f32.mrb[15].mxu1  ;;  %3198 = vst.msk [vmem:[%s5526_s20 + $0x70] sm:$0xff] %vm3183_vm11, %v3149_v58 }
 0x3f4   : > { %v3087_v39 = vadd.f32 %v5518_v20, %v3086_v1 }
 0x3f5   : > { %v3174_v3 = vmax.f32 %v3092_v31, 0.0 }
 0x3f6   : > { %v3173_v34 = vmax.f32 %v3087_v39, 0.0 }
 0x3f7   : > { %3223 = vst.msk [vmem:[%s5526_s20 + $0x138] sm:$0xff] %vm3183_vm11, %v3174_v3 }
 0x3f8   : > { %3222 = vst.msk [vmem:[%s5526_s20 + $0x130] sm:$0xff] %vm3183_vm11, %v3173_v34 }
 0x409   : > { %v3871_v19 = vpop.f32.mrb[16].mxu0 }
 0x40a   : > { %v2982_v37 = vadd.f32 %v3871_v19, %v5518_v20  ;;  %v2976_v24 = vpop.f32.mrb[17].mxu0 }
 0x40b   : > { %v2977_v38 = vadd.f32 %v5518_v20, %v2976_v24 }
 0x40c   : > { %v3152_v41 = vmax.f32 %v2982_v37, 0.0 }
 0x40d   : > { %v3151_v14 = vmax.f32 %v2977_v38, 0.0 }
 0x40e   : > { %v3907_v21 = vpop.f32.mrb[16].mxu1  ;;  %3201 = vst.msk [vmem:[%s5526_s20 + $0x88] sm:$0xff] %vm3183_vm11, %v3152_v41 }
 0x40f   : > { %v3102_v40 = vadd.f32 %v3907_v21, %v5518_v20  ;;  %v3096_v25 = vpop.f32.mrb[17].mxu1  ;;  %3200 = vst.msk [vmem:[%s5526_s20 + $0x80] sm:$0xff] %vm3183_vm11, %v3151_v14 }
 0x410   : > { %v3097_v43 = vadd.f32 %v5518_v20, %v3096_v25 }
 0x411   : > { %v3176_v42 = vmax.f32 %v3102_v40, 0.0 }
 0x412   : > { %v3175_v47 = vmax.f32 %v3097_v43, 0.0 }
 0x413   : > { %3225 = vst.msk [vmem:[%s5526_s20 + $0x148] sm:$0xff] %vm3183_vm11, %v3176_v42 }
 0x414   : > { %3224 = vst.msk [vmem:[%s5526_s20 + $0x140] sm:$0xff] %vm3183_vm11, %v3175_v47 }
 0x425   : > { %v3874_v46 = vpop.f32.mrb[18].mxu0 }
 0x426   : > { %v2992_v49 = vadd.f32 %v3874_v46, %v5518_v20  ;;  %v2986_v2 = vpop.f32.mrb[19].mxu0 }
 0x427   : > { %v2987_v48 = vadd.f32 %v5518_v20, %v2986_v2 }
 0x428   : > { %v3154_v53 = vmax.f32 %v2992_v49, 0.0 }
 0x429   : > { %v3153_v11 = vmax.f32 %v2987_v48, 0.0 }
 0x42a   : > { %v3910_v22 = vpop.f32.mrb[18].mxu1  ;;  %3203 = vst.msk [vmem:[%s5526_s20 + $0x98] sm:$0xff] %vm3183_vm11, %v3154_v53 }
 0x42b   : > { %v3112_v17 = vadd.f32 %v3910_v22, %v5518_v20  ;;  %v3106_v54 = vpop.f32.mrb[19].mxu1  ;;  %3202 = vst.msk [vmem:[%s5526_s20 + $0x90] sm:$0xff] %vm3183_vm11, %v3153_v11 }
 0x42c   : > { %v3107_v62 = vadd.f32 %v5518_v20, %v3106_v54 }
 0x42d   : > { %v3178_v5 = vmax.f32 %v3112_v17, 0.0 }
 0x42e   : > { %v3177_v8 = vmax.f32 %v3107_v62, 0.0 }
 0x42f   : > { %3227 = vst.msk [vmem:[%s5526_s20 + $0x158] sm:$0xff] %vm3183_vm11, %v3178_v5 }
 0x430   : > { %3226 = vst.msk [vmem:[%s5526_s20 + $0x150] sm:$0xff] %vm3183_vm11, %v3177_v8 }
 0x441   : > { %v3877_v52 = vpop.f32.mrb[20].mxu0 }
 0x442   : > { %v3002_v56 = vadd.f32 %v3877_v52, %v5518_v20  ;;  %v2996_v15 = vpop.f32.mrb[21].mxu0 }
 0x443   : > { %v2997_v57 = vadd.f32 %v5518_v20, %v2996_v15 }
 0x444   : > { %v3156_v23 = vmax.f32 %v3002_v56, 0.0 }
 0x445   : > { %v3155_v63 = vmax.f32 %v2997_v57, 0.0 }
 0x446   : > { %v3913_v61 = vpop.f32.mrb[20].mxu1  ;;  %3205 = vst.msk [vmem:[%s5526_s20 + $0xa8] sm:$0xff] %vm3183_vm11, %v3156_v23 }
 0x447   : > { %v3122_v12 = vadd.f32 %v3913_v61, %v5518_v20  ;;  %v3116_v60 = vpop.f32.mrb[21].mxu1  ;;  %3204 = vst.msk [vmem:[%s5526_s20 + $0xa0] sm:$0xff] %vm3183_vm11, %v3155_v63 }
 0x448   : > { %v3117_v4 = vadd.f32 %v5518_v20, %v3116_v60 }
 0x449   : > { %v3180_v30 = vmax.f32 %v3122_v12, 0.0 }
 0x44a   : > { %v3179_v9 = vmax.f32 %v3117_v4, 0.0 }
 0x44b   : > { %3229 = vst.msk [vmem:[%s5526_s20 + $0x168] sm:$0xff] %vm3183_vm11, %v3180_v30 }
 0x44c   : > { %3228 = vst.msk [vmem:[%s5526_s20 + $0x160] sm:$0xff] %vm3183_vm11, %v3179_v9 }
 0x45d   : > { %v3916_v35 = vpop.f32.mrb[22].mxu1 }
 0x45e   : > { %v3880_v0 = vpop.f32.mrb[22].mxu0  ;;  %v3132_v45 = vadd.f32 %v3916_v35, %v5518_v20  ;;  %v3126_v51 = vpop.f32.mrb[23].mxu1 }
 0x45f   : > { %v3012_v50 = vadd.f32 %v3880_v0, %v5518_v20  ;;  %v3006_v7 = vpop.f32.mrb[23].mxu0  ;;  %v3127_v18 = vadd.f32 %v5518_v20, %v3126_v51 }
 0x460   : > { %v3007_v59 = vadd.f32 %v5518_v20, %v3006_v7  ;;  %v3182_v55 = vmax.f32 %v3132_v45, 0.0 }
 0x461   : > { %v3158_v6 = vmax.f32 %v3012_v50, 0.0  ;;  %v3181_v16 = vmax.f32 %v3127_v18, 0.0 }
 0x462   : > { %v3157_v29 = vmax.f32 %v3007_v59, 0.0  ;;  %3231 = vst.msk [vmem:[%s5526_s20 + $0x178] sm:$0xff] %vm3183_vm11, %v3182_v55 }
 0x463   : > { %3207 = vst.msk [vmem:[%s5526_s20 + $0xb8] sm:$0xff] %vm3183_vm11, %v3158_v6  ;;  %3230 = vst.msk [vmem:[%s5526_s20 + $0x170] sm:$0xff] %vm3183_vm11, %v3181_v16 }
 0x464   : > { %3206 = vst.msk [vmem:[%s5526_s20 + $0xb0] sm:$0xff] %vm3183_vm11, %v3157_v29 }
 0x465 PF: > { %s13_s14 = sadd.s32 1, %s3987_s14   ;;  %s5744_s12 = smov %s3983_s13 }
 0x466   : > { %p10_p5 = scmp.ge.s32.totalorder %s13_s14, 4   ;;  %s5745_s13 = smov %s5747_s15 }
 0x468   :  { %12 = sbr.rel (!%p10_p5) target bundleno = 2 (0x2), region = 71 }

</bundles_post_ra>
